<compile_context>
chip_gen: v7x
topology: tpu7x:2x2x1
jax: 0.10.0
libtpu: 0.0.40
codegen_flags: <defaults>
</compile_context>

<pallas_src>
import jax
import jax.numpy as jnp
import numpy as np
from jax.experimental import pallas as pl
from jax.experimental.pallas import tpu as pltpu


# ---------------- fused kernel builder (closed over #LSTM layers) ----------------
def _make_fused_kernel(num_lstm):
    def kernel(*refs):
        n_in = 3 + 2 * num_lstm + 2
        x_ref, cw_ref, cb_ref = refs[0], refs[1], refs[2]
        lstm_refs = refs[3:3 + 2 * num_lstm]          # (w_cat, bias) per layer
        fcw_ref = refs[n_in - 2]
        fcb_ref = refs[n_in - 1]
        out_ref = refs[n_in]
        inp_bufs = refs[n_in + 1:n_in + 1 + num_lstm]  # VMEM staging rows

        B, L = x_ref.shape
        KW, NK = cw_ref.shape
        T = L - KW + 1                     # conv output length == LSTM seq len

        x = x_ref[...]                     # (B, L)
        cw = cw_ref[...]                   # (KW, NK)
        cb = cb_ref[...]                   # (1, NK)

        # ---- Conv1d(in_ch=1) + ReLU: per-timestep (B, NK) tiles, kept on-chip ----
        seq = []
        for t in range(T):                 # static unroll (T is small)
            a = jnp.zeros((B, NK), jnp.float32)
            for w in range(KW):            # static unroll over kernel width
                a = a + x[:, t + w:t + w + 1] * cw[w:w + 1, :]
            seq.append(jnp.maximum(a + cb, 0.0))

        # ---- stacked LSTM layers; fully unrolled, h/c carried as values ----
        for layer in range(num_lstm):
            w_cat = lstm_refs[2 * layer][...]        # (In + H, 4H) = [W_ih; W_hh]
            bias = lstm_refs[2 * layer + 1][...]     # (1, 4H)
            buf = inp_bufs[layer]                    # VMEM (B, In + H)
            H = w_cat.shape[1] // 4
            In = buf.shape[1] - H

            h = jnp.zeros((B, H), jnp.float32)
            c = jnp.zeros((B, H), jnp.float32)
            outs = []
            for x_t in seq:
                # stage [x_t, h] into one row -> single fused gate matmul
                buf[:, 0:In] = x_t
                buf[:, In:In + H] = h
                gates = jnp.dot(buf[...], w_cat,
                                preferred_element_type=jnp.float32) + bias
                # full-vreg activations (2 EUP pushes), then static lane slices
                sig = jax.nn.sigmoid(gates)
                tnh = jnp.tanh(gates)
                # PyTorch gate order: i, f, g, o
                i = sig[:, 0:H]
                f = sig[:, H:2 * H]
                g = tnh[:, 2 * H:3 * H]
                o = sig[:, 3 * H:4 * H]
                c = f * c + i * g
                h = o * jnp.tanh(c)
                outs.append(h)
            # TODO(synk): nn.Dropout between LSTM layers is identity here
            # (inference semantics); training-mode random dropout not modeled.
            seq = outs

        last = seq[-1]                                # (B, H_last)

        # ---- final Linear: the only HBM store of the whole forward ----
        out_ref[...] = (jnp.dot(last, fcw_ref[...],
                                preferred_element_type=jnp.float32)
                        + fcb_ref[...]).astype(out_ref.dtype)

    return kernel


# ---------------- full forward (one pallas_call) ----------------
def cnn_lstm_forward(params, x):
    # x: (B, 1, L), like PyTorch Conv1d NCL input
    x_bl = x[:, 0, :].astype(jnp.float32)
    B = x_bl.shape[0]
    NK = params["conv_w"].shape[1]
    num_lstm = len(params["lstm"])
    n_out = params["fc_w"].shape[1]

    args = [x_bl, params["conv_w"], params["conv_b"].reshape(1, NK)]
    scratch = []
    for lw in params["lstm"]:
        in_sz, four_h = lw["w_ih"].shape
        hsz = four_h // 4
        # single stacked gate weight: gates = [x_t, h] @ [W_ih; W_hh] + b
        args.append(jnp.concatenate([lw["w_ih"], lw["w_hh"]], axis=0))
        args.append(lw["b"].reshape(1, -1))
        scratch.append(pltpu.VMEM((B, in_sz + hsz), jnp.float32))
    args.append(params["fc_w"])
    args.append(params["fc_b"].reshape(1, n_out))

    return pl.pallas_call(
        _make_fused_kernel(num_lstm),
        out_shape=jax.ShapeDtypeStruct((B, n_out), jnp.float32),
        scratch_shapes=tuple(scratch),
    )(*args)


# ---------------- deterministic parameter init ----------------
def init_params(key, num_kernels, kernel_width, lstm_layers):
    keys = iter(jax.random.split(key, 4 + 3 * len(lstm_layers)))
    params = {}
    params["conv_w"] = 0.2 * jax.random.normal(
        next(keys), (kernel_width, num_kernels), jnp.float32)
    params["conv_b"] = 0.1 * jax.random.normal(
        next(keys), (num_kernels,), jnp.float32)
    in_sizes = [num_kernels] + lstm_layers[:-1]
    lstm_params = []
    for in_sz, hsz in zip(in_sizes, lstm_layers):
        w_ih = 0.2 * jax.random.normal(next(keys), (in_sz, 4 * hsz), jnp.float32)
        w_hh = 0.2 * jax.random.normal(next(keys), (hsz, 4 * hsz), jnp.float32)
        # NOTE: this single bias corresponds to PyTorch's b_ih + b_hh.
        b = 0.1 * jax.random.normal(next(keys), (1, 4 * hsz), jnp.float32)
        lstm_params.append({"w_ih": w_ih, "w_hh": w_hh, "b": b})
    params["lstm"] = lstm_params
    params["fc_w"] = 0.2 * jax.random.normal(
        next(keys), (lstm_layers[-1], 2), jnp.float32)
    params["fc_b"] = 0.1 * jax.random.normal(next(keys), (2,), jnp.float32)
    return params


# ---------------- pure-JAX reference for correctness ----------------
def reference_forward(params, x):
    x_bl = x[:, 0, :]
    B, L = x_bl.shape
    KW, NK = params["conv_w"].shape
    L_out = L - KW + 1
    cols = jnp.stack([x_bl[:, w:w + L_out] for w in range(KW)], axis=-1)
    y = jnp.einsum("btw,wk->btk", cols, params["conv_w"]) + params["conv_b"]
    y = jnp.maximum(y, 0.0)
    h_seq = jnp.transpose(y, (1, 0, 2))   # (T, B, NK)
    for lw in params["lstm"]:
        H = lw["w_hh"].shape[0]

        def step(carry, x_t, lw=lw, H=H):
            h, c = carry
            gates = x_t @ lw["w_ih"] + h @ lw["w_hh"] + lw["b"]
            i = jax.nn.sigmoid(gates[:, 0:H])
            f = jax.nn.sigmoid(gates[:, H:2 * H])
            g = jnp.tanh(gates[:, 2 * H:3 * H])
            o = jax.nn.sigmoid(gates[:, 3 * H:4 * H])
            c = f * c + i * g
            h = o * jnp.tanh(c)
            return (h, c), h

        h0 = jnp.zeros((B, H), jnp.float32)
        c0 = jnp.zeros((B, H), jnp.float32)
        _, h_seq = jax.lax.scan(step, (h0, c0), h_seq)
    last = h_seq[-1]
    return last @ params["fc_w"] + params["fc_b"]


if __name__ == "__main__":
    B = 2
    seq_len = 16
    num_kernels = 8
    kernel_width = 3
    lstm_layers = [32, 32]

    key = jax.random.PRNGKey(0)
    pkey, xkey = jax.random.split(key)
    params = init_params(pkey, num_kernels, kernel_width, lstm_layers)
    x = jax.random.normal(xkey, (B, 1, seq_len), jnp.float32)

    fwd = jax.jit(cnn_lstm_forward)
    out = jax.block_until_ready(fwd(params, x))
    assert out.shape == (B, 2)

    ref = reference_forward(params, x)
    np.testing.assert_allclose(np.asarray(out), np.asarray(ref),
                               rtol=1e-3, atol=1e-3)
    print("KERNEL_OK")
</pallas_src>

<mosaic_0001>
module attributes {stable_mosaic.version = 11 : i64} {
  func.func @kernel(%arg0: memref<2x16xf32, #tpu.memory_space<vmem>>, %arg1: memref<3x8xf32, #tpu.memory_space<vmem>>, %arg2: memref<1x8xf32, #tpu.memory_space<vmem>>, %arg3: memref<40x128xf32, #tpu.memory_space<vmem>>, %arg4: memref<1x128xf32, #tpu.memory_space<vmem>>, %arg5: memref<64x128xf32, #tpu.memory_space<vmem>>, %arg6: memref<1x128xf32, #tpu.memory_space<vmem>>, %arg7: memref<32x2xf32, #tpu.memory_space<vmem>>, %arg8: memref<1x2xf32, #tpu.memory_space<vmem>>, %arg9: memref<2x2xf32, #tpu.memory_space<vmem>>, %arg10: memref<2x40xf32, #tpu.memory_space<vmem>>, %arg11: memref<2x64xf32, #tpu.memory_space<vmem>>) attributes {dimension_semantics = [], scalar_prefetch = 0 : i64, scratch_operands = 2 : i64, tpu.core_type = #tpu.core_type<tc>} {
    %c0 = arith.constant 0 : index
    %c0_0 = arith.constant 0 : index
    %0 = vector.load %arg0[%c0, %c0_0] : memref<2x16xf32, #tpu.memory_space<vmem>>, vector<2x16xf32>
    %c0_1 = arith.constant 0 : index
    %c0_2 = arith.constant 0 : index
    %1 = vector.load %arg1[%c0_1, %c0_2] : memref<3x8xf32, #tpu.memory_space<vmem>>, vector<3x8xf32>
    %c0_3 = arith.constant 0 : index
    %c0_4 = arith.constant 0 : index
    %2 = vector.load %arg2[%c0_3, %c0_4] : memref<1x8xf32, #tpu.memory_space<vmem>>, vector<1x8xf32>
    %cst = arith.constant 0.000000e+00 : f32
    %3 = vector.broadcast %cst : f32 to vector<2x8xf32>
    %4 = vector.extract_strided_slice %0 {offsets = [0, 0], sizes = [2, 1], strides = [1, 1]} : vector<2x16xf32> to vector<2x1xf32>
    %5 = vector.extract_strided_slice %1 {offsets = [0, 0], sizes = [1, 8], strides = [1, 1]} : vector<3x8xf32> to vector<1x8xf32>
    %6 = vector.broadcast %4 : vector<2x1xf32> to vector<2x8xf32>
    %7 = vector.broadcast %5 : vector<1x8xf32> to vector<2x8xf32>
    %8 = arith.mulf %6, %7 : vector<2x8xf32>
    %9 = arith.addf %3, %8 : vector<2x8xf32>
    %10 = vector.extract_strided_slice %0 {offsets = [0, 1], sizes = [2, 1], strides = [1, 1]} : vector<2x16xf32> to vector<2x1xf32>
    %11 = vector.extract_strided_slice %1 {offsets = [1, 0], sizes = [1, 8], strides = [1, 1]} : vector<3x8xf32> to vector<1x8xf32>
    %12 = vector.broadcast %10 : vector<2x1xf32> to vector<2x8xf32>
    %13 = vector.broadcast %11 : vector<1x8xf32> to vector<2x8xf32>
    %14 = arith.mulf %12, %13 : vector<2x8xf32>
    %15 = arith.addf %9, %14 : vector<2x8xf32>
    %16 = vector.extract_strided_slice %0 {offsets = [0, 2], sizes = [2, 1], strides = [1, 1]} : vector<2x16xf32> to vector<2x1xf32>
    %17 = vector.extract_strided_slice %1 {offsets = [2, 0], sizes = [1, 8], strides = [1, 1]} : vector<3x8xf32> to vector<1x8xf32>
    %18 = vector.broadcast %16 : vector<2x1xf32> to vector<2x8xf32>
    %19 = vector.broadcast %17 : vector<1x8xf32> to vector<2x8xf32>
    %20 = arith.mulf %18, %19 : vector<2x8xf32>
    %21 = arith.addf %15, %20 : vector<2x8xf32>
    %22 = vector.broadcast %2 : vector<1x8xf32> to vector<2x8xf32>
    %23 = arith.addf %21, %22 : vector<2x8xf32>
    %cst_5 = arith.constant 0.000000e+00 : f32
    %24 = vector.broadcast %cst_5 : f32 to vector<2x8xf32>
    %25 = arith.maximumf %23, %24 : vector<2x8xf32>
    %cst_6 = arith.constant 0.000000e+00 : f32
    %26 = vector.broadcast %cst_6 : f32 to vector<2x8xf32>
    %27 = vector.extract_strided_slice %0 {offsets = [0, 1], sizes = [2, 1], strides = [1, 1]} : vector<2x16xf32> to vector<2x1xf32>
    %28 = vector.extract_strided_slice %1 {offsets = [0, 0], sizes = [1, 8], strides = [1, 1]} : vector<3x8xf32> to vector<1x8xf32>
    %29 = vector.broadcast %27 : vector<2x1xf32> to vector<2x8xf32>
    %30 = vector.broadcast %28 : vector<1x8xf32> to vector<2x8xf32>
    %31 = arith.mulf %29, %30 : vector<2x8xf32>
    %32 = arith.addf %26, %31 : vector<2x8xf32>
    %33 = vector.extract_strided_slice %0 {offsets = [0, 2], sizes = [2, 1], strides = [1, 1]} : vector<2x16xf32> to vector<2x1xf32>
    %34 = vector.extract_strided_slice %1 {offsets = [1, 0], sizes = [1, 8], strides = [1, 1]} : vector<3x8xf32> to vector<1x8xf32>
    %35 = vector.broadcast %33 : vector<2x1xf32> to vector<2x8xf32>
    %36 = vector.broadcast %34 : vector<1x8xf32> to vector<2x8xf32>
    %37 = arith.mulf %35, %36 : vector<2x8xf32>
    %38 = arith.addf %32, %37 : vector<2x8xf32>
    %39 = vector.extract_strided_slice %0 {offsets = [0, 3], sizes = [2, 1], strides = [1, 1]} : vector<2x16xf32> to vector<2x1xf32>
    %40 = vector.extract_strided_slice %1 {offsets = [2, 0], sizes = [1, 8], strides = [1, 1]} : vector<3x8xf32> to vector<1x8xf32>
    %41 = vector.broadcast %39 : vector<2x1xf32> to vector<2x8xf32>
    %42 = vector.broadcast %40 : vector<1x8xf32> to vector<2x8xf32>
    %43 = arith.mulf %41, %42 : vector<2x8xf32>
    %44 = arith.addf %38, %43 : vector<2x8xf32>
    %45 = vector.broadcast %2 : vector<1x8xf32> to vector<2x8xf32>
    %46 = arith.addf %44, %45 : vector<2x8xf32>
    %cst_7 = arith.constant 0.000000e+00 : f32
    %47 = vector.broadcast %cst_7 : f32 to vector<2x8xf32>
    %48 = arith.maximumf %46, %47 : vector<2x8xf32>
    %cst_8 = arith.constant 0.000000e+00 : f32
    %49 = vector.broadcast %cst_8 : f32 to vector<2x8xf32>
    %50 = vector.extract_strided_slice %0 {offsets = [0, 2], sizes = [2, 1], strides = [1, 1]} : vector<2x16xf32> to vector<2x1xf32>
    %51 = vector.extract_strided_slice %1 {offsets = [0, 0], sizes = [1, 8], strides = [1, 1]} : vector<3x8xf32> to vector<1x8xf32>
    %52 = vector.broadcast %50 : vector<2x1xf32> to vector<2x8xf32>
    %53 = vector.broadcast %51 : vector<1x8xf32> to vector<2x8xf32>
    %54 = arith.mulf %52, %53 : vector<2x8xf32>
    %55 = arith.addf %49, %54 : vector<2x8xf32>
    %56 = vector.extract_strided_slice %0 {offsets = [0, 3], sizes = [2, 1], strides = [1, 1]} : vector<2x16xf32> to vector<2x1xf32>
    %57 = vector.extract_strided_slice %1 {offsets = [1, 0], sizes = [1, 8], strides = [1, 1]} : vector<3x8xf32> to vector<1x8xf32>
    %58 = vector.broadcast %56 : vector<2x1xf32> to vector<2x8xf32>
    %59 = vector.broadcast %57 : vector<1x8xf32> to vector<2x8xf32>
    %60 = arith.mulf %58, %59 : vector<2x8xf32>
    %61 = arith.addf %55, %60 : vector<2x8xf32>
    %62 = vector.extract_strided_slice %0 {offsets = [0, 4], sizes = [2, 1], strides = [1, 1]} : vector<2x16xf32> to vector<2x1xf32>
    %63 = vector.extract_strided_slice %1 {offsets = [2, 0], sizes = [1, 8], strides = [1, 1]} : vector<3x8xf32> to vector<1x8xf32>
    %64 = vector.broadcast %62 : vector<2x1xf32> to vector<2x8xf32>
    %65 = vector.broadcast %63 : vector<1x8xf32> to vector<2x8xf32>
    %66 = arith.mulf %64, %65 : vector<2x8xf32>
    %67 = arith.addf %61, %66 : vector<2x8xf32>
    %68 = vector.broadcast %2 : vector<1x8xf32> to vector<2x8xf32>
    %69 = arith.addf %67, %68 : vector<2x8xf32>
    %cst_9 = arith.constant 0.000000e+00 : f32
    %70 = vector.broadcast %cst_9 : f32 to vector<2x8xf32>
    %71 = arith.maximumf %69, %70 : vector<2x8xf32>
    %cst_10 = arith.constant 0.000000e+00 : f32
    %72 = vector.broadcast %cst_10 : f32 to vector<2x8xf32>
    %73 = vector.extract_strided_slice %0 {offsets = [0, 3], sizes = [2, 1], strides = [1, 1]} : vector<2x16xf32> to vector<2x1xf32>
    %74 = vector.extract_strided_slice %1 {offsets = [0, 0], sizes = [1, 8], strides = [1, 1]} : vector<3x8xf32> to vector<1x8xf32>
    %75 = vector.broadcast %73 : vector<2x1xf32> to vector<2x8xf32>
    %76 = vector.broadcast %74 : vector<1x8xf32> to vector<2x8xf32>
    %77 = arith.mulf %75, %76 : vector<2x8xf32>
    %78 = arith.addf %72, %77 : vector<2x8xf32>
    %79 = vector.extract_strided_slice %0 {offsets = [0, 4], sizes = [2, 1], strides = [1, 1]} : vector<2x16xf32> to vector<2x1xf32>
    %80 = vector.extract_strided_slice %1 {offsets = [1, 0], sizes = [1, 8], strides = [1, 1]} : vector<3x8xf32> to vector<1x8xf32>
    %81 = vector.broadcast %79 : vector<2x1xf32> to vector<2x8xf32>
    %82 = vector.broadcast %80 : vector<1x8xf32> to vector<2x8xf32>
    %83 = arith.mulf %81, %82 : vector<2x8xf32>
    %84 = arith.addf %78, %83 : vector<2x8xf32>
    %85 = vector.extract_strided_slice %0 {offsets = [0, 5], sizes = [2, 1], strides = [1, 1]} : vector<2x16xf32> to vector<2x1xf32>
    %86 = vector.extract_strided_slice %1 {offsets = [2, 0], sizes = [1, 8], strides = [1, 1]} : vector<3x8xf32> to vector<1x8xf32>
    %87 = vector.broadcast %85 : vector<2x1xf32> to vector<2x8xf32>
    %88 = vector.broadcast %86 : vector<1x8xf32> to vector<2x8xf32>
    %89 = arith.mulf %87, %88 : vector<2x8xf32>
    %90 = arith.addf %84, %89 : vector<2x8xf32>
    %91 = vector.broadcast %2 : vector<1x8xf32> to vector<2x8xf32>
    %92 = arith.addf %90, %91 : vector<2x8xf32>
    %cst_11 = arith.constant 0.000000e+00 : f32
    %93 = vector.broadcast %cst_11 : f32 to vector<2x8xf32>
    %94 = arith.maximumf %92, %93 : vector<2x8xf32>
    %cst_12 = arith.constant 0.000000e+00 : f32
    %95 = vector.broadcast %cst_12 : f32 to vector<2x8xf32>
    %96 = vector.extract_strided_slice %0 {offsets = [0, 4], sizes = [2, 1], strides = [1, 1]} : vector<2x16xf32> to vector<2x1xf32>
    %97 = vector.extract_strided_slice %1 {offsets = [0, 0], sizes = [1, 8], strides = [1, 1]} : vector<3x8xf32> to vector<1x8xf32>
    %98 = vector.broadcast %96 : vector<2x1xf32> to vector<2x8xf32>
    %99 = vector.broadcast %97 : vector<1x8xf32> to vector<2x8xf32>
    %100 = arith.mulf %98, %99 : vector<2x8xf32>
    %101 = arith.addf %95, %100 : vector<2x8xf32>
    %102 = vector.extract_strided_slice %0 {offsets = [0, 5], sizes = [2, 1], strides = [1, 1]} : vector<2x16xf32> to vector<2x1xf32>
    %103 = vector.extract_strided_slice %1 {offsets = [1, 0], sizes = [1, 8], strides = [1, 1]} : vector<3x8xf32> to vector<1x8xf32>
    %104 = vector.broadcast %102 : vector<2x1xf32> to vector<2x8xf32>
    %105 = vector.broadcast %103 : vector<1x8xf32> to vector<2x8xf32>
    %106 = arith.mulf %104, %105 : vector<2x8xf32>
    %107 = arith.addf %101, %106 : vector<2x8xf32>
    %108 = vector.extract_strided_slice %0 {offsets = [0, 6], sizes = [2, 1], strides = [1, 1]} : vector<2x16xf32> to vector<2x1xf32>
    %109 = vector.extract_strided_slice %1 {offsets = [2, 0], sizes = [1, 8], strides = [1, 1]} : vector<3x8xf32> to vector<1x8xf32>
    %110 = vector.broadcast %108 : vector<2x1xf32> to vector<2x8xf32>
    %111 = vector.broadcast %109 : vector<1x8xf32> to vector<2x8xf32>
    %112 = arith.mulf %110, %111 : vector<2x8xf32>
    %113 = arith.addf %107, %112 : vector<2x8xf32>
    %114 = vector.broadcast %2 : vector<1x8xf32> to vector<2x8xf32>
    %115 = arith.addf %113, %114 : vector<2x8xf32>
    %cst_13 = arith.constant 0.000000e+00 : f32
    %116 = vector.broadcast %cst_13 : f32 to vector<2x8xf32>
    %117 = arith.maximumf %115, %116 : vector<2x8xf32>
    %cst_14 = arith.constant 0.000000e+00 : f32
    %118 = vector.broadcast %cst_14 : f32 to vector<2x8xf32>
    %119 = vector.extract_strided_slice %0 {offsets = [0, 5], sizes = [2, 1], strides = [1, 1]} : vector<2x16xf32> to vector<2x1xf32>
    %120 = vector.extract_strided_slice %1 {offsets = [0, 0], sizes = [1, 8], strides = [1, 1]} : vector<3x8xf32> to vector<1x8xf32>
    %121 = vector.broadcast %119 : vector<2x1xf32> to vector<2x8xf32>
    %122 = vector.broadcast %120 : vector<1x8xf32> to vector<2x8xf32>
    %123 = arith.mulf %121, %122 : vector<2x8xf32>
    %124 = arith.addf %118, %123 : vector<2x8xf32>
    %125 = vector.extract_strided_slice %0 {offsets = [0, 6], sizes = [2, 1], strides = [1, 1]} : vector<2x16xf32> to vector<2x1xf32>
    %126 = vector.extract_strided_slice %1 {offsets = [1, 0], sizes = [1, 8], strides = [1, 1]} : vector<3x8xf32> to vector<1x8xf32>
    %127 = vector.broadcast %125 : vector<2x1xf32> to vector<2x8xf32>
    %128 = vector.broadcast %126 : vector<1x8xf32> to vector<2x8xf32>
    %129 = arith.mulf %127, %128 : vector<2x8xf32>
    %130 = arith.addf %124, %129 : vector<2x8xf32>
    %131 = vector.extract_strided_slice %0 {offsets = [0, 7], sizes = [2, 1], strides = [1, 1]} : vector<2x16xf32> to vector<2x1xf32>
    %132 = vector.extract_strided_slice %1 {offsets = [2, 0], sizes = [1, 8], strides = [1, 1]} : vector<3x8xf32> to vector<1x8xf32>
    %133 = vector.broadcast %131 : vector<2x1xf32> to vector<2x8xf32>
    %134 = vector.broadcast %132 : vector<1x8xf32> to vector<2x8xf32>
    %135 = arith.mulf %133, %134 : vector<2x8xf32>
    %136 = arith.addf %130, %135 : vector<2x8xf32>
    %137 = vector.broadcast %2 : vector<1x8xf32> to vector<2x8xf32>
    %138 = arith.addf %136, %137 : vector<2x8xf32>
    %cst_15 = arith.constant 0.000000e+00 : f32
    %139 = vector.broadcast %cst_15 : f32 to vector<2x8xf32>
    %140 = arith.maximumf %138, %139 : vector<2x8xf32>
    %cst_16 = arith.constant 0.000000e+00 : f32
    %141 = vector.broadcast %cst_16 : f32 to vector<2x8xf32>
    %142 = vector.extract_strided_slice %0 {offsets = [0, 6], sizes = [2, 1], strides = [1, 1]} : vector<2x16xf32> to vector<2x1xf32>
    %143 = vector.extract_strided_slice %1 {offsets = [0, 0], sizes = [1, 8], strides = [1, 1]} : vector<3x8xf32> to vector<1x8xf32>
    %144 = vector.broadcast %142 : vector<2x1xf32> to vector<2x8xf32>
    %145 = vector.broadcast %143 : vector<1x8xf32> to vector<2x8xf32>
    %146 = arith.mulf %144, %145 : vector<2x8xf32>
    %147 = arith.addf %141, %146 : vector<2x8xf32>
    %148 = vector.extract_strided_slice %0 {offsets = [0, 7], sizes = [2, 1], strides = [1, 1]} : vector<2x16xf32> to vector<2x1xf32>
    %149 = vector.extract_strided_slice %1 {offsets = [1, 0], sizes = [1, 8], strides = [1, 1]} : vector<3x8xf32> to vector<1x8xf32>
    %150 = vector.broadcast %148 : vector<2x1xf32> to vector<2x8xf32>
    %151 = vector.broadcast %149 : vector<1x8xf32> to vector<2x8xf32>
    %152 = arith.mulf %150, %151 : vector<2x8xf32>
    %153 = arith.addf %147, %152 : vector<2x8xf32>
    %154 = vector.extract_strided_slice %0 {offsets = [0, 8], sizes = [2, 1], strides = [1, 1]} : vector<2x16xf32> to vector<2x1xf32>
    %155 = vector.extract_strided_slice %1 {offsets = [2, 0], sizes = [1, 8], strides = [1, 1]} : vector<3x8xf32> to vector<1x8xf32>
    %156 = vector.broadcast %154 : vector<2x1xf32> to vector<2x8xf32>
    %157 = vector.broadcast %155 : vector<1x8xf32> to vector<2x8xf32>
    %158 = arith.mulf %156, %157 : vector<2x8xf32>
    %159 = arith.addf %153, %158 : vector<2x8xf32>
    %160 = vector.broadcast %2 : vector<1x8xf32> to vector<2x8xf32>
    %161 = arith.addf %159, %160 : vector<2x8xf32>
    %cst_17 = arith.constant 0.000000e+00 : f32
    %162 = vector.broadcast %cst_17 : f32 to vector<2x8xf32>
    %163 = arith.maximumf %161, %162 : vector<2x8xf32>
    %cst_18 = arith.constant 0.000000e+00 : f32
    %164 = vector.broadcast %cst_18 : f32 to vector<2x8xf32>
    %165 = vector.extract_strided_slice %0 {offsets = [0, 7], sizes = [2, 1], strides = [1, 1]} : vector<2x16xf32> to vector<2x1xf32>
    %166 = vector.extract_strided_slice %1 {offsets = [0, 0], sizes = [1, 8], strides = [1, 1]} : vector<3x8xf32> to vector<1x8xf32>
    %167 = vector.broadcast %165 : vector<2x1xf32> to vector<2x8xf32>
    %168 = vector.broadcast %166 : vector<1x8xf32> to vector<2x8xf32>
    %169 = arith.mulf %167, %168 : vector<2x8xf32>
    %170 = arith.addf %164, %169 : vector<2x8xf32>
    %171 = vector.extract_strided_slice %0 {offsets = [0, 8], sizes = [2, 1], strides = [1, 1]} : vector<2x16xf32> to vector<2x1xf32>
    %172 = vector.extract_strided_slice %1 {offsets = [1, 0], sizes = [1, 8], strides = [1, 1]} : vector<3x8xf32> to vector<1x8xf32>
    %173 = vector.broadcast %171 : vector<2x1xf32> to vector<2x8xf32>
    %174 = vector.broadcast %172 : vector<1x8xf32> to vector<2x8xf32>
    %175 = arith.mulf %173, %174 : vector<2x8xf32>
    %176 = arith.addf %170, %175 : vector<2x8xf32>
    %177 = vector.extract_strided_slice %0 {offsets = [0, 9], sizes = [2, 1], strides = [1, 1]} : vector<2x16xf32> to vector<2x1xf32>
    %178 = vector.extract_strided_slice %1 {offsets = [2, 0], sizes = [1, 8], strides = [1, 1]} : vector<3x8xf32> to vector<1x8xf32>
    %179 = vector.broadcast %177 : vector<2x1xf32> to vector<2x8xf32>
    %180 = vector.broadcast %178 : vector<1x8xf32> to vector<2x8xf32>
    %181 = arith.mulf %179, %180 : vector<2x8xf32>
    %182 = arith.addf %176, %181 : vector<2x8xf32>
    %183 = vector.broadcast %2 : vector<1x8xf32> to vector<2x8xf32>
    %184 = arith.addf %182, %183 : vector<2x8xf32>
    %cst_19 = arith.constant 0.000000e+00 : f32
    %185 = vector.broadcast %cst_19 : f32 to vector<2x8xf32>
    %186 = arith.maximumf %184, %185 : vector<2x8xf32>
    %cst_20 = arith.constant 0.000000e+00 : f32
    %187 = vector.broadcast %cst_20 : f32 to vector<2x8xf32>
    %188 = vector.extract_strided_slice %0 {offsets = [0, 8], sizes = [2, 1], strides = [1, 1]} : vector<2x16xf32> to vector<2x1xf32>
    %189 = vector.extract_strided_slice %1 {offsets = [0, 0], sizes = [1, 8], strides = [1, 1]} : vector<3x8xf32> to vector<1x8xf32>
    %190 = vector.broadcast %188 : vector<2x1xf32> to vector<2x8xf32>
    %191 = vector.broadcast %189 : vector<1x8xf32> to vector<2x8xf32>
    %192 = arith.mulf %190, %191 : vector<2x8xf32>
    %193 = arith.addf %187, %192 : vector<2x8xf32>
    %194 = vector.extract_strided_slice %0 {offsets = [0, 9], sizes = [2, 1], strides = [1, 1]} : vector<2x16xf32> to vector<2x1xf32>
    %195 = vector.extract_strided_slice %1 {offsets = [1, 0], sizes = [1, 8], strides = [1, 1]} : vector<3x8xf32> to vector<1x8xf32>
    %196 = vector.broadcast %194 : vector<2x1xf32> to vector<2x8xf32>
    %197 = vector.broadcast %195 : vector<1x8xf32> to vector<2x8xf32>
    %198 = arith.mulf %196, %197 : vector<2x8xf32>
    %199 = arith.addf %193, %198 : vector<2x8xf32>
    %200 = vector.extract_strided_slice %0 {offsets = [0, 10], sizes = [2, 1], strides = [1, 1]} : vector<2x16xf32> to vector<2x1xf32>
    %201 = vector.extract_strided_slice %1 {offsets = [2, 0], sizes = [1, 8], strides = [1, 1]} : vector<3x8xf32> to vector<1x8xf32>
    %202 = vector.broadcast %200 : vector<2x1xf32> to vector<2x8xf32>
    %203 = vector.broadcast %201 : vector<1x8xf32> to vector<2x8xf32>
    %204 = arith.mulf %202, %203 : vector<2x8xf32>
    %205 = arith.addf %199, %204 : vector<2x8xf32>
    %206 = vector.broadcast %2 : vector<1x8xf32> to vector<2x8xf32>
    %207 = arith.addf %205, %206 : vector<2x8xf32>
    %cst_21 = arith.constant 0.000000e+00 : f32
    %208 = vector.broadcast %cst_21 : f32 to vector<2x8xf32>
    %209 = arith.maximumf %207, %208 : vector<2x8xf32>
    %cst_22 = arith.constant 0.000000e+00 : f32
    %210 = vector.broadcast %cst_22 : f32 to vector<2x8xf32>
    %211 = vector.extract_strided_slice %0 {offsets = [0, 9], sizes = [2, 1], strides = [1, 1]} : vector<2x16xf32> to vector<2x1xf32>
    %212 = vector.extract_strided_slice %1 {offsets = [0, 0], sizes = [1, 8], strides = [1, 1]} : vector<3x8xf32> to vector<1x8xf32>
    %213 = vector.broadcast %211 : vector<2x1xf32> to vector<2x8xf32>
    %214 = vector.broadcast %212 : vector<1x8xf32> to vector<2x8xf32>
    %215 = arith.mulf %213, %214 : vector<2x8xf32>
    %216 = arith.addf %210, %215 : vector<2x8xf32>
    %217 = vector.extract_strided_slice %0 {offsets = [0, 10], sizes = [2, 1], strides = [1, 1]} : vector<2x16xf32> to vector<2x1xf32>
    %218 = vector.extract_strided_slice %1 {offsets = [1, 0], sizes = [1, 8], strides = [1, 1]} : vector<3x8xf32> to vector<1x8xf32>
    %219 = vector.broadcast %217 : vector<2x1xf32> to vector<2x8xf32>
    %220 = vector.broadcast %218 : vector<1x8xf32> to vector<2x8xf32>
    %221 = arith.mulf %219, %220 : vector<2x8xf32>
    %222 = arith.addf %216, %221 : vector<2x8xf32>
    %223 = vector.extract_strided_slice %0 {offsets = [0, 11], sizes = [2, 1], strides = [1, 1]} : vector<2x16xf32> to vector<2x1xf32>
    %224 = vector.extract_strided_slice %1 {offsets = [2, 0], sizes = [1, 8], strides = [1, 1]} : vector<3x8xf32> to vector<1x8xf32>
    %225 = vector.broadcast %223 : vector<2x1xf32> to vector<2x8xf32>
    %226 = vector.broadcast %224 : vector<1x8xf32> to vector<2x8xf32>
    %227 = arith.mulf %225, %226 : vector<2x8xf32>
    %228 = arith.addf %222, %227 : vector<2x8xf32>
    %229 = vector.broadcast %2 : vector<1x8xf32> to vector<2x8xf32>
    %230 = arith.addf %228, %229 : vector<2x8xf32>
    %cst_23 = arith.constant 0.000000e+00 : f32
    %231 = vector.broadcast %cst_23 : f32 to vector<2x8xf32>
    %232 = arith.maximumf %230, %231 : vector<2x8xf32>
    %cst_24 = arith.constant 0.000000e+00 : f32
    %233 = vector.broadcast %cst_24 : f32 to vector<2x8xf32>
    %234 = vector.extract_strided_slice %0 {offsets = [0, 10], sizes = [2, 1], strides = [1, 1]} : vector<2x16xf32> to vector<2x1xf32>
    %235 = vector.extract_strided_slice %1 {offsets = [0, 0], sizes = [1, 8], strides = [1, 1]} : vector<3x8xf32> to vector<1x8xf32>
    %236 = vector.broadcast %234 : vector<2x1xf32> to vector<2x8xf32>
    %237 = vector.broadcast %235 : vector<1x8xf32> to vector<2x8xf32>
    %238 = arith.mulf %236, %237 : vector<2x8xf32>
    %239 = arith.addf %233, %238 : vector<2x8xf32>
    %240 = vector.extract_strided_slice %0 {offsets = [0, 11], sizes = [2, 1], strides = [1, 1]} : vector<2x16xf32> to vector<2x1xf32>
    %241 = vector.extract_strided_slice %1 {offsets = [1, 0], sizes = [1, 8], strides = [1, 1]} : vector<3x8xf32> to vector<1x8xf32>
    %242 = vector.broadcast %240 : vector<2x1xf32> to vector<2x8xf32>
    %243 = vector.broadcast %241 : vector<1x8xf32> to vector<2x8xf32>
    %244 = arith.mulf %242, %243 : vector<2x8xf32>
    %245 = arith.addf %239, %244 : vector<2x8xf32>
    %246 = vector.extract_strided_slice %0 {offsets = [0, 12], sizes = [2, 1], strides = [1, 1]} : vector<2x16xf32> to vector<2x1xf32>
    %247 = vector.extract_strided_slice %1 {offsets = [2, 0], sizes = [1, 8], strides = [1, 1]} : vector<3x8xf32> to vector<1x8xf32>
    %248 = vector.broadcast %246 : vector<2x1xf32> to vector<2x8xf32>
    %249 = vector.broadcast %247 : vector<1x8xf32> to vector<2x8xf32>
    %250 = arith.mulf %248, %249 : vector<2x8xf32>
    %251 = arith.addf %245, %250 : vector<2x8xf32>
    %252 = vector.broadcast %2 : vector<1x8xf32> to vector<2x8xf32>
    %253 = arith.addf %251, %252 : vector<2x8xf32>
    %cst_25 = arith.constant 0.000000e+00 : f32
    %254 = vector.broadcast %cst_25 : f32 to vector<2x8xf32>
    %255 = arith.maximumf %253, %254 : vector<2x8xf32>
    %cst_26 = arith.constant 0.000000e+00 : f32
    %256 = vector.broadcast %cst_26 : f32 to vector<2x8xf32>
    %257 = vector.extract_strided_slice %0 {offsets = [0, 11], sizes = [2, 1], strides = [1, 1]} : vector<2x16xf32> to vector<2x1xf32>
    %258 = vector.extract_strided_slice %1 {offsets = [0, 0], sizes = [1, 8], strides = [1, 1]} : vector<3x8xf32> to vector<1x8xf32>
    %259 = vector.broadcast %257 : vector<2x1xf32> to vector<2x8xf32>
    %260 = vector.broadcast %258 : vector<1x8xf32> to vector<2x8xf32>
    %261 = arith.mulf %259, %260 : vector<2x8xf32>
    %262 = arith.addf %256, %261 : vector<2x8xf32>
    %263 = vector.extract_strided_slice %0 {offsets = [0, 12], sizes = [2, 1], strides = [1, 1]} : vector<2x16xf32> to vector<2x1xf32>
    %264 = vector.extract_strided_slice %1 {offsets = [1, 0], sizes = [1, 8], strides = [1, 1]} : vector<3x8xf32> to vector<1x8xf32>
    %265 = vector.broadcast %263 : vector<2x1xf32> to vector<2x8xf32>
    %266 = vector.broadcast %264 : vector<1x8xf32> to vector<2x8xf32>
    %267 = arith.mulf %265, %266 : vector<2x8xf32>
    %268 = arith.addf %262, %267 : vector<2x8xf32>
    %269 = vector.extract_strided_slice %0 {offsets = [0, 13], sizes = [2, 1], strides = [1, 1]} : vector<2x16xf32> to vector<2x1xf32>
    %270 = vector.extract_strided_slice %1 {offsets = [2, 0], sizes = [1, 8], strides = [1, 1]} : vector<3x8xf32> to vector<1x8xf32>
    %271 = vector.broadcast %269 : vector<2x1xf32> to vector<2x8xf32>
    %272 = vector.broadcast %270 : vector<1x8xf32> to vector<2x8xf32>
    %273 = arith.mulf %271, %272 : vector<2x8xf32>
    %274 = arith.addf %268, %273 : vector<2x8xf32>
    %275 = vector.broadcast %2 : vector<1x8xf32> to vector<2x8xf32>
    %276 = arith.addf %274, %275 : vector<2x8xf32>
    %cst_27 = arith.constant 0.000000e+00 : f32
    %277 = vector.broadcast %cst_27 : f32 to vector<2x8xf32>
    %278 = arith.maximumf %276, %277 : vector<2x8xf32>
    %cst_28 = arith.constant 0.000000e+00 : f32
    %279 = vector.broadcast %cst_28 : f32 to vector<2x8xf32>
    %280 = vector.extract_strided_slice %0 {offsets = [0, 12], sizes = [2, 1], strides = [1, 1]} : vector<2x16xf32> to vector<2x1xf32>
    %281 = vector.extract_strided_slice %1 {offsets = [0, 0], sizes = [1, 8], strides = [1, 1]} : vector<3x8xf32> to vector<1x8xf32>
    %282 = vector.broadcast %280 : vector<2x1xf32> to vector<2x8xf32>
    %283 = vector.broadcast %281 : vector<1x8xf32> to vector<2x8xf32>
    %284 = arith.mulf %282, %283 : vector<2x8xf32>
    %285 = arith.addf %279, %284 : vector<2x8xf32>
    %286 = vector.extract_strided_slice %0 {offsets = [0, 13], sizes = [2, 1], strides = [1, 1]} : vector<2x16xf32> to vector<2x1xf32>
    %287 = vector.extract_strided_slice %1 {offsets = [1, 0], sizes = [1, 8], strides = [1, 1]} : vector<3x8xf32> to vector<1x8xf32>
    %288 = vector.broadcast %286 : vector<2x1xf32> to vector<2x8xf32>
    %289 = vector.broadcast %287 : vector<1x8xf32> to vector<2x8xf32>
    %290 = arith.mulf %288, %289 : vector<2x8xf32>
    %291 = arith.addf %285, %290 : vector<2x8xf32>
    %292 = vector.extract_strided_slice %0 {offsets = [0, 14], sizes = [2, 1], strides = [1, 1]} : vector<2x16xf32> to vector<2x1xf32>
    %293 = vector.extract_strided_slice %1 {offsets = [2, 0], sizes = [1, 8], strides = [1, 1]} : vector<3x8xf32> to vector<1x8xf32>
    %294 = vector.broadcast %292 : vector<2x1xf32> to vector<2x8xf32>
    %295 = vector.broadcast %293 : vector<1x8xf32> to vector<2x8xf32>
    %296 = arith.mulf %294, %295 : vector<2x8xf32>
    %297 = arith.addf %291, %296 : vector<2x8xf32>
    %298 = vector.broadcast %2 : vector<1x8xf32> to vector<2x8xf32>
    %299 = arith.addf %297, %298 : vector<2x8xf32>
    %cst_29 = arith.constant 0.000000e+00 : f32
    %300 = vector.broadcast %cst_29 : f32 to vector<2x8xf32>
    %301 = arith.maximumf %299, %300 : vector<2x8xf32>
    %cst_30 = arith.constant 0.000000e+00 : f32
    %302 = vector.broadcast %cst_30 : f32 to vector<2x8xf32>
    %303 = vector.extract_strided_slice %0 {offsets = [0, 13], sizes = [2, 1], strides = [1, 1]} : vector<2x16xf32> to vector<2x1xf32>
    %304 = vector.extract_strided_slice %1 {offsets = [0, 0], sizes = [1, 8], strides = [1, 1]} : vector<3x8xf32> to vector<1x8xf32>
    %305 = vector.broadcast %303 : vector<2x1xf32> to vector<2x8xf32>
    %306 = vector.broadcast %304 : vector<1x8xf32> to vector<2x8xf32>
    %307 = arith.mulf %305, %306 : vector<2x8xf32>
    %308 = arith.addf %302, %307 : vector<2x8xf32>
    %309 = vector.extract_strided_slice %0 {offsets = [0, 14], sizes = [2, 1], strides = [1, 1]} : vector<2x16xf32> to vector<2x1xf32>
    %310 = vector.extract_strided_slice %1 {offsets = [1, 0], sizes = [1, 8], strides = [1, 1]} : vector<3x8xf32> to vector<1x8xf32>
    %311 = vector.broadcast %309 : vector<2x1xf32> to vector<2x8xf32>
    %312 = vector.broadcast %310 : vector<1x8xf32> to vector<2x8xf32>
    %313 = arith.mulf %311, %312 : vector<2x8xf32>
    %314 = arith.addf %308, %313 : vector<2x8xf32>
    %315 = vector.extract_strided_slice %0 {offsets = [0, 15], sizes = [2, 1], strides = [1, 1]} : vector<2x16xf32> to vector<2x1xf32>
    %316 = vector.extract_strided_slice %1 {offsets = [2, 0], sizes = [1, 8], strides = [1, 1]} : vector<3x8xf32> to vector<1x8xf32>
    %317 = vector.broadcast %315 : vector<2x1xf32> to vector<2x8xf32>
    %318 = vector.broadcast %316 : vector<1x8xf32> to vector<2x8xf32>
    %319 = arith.mulf %317, %318 : vector<2x8xf32>
    %320 = arith.addf %314, %319 : vector<2x8xf32>
    %321 = vector.broadcast %2 : vector<1x8xf32> to vector<2x8xf32>
    %322 = arith.addf %320, %321 : vector<2x8xf32>
    %cst_31 = arith.constant 0.000000e+00 : f32
    %323 = vector.broadcast %cst_31 : f32 to vector<2x8xf32>
    %324 = arith.maximumf %322, %323 : vector<2x8xf32>
    %c0_32 = arith.constant 0 : index
    %c0_33 = arith.constant 0 : index
    %325 = vector.load %arg3[%c0_32, %c0_33] : memref<40x128xf32, #tpu.memory_space<vmem>>, vector<40x128xf32>
    %c0_34 = arith.constant 0 : index
    %c0_35 = arith.constant 0 : index
    %326 = vector.load %arg4[%c0_34, %c0_35] : memref<1x128xf32, #tpu.memory_space<vmem>>, vector<1x128xf32>
    %cst_36 = arith.constant 0.000000e+00 : f32
    %327 = vector.broadcast %cst_36 : f32 to vector<2x32xf32>
    %cst_37 = arith.constant 0.000000e+00 : f32
    %328 = vector.broadcast %cst_37 : f32 to vector<2x32xf32>
    %c0_38 = arith.constant 0 : index
    %c0_39 = arith.constant 0 : index
    %329 = vector.load %arg10[%c0_38, %c0_39] : memref<2x40xf32, #tpu.memory_space<vmem>>, vector<2x8xf32>
    tpu.vector_store %arg10[%c0_38, %c0_39], %25 {strides = array<i32>} : memref<2x40xf32, #tpu.memory_space<vmem>>, vector<2x8xf32>,
    %c0_40 = arith.constant 0 : index
    %c8 = arith.constant 8 : index
    %330 = vector.load %arg10[%c0_40, %c8] : memref<2x40xf32, #tpu.memory_space<vmem>>, vector<2x32xf32>
    tpu.vector_store %arg10[%c0_40, %c8], %327 {strides = array<i32>} : memref<2x40xf32, #tpu.memory_space<vmem>>, vector<2x32xf32>,
    %c0_41 = arith.constant 0 : index
    %c0_42 = arith.constant 0 : index
    %331 = vector.load %arg10[%c0_41, %c0_42] : memref<2x40xf32, #tpu.memory_space<vmem>>, vector<2x40xf32>
    %cst_43 = arith.constant dense<0.000000e+00> : vector<2x128xf32>
    %332 = tpu.matmul %331, %325, %cst_43 {dimension_numbers = #tpu.dot_dimension_numbers<[1], [0], [0], [1], [0, 0, 1, 1], [], []>} : vector<2x40xf32>, vector<40x128xf32>, vector<2x128xf32> -> vector<2x128xf32>
    %333 = vector.broadcast %326 : vector<1x128xf32> to vector<2x128xf32>
    %334 = arith.addf %332, %333 : vector<2x128xf32>
    %335 = arith.negf %334 : vector<2x128xf32>
    %336 = math.exp %335 : vector<2x128xf32>
    %cst_44 = arith.constant 1.000000e+00 : f32
    %337 = vector.broadcast %cst_44 : f32 to vector<2x128xf32>
    %338 = arith.addf %337, %336 : vector<2x128xf32>
    %339 = arith.divf %337, %338 : vector<2x128xf32>
    %340 = math.tanh %334 : vector<2x128xf32>
    %341 = vector.extract_strided_slice %339 {offsets = [0, 0], sizes = [2, 32], strides = [1, 1]} : vector<2x128xf32> to vector<2x32xf32>
    %342 = vector.extract_strided_slice %339 {offsets = [0, 32], sizes = [2, 32], strides = [1, 1]} : vector<2x128xf32> to vector<2x32xf32>
    %343 = vector.extract_strided_slice %340 {offsets = [0, 64], sizes = [2, 32], strides = [1, 1]} : vector<2x128xf32> to vector<2x32xf32>
    %344 = vector.extract_strided_slice %339 {offsets = [0, 96], sizes = [2, 32], strides = [1, 1]} : vector<2x128xf32> to vector<2x32xf32>
    %345 = arith.mulf %342, %328 : vector<2x32xf32>
    %346 = arith.mulf %341, %343 : vector<2x32xf32>
    %347 = arith.addf %345, %346 : vector<2x32xf32>
    %348 = math.tanh %347 : vector<2x32xf32>
    %349 = arith.mulf %344, %348 : vector<2x32xf32>
    %c0_45 = arith.constant 0 : index
    %c0_46 = arith.constant 0 : index
    %350 = vector.load %arg10[%c0_45, %c0_46] : memref<2x40xf32, #tpu.memory_space<vmem>>, vector<2x8xf32>
    tpu.vector_store %arg10[%c0_45, %c0_46], %48 {strides = array<i32>} : memref<2x40xf32, #tpu.memory_space<vmem>>, vector<2x8xf32>,
    %c0_47 = arith.constant 0 : index
    %c8_48 = arith.constant 8 : index
    %351 = vector.load %arg10[%c0_47, %c8_48] : memref<2x40xf32, #tpu.memory_space<vmem>>, vector<2x32xf32>
    tpu.vector_store %arg10[%c0_47, %c8_48], %349 {strides = array<i32>} : memref<2x40xf32, #tpu.memory_space<vmem>>, vector<2x32xf32>,
    %c0_49 = arith.constant 0 : index
    %c0_50 = arith.constant 0 : index
    %352 = vector.load %arg10[%c0_49, %c0_50] : memref<2x40xf32, #tpu.memory_space<vmem>>, vector<2x40xf32>
    %cst_51 = arith.constant dense<0.000000e+00> : vector<2x128xf32>
    %353 = tpu.matmul %352, %325, %cst_51 {dimension_numbers = #tpu.dot_dimension_numbers<[1], [0], [0], [1], [0, 0, 1, 1], [], []>} : vector<2x40xf32>, vector<40x128xf32>, vector<2x128xf32> -> vector<2x128xf32>
    %354 = vector.broadcast %326 : vector<1x128xf32> to vector<2x128xf32>
    %355 = arith.addf %353, %354 : vector<2x128xf32>
    %356 = arith.negf %355 : vector<2x128xf32>
    %357 = math.exp %356 : vector<2x128xf32>
    %cst_52 = arith.constant 1.000000e+00 : f32
    %358 = vector.broadcast %cst_52 : f32 to vector<2x128xf32>
    %359 = arith.addf %358, %357 : vector<2x128xf32>
    %360 = arith.divf %358, %359 : vector<2x128xf32>
    %361 = math.tanh %355 : vector<2x128xf32>
    %362 = vector.extract_strided_slice %360 {offsets = [0, 0], sizes = [2, 32], strides = [1, 1]} : vector<2x128xf32> to vector<2x32xf32>
    %363 = vector.extract_strided_slice %360 {offsets = [0, 32], sizes = [2, 32], strides = [1, 1]} : vector<2x128xf32> to vector<2x32xf32>
    %364 = vector.extract_strided_slice %361 {offsets = [0, 64], sizes = [2, 32], strides = [1, 1]} : vector<2x128xf32> to vector<2x32xf32>
    %365 = vector.extract_strided_slice %360 {offsets = [0, 96], sizes = [2, 32], strides = [1, 1]} : vector<2x128xf32> to vector<2x32xf32>
    %366 = arith.mulf %363, %347 : vector<2x32xf32>
    %367 = arith.mulf %362, %364 : vector<2x32xf32>
    %368 = arith.addf %366, %367 : vector<2x32xf32>
    %369 = math.tanh %368 : vector<2x32xf32>
    %370 = arith.mulf %365, %369 : vector<2x32xf32>
    %c0_53 = arith.constant 0 : index
    %c0_54 = arith.constant 0 : index
    %371 = vector.load %arg10[%c0_53, %c0_54] : memref<2x40xf32, #tpu.memory_space<vmem>>, vector<2x8xf32>
    tpu.vector_store %arg10[%c0_53, %c0_54], %71 {strides = array<i32>} : memref<2x40xf32, #tpu.memory_space<vmem>>, vector<2x8xf32>,
    %c0_55 = arith.constant 0 : index
    %c8_56 = arith.constant 8 : index
    %372 = vector.load %arg10[%c0_55, %c8_56] : memref<2x40xf32, #tpu.memory_space<vmem>>, vector<2x32xf32>
    tpu.vector_store %arg10[%c0_55, %c8_56], %370 {strides = array<i32>} : memref<2x40xf32, #tpu.memory_space<vmem>>, vector<2x32xf32>,
    %c0_57 = arith.constant 0 : index
    %c0_58 = arith.constant 0 : index
    %373 = vector.load %arg10[%c0_57, %c0_58] : memref<2x40xf32, #tpu.memory_space<vmem>>, vector<2x40xf32>
    %cst_59 = arith.constant dense<0.000000e+00> : vector<2x128xf32>
    %374 = tpu.matmul %373, %325, %cst_59 {dimension_numbers = #tpu.dot_dimension_numbers<[1], [0], [0], [1], [0, 0, 1, 1], [], []>} : vector<2x40xf32>, vector<40x128xf32>, vector<2x128xf32> -> vector<2x128xf32>
    %375 = vector.broadcast %326 : vector<1x128xf32> to vector<2x128xf32>
    %376 = arith.addf %374, %375 : vector<2x128xf32>
    %377 = arith.negf %376 : vector<2x128xf32>
    %378 = math.exp %377 : vector<2x128xf32>
    %cst_60 = arith.constant 1.000000e+00 : f32
    %379 = vector.broadcast %cst_60 : f32 to vector<2x128xf32>
    %380 = arith.addf %379, %378 : vector<2x128xf32>
    %381 = arith.divf %379, %380 : vector<2x128xf32>
    %382 = math.tanh %376 : vector<2x128xf32>
    %383 = vector.extract_strided_slice %381 {offsets = [0, 0], sizes = [2, 32], strides = [1, 1]} : vector<2x128xf32> to vector<2x32xf32>
    %384 = vector.extract_strided_slice %381 {offsets = [0, 32], sizes = [2, 32], strides = [1, 1]} : vector<2x128xf32> to vector<2x32xf32>
    %385 = vector.extract_strided_slice %382 {offsets = [0, 64], sizes = [2, 32], strides = [1, 1]} : vector<2x128xf32> to vector<2x32xf32>
    %386 = vector.extract_strided_slice %381 {offsets = [0, 96], sizes = [2, 32], strides = [1, 1]} : vector<2x128xf32> to vector<2x32xf32>
    %387 = arith.mulf %384, %368 : vector<2x32xf32>
    %388 = arith.mulf %383, %385 : vector<2x32xf32>
    %389 = arith.addf %387, %388 : vector<2x32xf32>
    %390 = math.tanh %389 : vector<2x32xf32>
    %391 = arith.mulf %386, %390 : vector<2x32xf32>
    %c0_61 = arith.constant 0 : index
    %c0_62 = arith.constant 0 : index
    %392 = vector.load %arg10[%c0_61, %c0_62] : memref<2x40xf32, #tpu.memory_space<vmem>>, vector<2x8xf32>
    tpu.vector_store %arg10[%c0_61, %c0_62], %94 {strides = array<i32>} : memref<2x40xf32, #tpu.memory_space<vmem>>, vector<2x8xf32>,
    %c0_63 = arith.constant 0 : index
    %c8_64 = arith.constant 8 : index
    %393 = vector.load %arg10[%c0_63, %c8_64] : memref<2x40xf32, #tpu.memory_space<vmem>>, vector<2x32xf32>
    tpu.vector_store %arg10[%c0_63, %c8_64], %391 {strides = array<i32>} : memref<2x40xf32, #tpu.memory_space<vmem>>, vector<2x32xf32>,
    %c0_65 = arith.constant 0 : index
    %c0_66 = arith.constant 0 : index
    %394 = vector.load %arg10[%c0_65, %c0_66] : memref<2x40xf32, #tpu.memory_space<vmem>>, vector<2x40xf32>
    %cst_67 = arith.constant dense<0.000000e+00> : vector<2x128xf32>
    %395 = tpu.matmul %394, %325, %cst_67 {dimension_numbers = #tpu.dot_dimension_numbers<[1], [0], [0], [1], [0, 0, 1, 1], [], []>} : vector<2x40xf32>, vector<40x128xf32>, vector<2x128xf32> -> vector<2x128xf32>
    %396 = vector.broadcast %326 : vector<1x128xf32> to vector<2x128xf32>
    %397 = arith.addf %395, %396 : vector<2x128xf32>
    %398 = arith.negf %397 : vector<2x128xf32>
    %399 = math.exp %398 : vector<2x128xf32>
    %cst_68 = arith.constant 1.000000e+00 : f32
    %400 = vector.broadcast %cst_68 : f32 to vector<2x128xf32>
    %401 = arith.addf %400, %399 : vector<2x128xf32>
    %402 = arith.divf %400, %401 : vector<2x128xf32>
    %403 = math.tanh %397 : vector<2x128xf32>
    %404 = vector.extract_strided_slice %402 {offsets = [0, 0], sizes = [2, 32], strides = [1, 1]} : vector<2x128xf32> to vector<2x32xf32>
    %405 = vector.extract_strided_slice %402 {offsets = [0, 32], sizes = [2, 32], strides = [1, 1]} : vector<2x128xf32> to vector<2x32xf32>
    %406 = vector.extract_strided_slice %403 {offsets = [0, 64], sizes = [2, 32], strides = [1, 1]} : vector<2x128xf32> to vector<2x32xf32>
    %407 = vector.extract_strided_slice %402 {offsets = [0, 96], sizes = [2, 32], strides = [1, 1]} : vector<2x128xf32> to vector<2x32xf32>
    %408 = arith.mulf %405, %389 : vector<2x32xf32>
    %409 = arith.mulf %404, %406 : vector<2x32xf32>
    %410 = arith.addf %408, %409 : vector<2x32xf32>
    %411 = math.tanh %410 : vector<2x32xf32>
    %412 = arith.mulf %407, %411 : vector<2x32xf32>
    %c0_69 = arith.constant 0 : index
    %c0_70 = arith.constant 0 : index
    %413 = vector.load %arg10[%c0_69, %c0_70] : memref<2x40xf32, #tpu.memory_space<vmem>>, vector<2x8xf32>
    tpu.vector_store %arg10[%c0_69, %c0_70], %117 {strides = array<i32>} : memref<2x40xf32, #tpu.memory_space<vmem>>, vector<2x8xf32>,
    %c0_71 = arith.constant 0 : index
    %c8_72 = arith.constant 8 : index
    %414 = vector.load %arg10[%c0_71, %c8_72] : memref<2x40xf32, #tpu.memory_space<vmem>>, vector<2x32xf32>
    tpu.vector_store %arg10[%c0_71, %c8_72], %412 {strides = array<i32>} : memref<2x40xf32, #tpu.memory_space<vmem>>, vector<2x32xf32>,
    %c0_73 = arith.constant 0 : index
    %c0_74 = arith.constant 0 : index
    %415 = vector.load %arg10[%c0_73, %c0_74] : memref<2x40xf32, #tpu.memory_space<vmem>>, vector<2x40xf32>
    %cst_75 = arith.constant dense<0.000000e+00> : vector<2x128xf32>
    %416 = tpu.matmul %415, %325, %cst_75 {dimension_numbers = #tpu.dot_dimension_numbers<[1], [0], [0], [1], [0, 0, 1, 1], [], []>} : vector<2x40xf32>, vector<40x128xf32>, vector<2x128xf32> -> vector<2x128xf32>
    %417 = vector.broadcast %326 : vector<1x128xf32> to vector<2x128xf32>
    %418 = arith.addf %416, %417 : vector<2x128xf32>
    %419 = arith.negf %418 : vector<2x128xf32>
    %420 = math.exp %419 : vector<2x128xf32>
    %cst_76 = arith.constant 1.000000e+00 : f32
    %421 = vector.broadcast %cst_76 : f32 to vector<2x128xf32>
    %422 = arith.addf %421, %420 : vector<2x128xf32>
    %423 = arith.divf %421, %422 : vector<2x128xf32>
    %424 = math.tanh %418 : vector<2x128xf32>
    %425 = vector.extract_strided_slice %423 {offsets = [0, 0], sizes = [2, 32], strides = [1, 1]} : vector<2x128xf32> to vector<2x32xf32>
    %426 = vector.extract_strided_slice %423 {offsets = [0, 32], sizes = [2, 32], strides = [1, 1]} : vector<2x128xf32> to vector<2x32xf32>
    %427 = vector.extract_strided_slice %424 {offsets = [0, 64], sizes = [2, 32], strides = [1, 1]} : vector<2x128xf32> to vector<2x32xf32>
    %428 = vector.extract_strided_slice %423 {offsets = [0, 96], sizes = [2, 32], strides = [1, 1]} : vector<2x128xf32> to vector<2x32xf32>
    %429 = arith.mulf %426, %410 : vector<2x32xf32>
    %430 = arith.mulf %425, %427 : vector<2x32xf32>
    %431 = arith.addf %429, %430 : vector<2x32xf32>
    %432 = math.tanh %431 : vector<2x32xf32>
    %433 = arith.mulf %428, %432 : vector<2x32xf32>
    %c0_77 = arith.constant 0 : index
    %c0_78 = arith.constant 0 : index
    %434 = vector.load %arg10[%c0_77, %c0_78] : memref<2x40xf32, #tpu.memory_space<vmem>>, vector<2x8xf32>
    tpu.vector_store %arg10[%c0_77, %c0_78], %140 {strides = array<i32>} : memref<2x40xf32, #tpu.memory_space<vmem>>, vector<2x8xf32>,
    %c0_79 = arith.constant 0 : index
    %c8_80 = arith.constant 8 : index
    %435 = vector.load %arg10[%c0_79, %c8_80] : memref<2x40xf32, #tpu.memory_space<vmem>>, vector<2x32xf32>
    tpu.vector_store %arg10[%c0_79, %c8_80], %433 {strides = array<i32>} : memref<2x40xf32, #tpu.memory_space<vmem>>, vector<2x32xf32>,
    %c0_81 = arith.constant 0 : index
    %c0_82 = arith.constant 0 : index
    %436 = vector.load %arg10[%c0_81, %c0_82] : memref<2x40xf32, #tpu.memory_space<vmem>>, vector<2x40xf32>
    %cst_83 = arith.constant dense<0.000000e+00> : vector<2x128xf32>
    %437 = tpu.matmul %436, %325, %cst_83 {dimension_numbers = #tpu.dot_dimension_numbers<[1], [0], [0], [1], [0, 0, 1, 1], [], []>} : vector<2x40xf32>, vector<40x128xf32>, vector<2x128xf32> -> vector<2x128xf32>
    %438 = vector.broadcast %326 : vector<1x128xf32> to vector<2x128xf32>
    %439 = arith.addf %437, %438 : vector<2x128xf32>
    %440 = arith.negf %439 : vector<2x128xf32>
    %441 = math.exp %440 : vector<2x128xf32>
    %cst_84 = arith.constant 1.000000e+00 : f32
    %442 = vector.broadcast %cst_84 : f32 to vector<2x128xf32>
    %443 = arith.addf %442, %441 : vector<2x128xf32>
    %444 = arith.divf %442, %443 : vector<2x128xf32>
    %445 = math.tanh %439 : vector<2x128xf32>
    %446 = vector.extract_strided_slice %444 {offsets = [0, 0], sizes = [2, 32], strides = [1, 1]} : vector<2x128xf32> to vector<2x32xf32>
    %447 = vector.extract_strided_slice %444 {offsets = [0, 32], sizes = [2, 32], strides = [1, 1]} : vector<2x128xf32> to vector<2x32xf32>
    %448 = vector.extract_strided_slice %445 {offsets = [0, 64], sizes = [2, 32], strides = [1, 1]} : vector<2x128xf32> to vector<2x32xf32>
    %449 = vector.extract_strided_slice %444 {offsets = [0, 96], sizes = [2, 32], strides = [1, 1]} : vector<2x128xf32> to vector<2x32xf32>
    %450 = arith.mulf %447, %431 : vector<2x32xf32>
    %451 = arith.mulf %446, %448 : vector<2x32xf32>
    %452 = arith.addf %450, %451 : vector<2x32xf32>
    %453 = math.tanh %452 : vector<2x32xf32>
    %454 = arith.mulf %449, %453 : vector<2x32xf32>
    %c0_85 = arith.constant 0 : index
    %c0_86 = arith.constant 0 : index
    %455 = vector.load %arg10[%c0_85, %c0_86] : memref<2x40xf32, #tpu.memory_space<vmem>>, vector<2x8xf32>
    tpu.vector_store %arg10[%c0_85, %c0_86], %163 {strides = array<i32>} : memref<2x40xf32, #tpu.memory_space<vmem>>, vector<2x8xf32>,
    %c0_87 = arith.constant 0 : index
    %c8_88 = arith.constant 8 : index
    %456 = vector.load %arg10[%c0_87, %c8_88] : memref<2x40xf32, #tpu.memory_space<vmem>>, vector<2x32xf32>
    tpu.vector_store %arg10[%c0_87, %c8_88], %454 {strides = array<i32>} : memref<2x40xf32, #tpu.memory_space<vmem>>, vector<2x32xf32>,
    %c0_89 = arith.constant 0 : index
    %c0_90 = arith.constant 0 : index
    %457 = vector.load %arg10[%c0_89, %c0_90] : memref<2x40xf32, #tpu.memory_space<vmem>>, vector<2x40xf32>
    %cst_91 = arith.constant dense<0.000000e+00> : vector<2x128xf32>
    %458 = tpu.matmul %457, %325, %cst_91 {dimension_numbers = #tpu.dot_dimension_numbers<[1], [0], [0], [1], [0, 0, 1, 1], [], []>} : vector<2x40xf32>, vector<40x128xf32>, vector<2x128xf32> -> vector<2x128xf32>
    %459 = vector.broadcast %326 : vector<1x128xf32> to vector<2x128xf32>
    %460 = arith.addf %458, %459 : vector<2x128xf32>
    %461 = arith.negf %460 : vector<2x128xf32>
    %462 = math.exp %461 : vector<2x128xf32>
    %cst_92 = arith.constant 1.000000e+00 : f32
    %463 = vector.broadcast %cst_92 : f32 to vector<2x128xf32>
    %464 = arith.addf %463, %462 : vector<2x128xf32>
    %465 = arith.divf %463, %464 : vector<2x128xf32>
    %466 = math.tanh %460 : vector<2x128xf32>
    %467 = vector.extract_strided_slice %465 {offsets = [0, 0], sizes = [2, 32], strides = [1, 1]} : vector<2x128xf32> to vector<2x32xf32>
    %468 = vector.extract_strided_slice %465 {offsets = [0, 32], sizes = [2, 32], strides = [1, 1]} : vector<2x128xf32> to vector<2x32xf32>
    %469 = vector.extract_strided_slice %466 {offsets = [0, 64], sizes = [2, 32], strides = [1, 1]} : vector<2x128xf32> to vector<2x32xf32>
    %470 = vector.extract_strided_slice %465 {offsets = [0, 96], sizes = [2, 32], strides = [1, 1]} : vector<2x128xf32> to vector<2x32xf32>
    %471 = arith.mulf %468, %452 : vector<2x32xf32>
    %472 = arith.mulf %467, %469 : vector<2x32xf32>
    %473 = arith.addf %471, %472 : vector<2x32xf32>
    %474 = math.tanh %473 : vector<2x32xf32>
    %475 = arith.mulf %470, %474 : vector<2x32xf32>
    %c0_93 = arith.constant 0 : index
    %c0_94 = arith.constant 0 : index
    %476 = vector.load %arg10[%c0_93, %c0_94] : memref<2x40xf32, #tpu.memory_space<vmem>>, vector<2x8xf32>
    tpu.vector_store %arg10[%c0_93, %c0_94], %186 {strides = array<i32>} : memref<2x40xf32, #tpu.memory_space<vmem>>, vector<2x8xf32>,
    %c0_95 = arith.constant 0 : index
    %c8_96 = arith.constant 8 : index
    %477 = vector.load %arg10[%c0_95, %c8_96] : memref<2x40xf32, #tpu.memory_space<vmem>>, vector<2x32xf32>
    tpu.vector_store %arg10[%c0_95, %c8_96], %475 {strides = array<i32>} : memref<2x40xf32, #tpu.memory_space<vmem>>, vector<2x32xf32>,
    %c0_97 = arith.constant 0 : index
    %c0_98 = arith.constant 0 : index
    %478 = vector.load %arg10[%c0_97, %c0_98] : memref<2x40xf32, #tpu.memory_space<vmem>>, vector<2x40xf32>
    %cst_99 = arith.constant dense<0.000000e+00> : vector<2x128xf32>
    %479 = tpu.matmul %478, %325, %cst_99 {dimension_numbers = #tpu.dot_dimension_numbers<[1], [0], [0], [1], [0, 0, 1, 1], [], []>} : vector<2x40xf32>, vector<40x128xf32>, vector<2x128xf32> -> vector<2x128xf32>
    %480 = vector.broadcast %326 : vector<1x128xf32> to vector<2x128xf32>
    %481 = arith.addf %479, %480 : vector<2x128xf32>
    %482 = arith.negf %481 : vector<2x128xf32>
    %483 = math.exp %482 : vector<2x128xf32>
    %cst_100 = arith.constant 1.000000e+00 : f32
    %484 = vector.broadcast %cst_100 : f32 to vector<2x128xf32>
    %485 = arith.addf %484, %483 : vector<2x128xf32>
    %486 = arith.divf %484, %485 : vector<2x128xf32>
    %487 = math.tanh %481 : vector<2x128xf32>
    %488 = vector.extract_strided_slice %486 {offsets = [0, 0], sizes = [2, 32], strides = [1, 1]} : vector<2x128xf32> to vector<2x32xf32>
    %489 = vector.extract_strided_slice %486 {offsets = [0, 32], sizes = [2, 32], strides = [1, 1]} : vector<2x128xf32> to vector<2x32xf32>
    %490 = vector.extract_strided_slice %487 {offsets = [0, 64], sizes = [2, 32], strides = [1, 1]} : vector<2x128xf32> to vector<2x32xf32>
    %491 = vector.extract_strided_slice %486 {offsets = [0, 96], sizes = [2, 32], strides = [1, 1]} : vector<2x128xf32> to vector<2x32xf32>
    %492 = arith.mulf %489, %473 : vector<2x32xf32>
    %493 = arith.mulf %488, %490 : vector<2x32xf32>
    %494 = arith.addf %492, %493 : vector<2x32xf32>
    %495 = math.tanh %494 : vector<2x32xf32>
    %496 = arith.mulf %491, %495 : vector<2x32xf32>
    %c0_101 = arith.constant 0 : index
    %c0_102 = arith.constant 0 : index
    %497 = vector.load %arg10[%c0_101, %c0_102] : memref<2x40xf32, #tpu.memory_space<vmem>>, vector<2x8xf32>
    tpu.vector_store %arg10[%c0_101, %c0_102], %209 {strides = array<i32>} : memref<2x40xf32, #tpu.memory_space<vmem>>, vector<2x8xf32>,
    %c0_103 = arith.constant 0 : index
    %c8_104 = arith.constant 8 : index
    %498 = vector.load %arg10[%c0_103, %c8_104] : memref<2x40xf32, #tpu.memory_space<vmem>>, vector<2x32xf32>
    tpu.vector_store %arg10[%c0_103, %c8_104], %496 {strides = array<i32>} : memref<2x40xf32, #tpu.memory_space<vmem>>, vector<2x32xf32>,
    %c0_105 = arith.constant 0 : index
    %c0_106 = arith.constant 0 : index
    %499 = vector.load %arg10[%c0_105, %c0_106] : memref<2x40xf32, #tpu.memory_space<vmem>>, vector<2x40xf32>
    %cst_107 = arith.constant dense<0.000000e+00> : vector<2x128xf32>
    %500 = tpu.matmul %499, %325, %cst_107 {dimension_numbers = #tpu.dot_dimension_numbers<[1], [0], [0], [1], [0, 0, 1, 1], [], []>} : vector<2x40xf32>, vector<40x128xf32>, vector<2x128xf32> -> vector<2x128xf32>
    %501 = vector.broadcast %326 : vector<1x128xf32> to vector<2x128xf32>
    %502 = arith.addf %500, %501 : vector<2x128xf32>
    %503 = arith.negf %502 : vector<2x128xf32>
    %504 = math.exp %503 : vector<2x128xf32>
    %cst_108 = arith.constant 1.000000e+00 : f32
    %505 = vector.broadcast %cst_108 : f32 to vector<2x128xf32>
    %506 = arith.addf %505, %504 : vector<2x128xf32>
    %507 = arith.divf %505, %506 : vector<2x128xf32>
    %508 = math.tanh %502 : vector<2x128xf32>
    %509 = vector.extract_strided_slice %507 {offsets = [0, 0], sizes = [2, 32], strides = [1, 1]} : vector<2x128xf32> to vector<2x32xf32>
    %510 = vector.extract_strided_slice %507 {offsets = [0, 32], sizes = [2, 32], strides = [1, 1]} : vector<2x128xf32> to vector<2x32xf32>
    %511 = vector.extract_strided_slice %508 {offsets = [0, 64], sizes = [2, 32], strides = [1, 1]} : vector<2x128xf32> to vector<2x32xf32>
    %512 = vector.extract_strided_slice %507 {offsets = [0, 96], sizes = [2, 32], strides = [1, 1]} : vector<2x128xf32> to vector<2x32xf32>
    %513 = arith.mulf %510, %494 : vector<2x32xf32>
    %514 = arith.mulf %509, %511 : vector<2x32xf32>
    %515 = arith.addf %513, %514 : vector<2x32xf32>
    %516 = math.tanh %515 : vector<2x32xf32>
    %517 = arith.mulf %512, %516 : vector<2x32xf32>
    %c0_109 = arith.constant 0 : index
    %c0_110 = arith.constant 0 : index
    %518 = vector.load %arg10[%c0_109, %c0_110] : memref<2x40xf32, #tpu.memory_space<vmem>>, vector<2x8xf32>
    tpu.vector_store %arg10[%c0_109, %c0_110], %232 {strides = array<i32>} : memref<2x40xf32, #tpu.memory_space<vmem>>, vector<2x8xf32>,
    %c0_111 = arith.constant 0 : index
    %c8_112 = arith.constant 8 : index
    %519 = vector.load %arg10[%c0_111, %c8_112] : memref<2x40xf32, #tpu.memory_space<vmem>>, vector<2x32xf32>
    tpu.vector_store %arg10[%c0_111, %c8_112], %517 {strides = array<i32>} : memref<2x40xf32, #tpu.memory_space<vmem>>, vector<2x32xf32>,
    %c0_113 = arith.constant 0 : index
    %c0_114 = arith.constant 0 : index
    %520 = vector.load %arg10[%c0_113, %c0_114] : memref<2x40xf32, #tpu.memory_space<vmem>>, vector<2x40xf32>
    %cst_115 = arith.constant dense<0.000000e+00> : vector<2x128xf32>
    %521 = tpu.matmul %520, %325, %cst_115 {dimension_numbers = #tpu.dot_dimension_numbers<[1], [0], [0], [1], [0, 0, 1, 1], [], []>} : vector<2x40xf32>, vector<40x128xf32>, vector<2x128xf32> -> vector<2x128xf32>
    %522 = vector.broadcast %326 : vector<1x128xf32> to vector<2x128xf32>
    %523 = arith.addf %521, %522 : vector<2x128xf32>
    %524 = arith.negf %523 : vector<2x128xf32>
    %525 = math.exp %524 : vector<2x128xf32>
    %cst_116 = arith.constant 1.000000e+00 : f32
    %526 = vector.broadcast %cst_116 : f32 to vector<2x128xf32>
    %527 = arith.addf %526, %525 : vector<2x128xf32>
    %528 = arith.divf %526, %527 : vector<2x128xf32>
    %529 = math.tanh %523 : vector<2x128xf32>
    %530 = vector.extract_strided_slice %528 {offsets = [0, 0], sizes = [2, 32], strides = [1, 1]} : vector<2x128xf32> to vector<2x32xf32>
    %531 = vector.extract_strided_slice %528 {offsets = [0, 32], sizes = [2, 32], strides = [1, 1]} : vector<2x128xf32> to vector<2x32xf32>
    %532 = vector.extract_strided_slice %529 {offsets = [0, 64], sizes = [2, 32], strides = [1, 1]} : vector<2x128xf32> to vector<2x32xf32>
    %533 = vector.extract_strided_slice %528 {offsets = [0, 96], sizes = [2, 32], strides = [1, 1]} : vector<2x128xf32> to vector<2x32xf32>
    %534 = arith.mulf %531, %515 : vector<2x32xf32>
    %535 = arith.mulf %530, %532 : vector<2x32xf32>
    %536 = arith.addf %534, %535 : vector<2x32xf32>
    %537 = math.tanh %536 : vector<2x32xf32>
    %538 = arith.mulf %533, %537 : vector<2x32xf32>
    %c0_117 = arith.constant 0 : index
    %c0_118 = arith.constant 0 : index
    %539 = vector.load %arg10[%c0_117, %c0_118] : memref<2x40xf32, #tpu.memory_space<vmem>>, vector<2x8xf32>
    tpu.vector_store %arg10[%c0_117, %c0_118], %255 {strides = array<i32>} : memref<2x40xf32, #tpu.memory_space<vmem>>, vector<2x8xf32>,
    %c0_119 = arith.constant 0 : index
    %c8_120 = arith.constant 8 : index
    %540 = vector.load %arg10[%c0_119, %c8_120] : memref<2x40xf32, #tpu.memory_space<vmem>>, vector<2x32xf32>
    tpu.vector_store %arg10[%c0_119, %c8_120], %538 {strides = array<i32>} : memref<2x40xf32, #tpu.memory_space<vmem>>, vector<2x32xf32>,
    %c0_121 = arith.constant 0 : index
    %c0_122 = arith.constant 0 : index
    %541 = vector.load %arg10[%c0_121, %c0_122] : memref<2x40xf32, #tpu.memory_space<vmem>>, vector<2x40xf32>
    %cst_123 = arith.constant dense<0.000000e+00> : vector<2x128xf32>
    %542 = tpu.matmul %541, %325, %cst_123 {dimension_numbers = #tpu.dot_dimension_numbers<[1], [0], [0], [1], [0, 0, 1, 1], [], []>} : vector<2x40xf32>, vector<40x128xf32>, vector<2x128xf32> -> vector<2x128xf32>
    %543 = vector.broadcast %326 : vector<1x128xf32> to vector<2x128xf32>
    %544 = arith.addf %542, %543 : vector<2x128xf32>
    %545 = arith.negf %544 : vector<2x128xf32>
    %546 = math.exp %545 : vector<2x128xf32>
    %cst_124 = arith.constant 1.000000e+00 : f32
    %547 = vector.broadcast %cst_124 : f32 to vector<2x128xf32>
    %548 = arith.addf %547, %546 : vector<2x128xf32>
    %549 = arith.divf %547, %548 : vector<2x128xf32>
    %550 = math.tanh %544 : vector<2x128xf32>
    %551 = vector.extract_strided_slice %549 {offsets = [0, 0], sizes = [2, 32], strides = [1, 1]} : vector<2x128xf32> to vector<2x32xf32>
    %552 = vector.extract_strided_slice %549 {offsets = [0, 32], sizes = [2, 32], strides = [1, 1]} : vector<2x128xf32> to vector<2x32xf32>
    %553 = vector.extract_strided_slice %550 {offsets = [0, 64], sizes = [2, 32], strides = [1, 1]} : vector<2x128xf32> to vector<2x32xf32>
    %554 = vector.extract_strided_slice %549 {offsets = [0, 96], sizes = [2, 32], strides = [1, 1]} : vector<2x128xf32> to vector<2x32xf32>
    %555 = arith.mulf %552, %536 : vector<2x32xf32>
    %556 = arith.mulf %551, %553 : vector<2x32xf32>
    %557 = arith.addf %555, %556 : vector<2x32xf32>
    %558 = math.tanh %557 : vector<2x32xf32>
    %559 = arith.mulf %554, %558 : vector<2x32xf32>
    %c0_125 = arith.constant 0 : index
    %c0_126 = arith.constant 0 : index
    %560 = vector.load %arg10[%c0_125, %c0_126] : memref<2x40xf32, #tpu.memory_space<vmem>>, vector<2x8xf32>
    tpu.vector_store %arg10[%c0_125, %c0_126], %278 {strides = array<i32>} : memref<2x40xf32, #tpu.memory_space<vmem>>, vector<2x8xf32>,
    %c0_127 = arith.constant 0 : index
    %c8_128 = arith.constant 8 : index
    %561 = vector.load %arg10[%c0_127, %c8_128] : memref<2x40xf32, #tpu.memory_space<vmem>>, vector<2x32xf32>
    tpu.vector_store %arg10[%c0_127, %c8_128], %559 {strides = array<i32>} : memref<2x40xf32, #tpu.memory_space<vmem>>, vector<2x32xf32>,
    %c0_129 = arith.constant 0 : index
    %c0_130 = arith.constant 0 : index
    %562 = vector.load %arg10[%c0_129, %c0_130] : memref<2x40xf32, #tpu.memory_space<vmem>>, vector<2x40xf32>
    %cst_131 = arith.constant dense<0.000000e+00> : vector<2x128xf32>
    %563 = tpu.matmul %562, %325, %cst_131 {dimension_numbers = #tpu.dot_dimension_numbers<[1], [0], [0], [1], [0, 0, 1, 1], [], []>} : vector<2x40xf32>, vector<40x128xf32>, vector<2x128xf32> -> vector<2x128xf32>
    %564 = vector.broadcast %326 : vector<1x128xf32> to vector<2x128xf32>
    %565 = arith.addf %563, %564 : vector<2x128xf32>
    %566 = arith.negf %565 : vector<2x128xf32>
    %567 = math.exp %566 : vector<2x128xf32>
    %cst_132 = arith.constant 1.000000e+00 : f32
    %568 = vector.broadcast %cst_132 : f32 to vector<2x128xf32>
    %569 = arith.addf %568, %567 : vector<2x128xf32>
    %570 = arith.divf %568, %569 : vector<2x128xf32>
    %571 = math.tanh %565 : vector<2x128xf32>
    %572 = vector.extract_strided_slice %570 {offsets = [0, 0], sizes = [2, 32], strides = [1, 1]} : vector<2x128xf32> to vector<2x32xf32>
    %573 = vector.extract_strided_slice %570 {offsets = [0, 32], sizes = [2, 32], strides = [1, 1]} : vector<2x128xf32> to vector<2x32xf32>
    %574 = vector.extract_strided_slice %571 {offsets = [0, 64], sizes = [2, 32], strides = [1, 1]} : vector<2x128xf32> to vector<2x32xf32>
    %575 = vector.extract_strided_slice %570 {offsets = [0, 96], sizes = [2, 32], strides = [1, 1]} : vector<2x128xf32> to vector<2x32xf32>
    %576 = arith.mulf %573, %557 : vector<2x32xf32>
    %577 = arith.mulf %572, %574 : vector<2x32xf32>
    %578 = arith.addf %576, %577 : vector<2x32xf32>
    %579 = math.tanh %578 : vector<2x32xf32>
    %580 = arith.mulf %575, %579 : vector<2x32xf32>
    %c0_133 = arith.constant 0 : index
    %c0_134 = arith.constant 0 : index
    %581 = vector.load %arg10[%c0_133, %c0_134] : memref<2x40xf32, #tpu.memory_space<vmem>>, vector<2x8xf32>
    tpu.vector_store %arg10[%c0_133, %c0_134], %301 {strides = array<i32>} : memref<2x40xf32, #tpu.memory_space<vmem>>, vector<2x8xf32>,
    %c0_135 = arith.constant 0 : index
    %c8_136 = arith.constant 8 : index
    %582 = vector.load %arg10[%c0_135, %c8_136] : memref<2x40xf32, #tpu.memory_space<vmem>>, vector<2x32xf32>
    tpu.vector_store %arg10[%c0_135, %c8_136], %580 {strides = array<i32>} : memref<2x40xf32, #tpu.memory_space<vmem>>, vector<2x32xf32>,
    %c0_137 = arith.constant 0 : index
    %c0_138 = arith.constant 0 : index
    %583 = vector.load %arg10[%c0_137, %c0_138] : memref<2x40xf32, #tpu.memory_space<vmem>>, vector<2x40xf32>
    %cst_139 = arith.constant dense<0.000000e+00> : vector<2x128xf32>
    %584 = tpu.matmul %583, %325, %cst_139 {dimension_numbers = #tpu.dot_dimension_numbers<[1], [0], [0], [1], [0, 0, 1, 1], [], []>} : vector<2x40xf32>, vector<40x128xf32>, vector<2x128xf32> -> vector<2x128xf32>
    %585 = vector.broadcast %326 : vector<1x128xf32> to vector<2x128xf32>
    %586 = arith.addf %584, %585 : vector<2x128xf32>
    %587 = arith.negf %586 : vector<2x128xf32>
    %588 = math.exp %587 : vector<2x128xf32>
    %cst_140 = arith.constant 1.000000e+00 : f32
    %589 = vector.broadcast %cst_140 : f32 to vector<2x128xf32>
    %590 = arith.addf %589, %588 : vector<2x128xf32>
    %591 = arith.divf %589, %590 : vector<2x128xf32>
    %592 = math.tanh %586 : vector<2x128xf32>
    %593 = vector.extract_strided_slice %591 {offsets = [0, 0], sizes = [2, 32], strides = [1, 1]} : vector<2x128xf32> to vector<2x32xf32>
    %594 = vector.extract_strided_slice %591 {offsets = [0, 32], sizes = [2, 32], strides = [1, 1]} : vector<2x128xf32> to vector<2x32xf32>
    %595 = vector.extract_strided_slice %592 {offsets = [0, 64], sizes = [2, 32], strides = [1, 1]} : vector<2x128xf32> to vector<2x32xf32>
    %596 = vector.extract_strided_slice %591 {offsets = [0, 96], sizes = [2, 32], strides = [1, 1]} : vector<2x128xf32> to vector<2x32xf32>
    %597 = arith.mulf %594, %578 : vector<2x32xf32>
    %598 = arith.mulf %593, %595 : vector<2x32xf32>
    %599 = arith.addf %597, %598 : vector<2x32xf32>
    %600 = math.tanh %599 : vector<2x32xf32>
    %601 = arith.mulf %596, %600 : vector<2x32xf32>
    %c0_141 = arith.constant 0 : index
    %c0_142 = arith.constant 0 : index
    %602 = vector.load %arg10[%c0_141, %c0_142] : memref<2x40xf32, #tpu.memory_space<vmem>>, vector<2x8xf32>
    tpu.vector_store %arg10[%c0_141, %c0_142], %324 {strides = array<i32>} : memref<2x40xf32, #tpu.memory_space<vmem>>, vector<2x8xf32>,
    %c0_143 = arith.constant 0 : index
    %c8_144 = arith.constant 8 : index
    %603 = vector.load %arg10[%c0_143, %c8_144] : memref<2x40xf32, #tpu.memory_space<vmem>>, vector<2x32xf32>
    tpu.vector_store %arg10[%c0_143, %c8_144], %601 {strides = array<i32>} : memref<2x40xf32, #tpu.memory_space<vmem>>, vector<2x32xf32>,
    %c0_145 = arith.constant 0 : index
    %c0_146 = arith.constant 0 : index
    %604 = vector.load %arg10[%c0_145, %c0_146] : memref<2x40xf32, #tpu.memory_space<vmem>>, vector<2x40xf32>
    %cst_147 = arith.constant dense<0.000000e+00> : vector<2x128xf32>
    %605 = tpu.matmul %604, %325, %cst_147 {dimension_numbers = #tpu.dot_dimension_numbers<[1], [0], [0], [1], [0, 0, 1, 1], [], []>} : vector<2x40xf32>, vector<40x128xf32>, vector<2x128xf32> -> vector<2x128xf32>
    %606 = vector.broadcast %326 : vector<1x128xf32> to vector<2x128xf32>
    %607 = arith.addf %605, %606 : vector<2x128xf32>
    %608 = arith.negf %607 : vector<2x128xf32>
    %609 = math.exp %608 : vector<2x128xf32>
    %cst_148 = arith.constant 1.000000e+00 : f32
    %610 = vector.broadcast %cst_148 : f32 to vector<2x128xf32>
    %611 = arith.addf %610, %609 : vector<2x128xf32>
    %612 = arith.divf %610, %611 : vector<2x128xf32>
    %613 = math.tanh %607 : vector<2x128xf32>
    %614 = vector.extract_strided_slice %612 {offsets = [0, 0], sizes = [2, 32], strides = [1, 1]} : vector<2x128xf32> to vector<2x32xf32>
    %615 = vector.extract_strided_slice %612 {offsets = [0, 32], sizes = [2, 32], strides = [1, 1]} : vector<2x128xf32> to vector<2x32xf32>
    %616 = vector.extract_strided_slice %613 {offsets = [0, 64], sizes = [2, 32], strides = [1, 1]} : vector<2x128xf32> to vector<2x32xf32>
    %617 = vector.extract_strided_slice %612 {offsets = [0, 96], sizes = [2, 32], strides = [1, 1]} : vector<2x128xf32> to vector<2x32xf32>
    %618 = arith.mulf %615, %599 : vector<2x32xf32>
    %619 = arith.mulf %614, %616 : vector<2x32xf32>
    %620 = arith.addf %618, %619 : vector<2x32xf32>
    %621 = math.tanh %620 : vector<2x32xf32>
    %622 = arith.mulf %617, %621 : vector<2x32xf32>
    %c0_149 = arith.constant 0 : index
    %c0_150 = arith.constant 0 : index
    %623 = vector.load %arg5[%c0_149, %c0_150] : memref<64x128xf32, #tpu.memory_space<vmem>>, vector<64x128xf32>
    %c0_151 = arith.constant 0 : index
    %c0_152 = arith.constant 0 : index
    %624 = vector.load %arg6[%c0_151, %c0_152] : memref<1x128xf32, #tpu.memory_space<vmem>>, vector<1x128xf32>
    %cst_153 = arith.constant 0.000000e+00 : f32
    %625 = vector.broadcast %cst_153 : f32 to vector<2x32xf32>
    %cst_154 = arith.constant 0.000000e+00 : f32
    %626 = vector.broadcast %cst_154 : f32 to vector<2x32xf32>
    %c0_155 = arith.constant 0 : index
    %c0_156 = arith.constant 0 : index
    %627 = vector.load %arg11[%c0_155, %c0_156] : memref<2x64xf32, #tpu.memory_space<vmem>>, vector<2x32xf32>
    tpu.vector_store %arg11[%c0_155, %c0_156], %349 {strides = array<i32>} : memref<2x64xf32, #tpu.memory_space<vmem>>, vector<2x32xf32>,
    %c0_157 = arith.constant 0 : index
    %c32 = arith.constant 32 : index
    %628 = vector.load %arg11[%c0_157, %c32] : memref<2x64xf32, #tpu.memory_space<vmem>>, vector<2x32xf32>
    tpu.vector_store %arg11[%c0_157, %c32], %625 {strides = array<i32>} : memref<2x64xf32, #tpu.memory_space<vmem>>, vector<2x32xf32>,
    %c0_158 = arith.constant 0 : index
    %c0_159 = arith.constant 0 : index
    %629 = vector.load %arg11[%c0_158, %c0_159] : memref<2x64xf32, #tpu.memory_space<vmem>>, vector<2x64xf32>
    %cst_160 = arith.constant dense<0.000000e+00> : vector<2x128xf32>
    %630 = tpu.matmul %629, %623, %cst_160 {dimension_numbers = #tpu.dot_dimension_numbers<[1], [0], [0], [1], [0, 0, 1, 1], [], []>} : vector<2x64xf32>, vector<64x128xf32>, vector<2x128xf32> -> vector<2x128xf32>
    %631 = vector.broadcast %624 : vector<1x128xf32> to vector<2x128xf32>
    %632 = arith.addf %630, %631 : vector<2x128xf32>
    %633 = arith.negf %632 : vector<2x128xf32>
    %634 = math.exp %633 : vector<2x128xf32>
    %cst_161 = arith.constant 1.000000e+00 : f32
    %635 = vector.broadcast %cst_161 : f32 to vector<2x128xf32>
    %636 = arith.addf %635, %634 : vector<2x128xf32>
    %637 = arith.divf %635, %636 : vector<2x128xf32>
    %638 = math.tanh %632 : vector<2x128xf32>
    %639 = vector.extract_strided_slice %637 {offsets = [0, 0], sizes = [2, 32], strides = [1, 1]} : vector<2x128xf32> to vector<2x32xf32>
    %640 = vector.extract_strided_slice %637 {offsets = [0, 32], sizes = [2, 32], strides = [1, 1]} : vector<2x128xf32> to vector<2x32xf32>
    %641 = vector.extract_strided_slice %638 {offsets = [0, 64], sizes = [2, 32], strides = [1, 1]} : vector<2x128xf32> to vector<2x32xf32>
    %642 = vector.extract_strided_slice %637 {offsets = [0, 96], sizes = [2, 32], strides = [1, 1]} : vector<2x128xf32> to vector<2x32xf32>
    %643 = arith.mulf %640, %626 : vector<2x32xf32>
    %644 = arith.mulf %639, %641 : vector<2x32xf32>
    %645 = arith.addf %643, %644 : vector<2x32xf32>
    %646 = math.tanh %645 : vector<2x32xf32>
    %647 = arith.mulf %642, %646 : vector<2x32xf32>
    %c0_162 = arith.constant 0 : index
    %c0_163 = arith.constant 0 : index
    %648 = vector.load %arg11[%c0_162, %c0_163] : memref<2x64xf32, #tpu.memory_space<vmem>>, vector<2x32xf32>
    tpu.vector_store %arg11[%c0_162, %c0_163], %370 {strides = array<i32>} : memref<2x64xf32, #tpu.memory_space<vmem>>, vector<2x32xf32>,
    %c0_164 = arith.constant 0 : index
    %c32_165 = arith.constant 32 : index
    %649 = vector.load %arg11[%c0_164, %c32_165] : memref<2x64xf32, #tpu.memory_space<vmem>>, vector<2x32xf32>
    tpu.vector_store %arg11[%c0_164, %c32_165], %647 {strides = array<i32>} : memref<2x64xf32, #tpu.memory_space<vmem>>, vector<2x32xf32>,
    %c0_166 = arith.constant 0 : index
    %c0_167 = arith.constant 0 : index
    %650 = vector.load %arg11[%c0_166, %c0_167] : memref<2x64xf32, #tpu.memory_space<vmem>>, vector<2x64xf32>
    %cst_168 = arith.constant dense<0.000000e+00> : vector<2x128xf32>
    %651 = tpu.matmul %650, %623, %cst_168 {dimension_numbers = #tpu.dot_dimension_numbers<[1], [0], [0], [1], [0, 0, 1, 1], [], []>} : vector<2x64xf32>, vector<64x128xf32>, vector<2x128xf32> -> vector<2x128xf32>
    %652 = vector.broadcast %624 : vector<1x128xf32> to vector<2x128xf32>
    %653 = arith.addf %651, %652 : vector<2x128xf32>
    %654 = arith.negf %653 : vector<2x128xf32>
    %655 = math.exp %654 : vector<2x128xf32>
    %cst_169 = arith.constant 1.000000e+00 : f32
    %656 = vector.broadcast %cst_169 : f32 to vector<2x128xf32>
    %657 = arith.addf %656, %655 : vector<2x128xf32>
    %658 = arith.divf %656, %657 : vector<2x128xf32>
    %659 = math.tanh %653 : vector<2x128xf32>
    %660 = vector.extract_strided_slice %658 {offsets = [0, 0], sizes = [2, 32], strides = [1, 1]} : vector<2x128xf32> to vector<2x32xf32>
    %661 = vector.extract_strided_slice %658 {offsets = [0, 32], sizes = [2, 32], strides = [1, 1]} : vector<2x128xf32> to vector<2x32xf32>
    %662 = vector.extract_strided_slice %659 {offsets = [0, 64], sizes = [2, 32], strides = [1, 1]} : vector<2x128xf32> to vector<2x32xf32>
    %663 = vector.extract_strided_slice %658 {offsets = [0, 96], sizes = [2, 32], strides = [1, 1]} : vector<2x128xf32> to vector<2x32xf32>
    %664 = arith.mulf %661, %645 : vector<2x32xf32>
    %665 = arith.mulf %660, %662 : vector<2x32xf32>
    %666 = arith.addf %664, %665 : vector<2x32xf32>
    %667 = math.tanh %666 : vector<2x32xf32>
    %668 = arith.mulf %663, %667 : vector<2x32xf32>
    %c0_170 = arith.constant 0 : index
    %c0_171 = arith.constant 0 : index
    %669 = vector.load %arg11[%c0_170, %c0_171] : memref<2x64xf32, #tpu.memory_space<vmem>>, vector<2x32xf32>
    tpu.vector_store %arg11[%c0_170, %c0_171], %391 {strides = array<i32>} : memref<2x64xf32, #tpu.memory_space<vmem>>, vector<2x32xf32>,
    %c0_172 = arith.constant 0 : index
    %c32_173 = arith.constant 32 : index
    %670 = vector.load %arg11[%c0_172, %c32_173] : memref<2x64xf32, #tpu.memory_space<vmem>>, vector<2x32xf32>
    tpu.vector_store %arg11[%c0_172, %c32_173], %668 {strides = array<i32>} : memref<2x64xf32, #tpu.memory_space<vmem>>, vector<2x32xf32>,
    %c0_174 = arith.constant 0 : index
    %c0_175 = arith.constant 0 : index
    %671 = vector.load %arg11[%c0_174, %c0_175] : memref<2x64xf32, #tpu.memory_space<vmem>>, vector<2x64xf32>
    %cst_176 = arith.constant dense<0.000000e+00> : vector<2x128xf32>
    %672 = tpu.matmul %671, %623, %cst_176 {dimension_numbers = #tpu.dot_dimension_numbers<[1], [0], [0], [1], [0, 0, 1, 1], [], []>} : vector<2x64xf32>, vector<64x128xf32>, vector<2x128xf32> -> vector<2x128xf32>
    %673 = vector.broadcast %624 : vector<1x128xf32> to vector<2x128xf32>
    %674 = arith.addf %672, %673 : vector<2x128xf32>
    %675 = arith.negf %674 : vector<2x128xf32>
    %676 = math.exp %675 : vector<2x128xf32>
    %cst_177 = arith.constant 1.000000e+00 : f32
    %677 = vector.broadcast %cst_177 : f32 to vector<2x128xf32>
    %678 = arith.addf %677, %676 : vector<2x128xf32>
    %679 = arith.divf %677, %678 : vector<2x128xf32>
    %680 = math.tanh %674 : vector<2x128xf32>
    %681 = vector.extract_strided_slice %679 {offsets = [0, 0], sizes = [2, 32], strides = [1, 1]} : vector<2x128xf32> to vector<2x32xf32>
    %682 = vector.extract_strided_slice %679 {offsets = [0, 32], sizes = [2, 32], strides = [1, 1]} : vector<2x128xf32> to vector<2x32xf32>
    %683 = vector.extract_strided_slice %680 {offsets = [0, 64], sizes = [2, 32], strides = [1, 1]} : vector<2x128xf32> to vector<2x32xf32>
    %684 = vector.extract_strided_slice %679 {offsets = [0, 96], sizes = [2, 32], strides = [1, 1]} : vector<2x128xf32> to vector<2x32xf32>
    %685 = arith.mulf %682, %666 : vector<2x32xf32>
    %686 = arith.mulf %681, %683 : vector<2x32xf32>
    %687 = arith.addf %685, %686 : vector<2x32xf32>
    %688 = math.tanh %687 : vector<2x32xf32>
    %689 = arith.mulf %684, %688 : vector<2x32xf32>
    %c0_178 = arith.constant 0 : index
    %c0_179 = arith.constant 0 : index
    %690 = vector.load %arg11[%c0_178, %c0_179] : memref<2x64xf32, #tpu.memory_space<vmem>>, vector<2x32xf32>
    tpu.vector_store %arg11[%c0_178, %c0_179], %412 {strides = array<i32>} : memref<2x64xf32, #tpu.memory_space<vmem>>, vector<2x32xf32>,
    %c0_180 = arith.constant 0 : index
    %c32_181 = arith.constant 32 : index
    %691 = vector.load %arg11[%c0_180, %c32_181] : memref<2x64xf32, #tpu.memory_space<vmem>>, vector<2x32xf32>
    tpu.vector_store %arg11[%c0_180, %c32_181], %689 {strides = array<i32>} : memref<2x64xf32, #tpu.memory_space<vmem>>, vector<2x32xf32>,
    %c0_182 = arith.constant 0 : index
    %c0_183 = arith.constant 0 : index
    %692 = vector.load %arg11[%c0_182, %c0_183] : memref<2x64xf32, #tpu.memory_space<vmem>>, vector<2x64xf32>
    %cst_184 = arith.constant dense<0.000000e+00> : vector<2x128xf32>
    %693 = tpu.matmul %692, %623, %cst_184 {dimension_numbers = #tpu.dot_dimension_numbers<[1], [0], [0], [1], [0, 0, 1, 1], [], []>} : vector<2x64xf32>, vector<64x128xf32>, vector<2x128xf32> -> vector<2x128xf32>
    %694 = vector.broadcast %624 : vector<1x128xf32> to vector<2x128xf32>
    %695 = arith.addf %693, %694 : vector<2x128xf32>
    %696 = arith.negf %695 : vector<2x128xf32>
    %697 = math.exp %696 : vector<2x128xf32>
    %cst_185 = arith.constant 1.000000e+00 : f32
    %698 = vector.broadcast %cst_185 : f32 to vector<2x128xf32>
    %699 = arith.addf %698, %697 : vector<2x128xf32>
    %700 = arith.divf %698, %699 : vector<2x128xf32>
    %701 = math.tanh %695 : vector<2x128xf32>
    %702 = vector.extract_strided_slice %700 {offsets = [0, 0], sizes = [2, 32], strides = [1, 1]} : vector<2x128xf32> to vector<2x32xf32>
    %703 = vector.extract_strided_slice %700 {offsets = [0, 32], sizes = [2, 32], strides = [1, 1]} : vector<2x128xf32> to vector<2x32xf32>
    %704 = vector.extract_strided_slice %701 {offsets = [0, 64], sizes = [2, 32], strides = [1, 1]} : vector<2x128xf32> to vector<2x32xf32>
    %705 = vector.extract_strided_slice %700 {offsets = [0, 96], sizes = [2, 32], strides = [1, 1]} : vector<2x128xf32> to vector<2x32xf32>
    %706 = arith.mulf %703, %687 : vector<2x32xf32>
    %707 = arith.mulf %702, %704 : vector<2x32xf32>
    %708 = arith.addf %706, %707 : vector<2x32xf32>
    %709 = math.tanh %708 : vector<2x32xf32>
    %710 = arith.mulf %705, %709 : vector<2x32xf32>
    %c0_186 = arith.constant 0 : index
    %c0_187 = arith.constant 0 : index
    %711 = vector.load %arg11[%c0_186, %c0_187] : memref<2x64xf32, #tpu.memory_space<vmem>>, vector<2x32xf32>
    tpu.vector_store %arg11[%c0_186, %c0_187], %433 {strides = array<i32>} : memref<2x64xf32, #tpu.memory_space<vmem>>, vector<2x32xf32>,
    %c0_188 = arith.constant 0 : index
    %c32_189 = arith.constant 32 : index
    %712 = vector.load %arg11[%c0_188, %c32_189] : memref<2x64xf32, #tpu.memory_space<vmem>>, vector<2x32xf32>
    tpu.vector_store %arg11[%c0_188, %c32_189], %710 {strides = array<i32>} : memref<2x64xf32, #tpu.memory_space<vmem>>, vector<2x32xf32>,
    %c0_190 = arith.constant 0 : index
    %c0_191 = arith.constant 0 : index
    %713 = vector.load %arg11[%c0_190, %c0_191] : memref<2x64xf32, #tpu.memory_space<vmem>>, vector<2x64xf32>
    %cst_192 = arith.constant dense<0.000000e+00> : vector<2x128xf32>
    %714 = tpu.matmul %713, %623, %cst_192 {dimension_numbers = #tpu.dot_dimension_numbers<[1], [0], [0], [1], [0, 0, 1, 1], [], []>} : vector<2x64xf32>, vector<64x128xf32>, vector<2x128xf32> -> vector<2x128xf32>
    %715 = vector.broadcast %624 : vector<1x128xf32> to vector<2x128xf32>
    %716 = arith.addf %714, %715 : vector<2x128xf32>
    %717 = arith.negf %716 : vector<2x128xf32>
    %718 = math.exp %717 : vector<2x128xf32>
    %cst_193 = arith.constant 1.000000e+00 : f32
    %719 = vector.broadcast %cst_193 : f32 to vector<2x128xf32>
    %720 = arith.addf %719, %718 : vector<2x128xf32>
    %721 = arith.divf %719, %720 : vector<2x128xf32>
    %722 = math.tanh %716 : vector<2x128xf32>
    %723 = vector.extract_strided_slice %721 {offsets = [0, 0], sizes = [2, 32], strides = [1, 1]} : vector<2x128xf32> to vector<2x32xf32>
    %724 = vector.extract_strided_slice %721 {offsets = [0, 32], sizes = [2, 32], strides = [1, 1]} : vector<2x128xf32> to vector<2x32xf32>
    %725 = vector.extract_strided_slice %722 {offsets = [0, 64], sizes = [2, 32], strides = [1, 1]} : vector<2x128xf32> to vector<2x32xf32>
    %726 = vector.extract_strided_slice %721 {offsets = [0, 96], sizes = [2, 32], strides = [1, 1]} : vector<2x128xf32> to vector<2x32xf32>
    %727 = arith.mulf %724, %708 : vector<2x32xf32>
    %728 = arith.mulf %723, %725 : vector<2x32xf32>
    %729 = arith.addf %727, %728 : vector<2x32xf32>
    %730 = math.tanh %729 : vector<2x32xf32>
    %731 = arith.mulf %726, %730 : vector<2x32xf32>
    %c0_194 = arith.constant 0 : index
    %c0_195 = arith.constant 0 : index
    %732 = vector.load %arg11[%c0_194, %c0_195] : memref<2x64xf32, #tpu.memory_space<vmem>>, vector<2x32xf32>
    tpu.vector_store %arg11[%c0_194, %c0_195], %454 {strides = array<i32>} : memref<2x64xf32, #tpu.memory_space<vmem>>, vector<2x32xf32>,
    %c0_196 = arith.constant 0 : index
    %c32_197 = arith.constant 32 : index
    %733 = vector.load %arg11[%c0_196, %c32_197] : memref<2x64xf32, #tpu.memory_space<vmem>>, vector<2x32xf32>
    tpu.vector_store %arg11[%c0_196, %c32_197], %731 {strides = array<i32>} : memref<2x64xf32, #tpu.memory_space<vmem>>, vector<2x32xf32>,
    %c0_198 = arith.constant 0 : index
    %c0_199 = arith.constant 0 : index
    %734 = vector.load %arg11[%c0_198, %c0_199] : memref<2x64xf32, #tpu.memory_space<vmem>>, vector<2x64xf32>
    %cst_200 = arith.constant dense<0.000000e+00> : vector<2x128xf32>
    %735 = tpu.matmul %734, %623, %cst_200 {dimension_numbers = #tpu.dot_dimension_numbers<[1], [0], [0], [1], [0, 0, 1, 1], [], []>} : vector<2x64xf32>, vector<64x128xf32>, vector<2x128xf32> -> vector<2x128xf32>
    %736 = vector.broadcast %624 : vector<1x128xf32> to vector<2x128xf32>
    %737 = arith.addf %735, %736 : vector<2x128xf32>
    %738 = arith.negf %737 : vector<2x128xf32>
    %739 = math.exp %738 : vector<2x128xf32>
    %cst_201 = arith.constant 1.000000e+00 : f32
    %740 = vector.broadcast %cst_201 : f32 to vector<2x128xf32>
    %741 = arith.addf %740, %739 : vector<2x128xf32>
    %742 = arith.divf %740, %741 : vector<2x128xf32>
    %743 = math.tanh %737 : vector<2x128xf32>
    %744 = vector.extract_strided_slice %742 {offsets = [0, 0], sizes = [2, 32], strides = [1, 1]} : vector<2x128xf32> to vector<2x32xf32>
    %745 = vector.extract_strided_slice %742 {offsets = [0, 32], sizes = [2, 32], strides = [1, 1]} : vector<2x128xf32> to vector<2x32xf32>
    %746 = vector.extract_strided_slice %743 {offsets = [0, 64], sizes = [2, 32], strides = [1, 1]} : vector<2x128xf32> to vector<2x32xf32>
    %747 = vector.extract_strided_slice %742 {offsets = [0, 96], sizes = [2, 32], strides = [1, 1]} : vector<2x128xf32> to vector<2x32xf32>
    %748 = arith.mulf %745, %729 : vector<2x32xf32>
    %749 = arith.mulf %744, %746 : vector<2x32xf32>
    %750 = arith.addf %748, %749 : vector<2x32xf32>
    %751 = math.tanh %750 : vector<2x32xf32>
    %752 = arith.mulf %747, %751 : vector<2x32xf32>
    %c0_202 = arith.constant 0 : index
    %c0_203 = arith.constant 0 : index
    %753 = vector.load %arg11[%c0_202, %c0_203] : memref<2x64xf32, #tpu.memory_space<vmem>>, vector<2x32xf32>
    tpu.vector_store %arg11[%c0_202, %c0_203], %475 {strides = array<i32>} : memref<2x64xf32, #tpu.memory_space<vmem>>, vector<2x32xf32>,
    %c0_204 = arith.constant 0 : index
    %c32_205 = arith.constant 32 : index
    %754 = vector.load %arg11[%c0_204, %c32_205] : memref<2x64xf32, #tpu.memory_space<vmem>>, vector<2x32xf32>
    tpu.vector_store %arg11[%c0_204, %c32_205], %752 {strides = array<i32>} : memref<2x64xf32, #tpu.memory_space<vmem>>, vector<2x32xf32>,
    %c0_206 = arith.constant 0 : index
    %c0_207 = arith.constant 0 : index
    %755 = vector.load %arg11[%c0_206, %c0_207] : memref<2x64xf32, #tpu.memory_space<vmem>>, vector<2x64xf32>
    %cst_208 = arith.constant dense<0.000000e+00> : vector<2x128xf32>
    %756 = tpu.matmul %755, %623, %cst_208 {dimension_numbers = #tpu.dot_dimension_numbers<[1], [0], [0], [1], [0, 0, 1, 1], [], []>} : vector<2x64xf32>, vector<64x128xf32>, vector<2x128xf32> -> vector<2x128xf32>
    %757 = vector.broadcast %624 : vector<1x128xf32> to vector<2x128xf32>
    %758 = arith.addf %756, %757 : vector<2x128xf32>
    %759 = arith.negf %758 : vector<2x128xf32>
    %760 = math.exp %759 : vector<2x128xf32>
    %cst_209 = arith.constant 1.000000e+00 : f32
    %761 = vector.broadcast %cst_209 : f32 to vector<2x128xf32>
    %762 = arith.addf %761, %760 : vector<2x128xf32>
    %763 = arith.divf %761, %762 : vector<2x128xf32>
    %764 = math.tanh %758 : vector<2x128xf32>
    %765 = vector.extract_strided_slice %763 {offsets = [0, 0], sizes = [2, 32], strides = [1, 1]} : vector<2x128xf32> to vector<2x32xf32>
    %766 = vector.extract_strided_slice %763 {offsets = [0, 32], sizes = [2, 32], strides = [1, 1]} : vector<2x128xf32> to vector<2x32xf32>
    %767 = vector.extract_strided_slice %764 {offsets = [0, 64], sizes = [2, 32], strides = [1, 1]} : vector<2x128xf32> to vector<2x32xf32>
    %768 = vector.extract_strided_slice %763 {offsets = [0, 96], sizes = [2, 32], strides = [1, 1]} : vector<2x128xf32> to vector<2x32xf32>
    %769 = arith.mulf %766, %750 : vector<2x32xf32>
    %770 = arith.mulf %765, %767 : vector<2x32xf32>
    %771 = arith.addf %769, %770 : vector<2x32xf32>
    %772 = math.tanh %771 : vector<2x32xf32>
    %773 = arith.mulf %768, %772 : vector<2x32xf32>
    %c0_210 = arith.constant 0 : index
    %c0_211 = arith.constant 0 : index
    %774 = vector.load %arg11[%c0_210, %c0_211] : memref<2x64xf32, #tpu.memory_space<vmem>>, vector<2x32xf32>
    tpu.vector_store %arg11[%c0_210, %c0_211], %496 {strides = array<i32>} : memref<2x64xf32, #tpu.memory_space<vmem>>, vector<2x32xf32>,
    %c0_212 = arith.constant 0 : index
    %c32_213 = arith.constant 32 : index
    %775 = vector.load %arg11[%c0_212, %c32_213] : memref<2x64xf32, #tpu.memory_space<vmem>>, vector<2x32xf32>
    tpu.vector_store %arg11[%c0_212, %c32_213], %773 {strides = array<i32>} : memref<2x64xf32, #tpu.memory_space<vmem>>, vector<2x32xf32>,
    %c0_214 = arith.constant 0 : index
    %c0_215 = arith.constant 0 : index
    %776 = vector.load %arg11[%c0_214, %c0_215] : memref<2x64xf32, #tpu.memory_space<vmem>>, vector<2x64xf32>
    %cst_216 = arith.constant dense<0.000000e+00> : vector<2x128xf32>
    %777 = tpu.matmul %776, %623, %cst_216 {dimension_numbers = #tpu.dot_dimension_numbers<[1], [0], [0], [1], [0, 0, 1, 1], [], []>} : vector<2x64xf32>, vector<64x128xf32>, vector<2x128xf32> -> vector<2x128xf32>
    %778 = vector.broadcast %624 : vector<1x128xf32> to vector<2x128xf32>
    %779 = arith.addf %777, %778 : vector<2x128xf32>
    %780 = arith.negf %779 : vector<2x128xf32>
    %781 = math.exp %780 : vector<2x128xf32>
    %cst_217 = arith.constant 1.000000e+00 : f32
    %782 = vector.broadcast %cst_217 : f32 to vector<2x128xf32>
    %783 = arith.addf %782, %781 : vector<2x128xf32>
    %784 = arith.divf %782, %783 : vector<2x128xf32>
    %785 = math.tanh %779 : vector<2x128xf32>
    %786 = vector.extract_strided_slice %784 {offsets = [0, 0], sizes = [2, 32], strides = [1, 1]} : vector<2x128xf32> to vector<2x32xf32>
    %787 = vector.extract_strided_slice %784 {offsets = [0, 32], sizes = [2, 32], strides = [1, 1]} : vector<2x128xf32> to vector<2x32xf32>
    %788 = vector.extract_strided_slice %785 {offsets = [0, 64], sizes = [2, 32], strides = [1, 1]} : vector<2x128xf32> to vector<2x32xf32>
    %789 = vector.extract_strided_slice %784 {offsets = [0, 96], sizes = [2, 32], strides = [1, 1]} : vector<2x128xf32> to vector<2x32xf32>
    %790 = arith.mulf %787, %771 : vector<2x32xf32>
    %791 = arith.mulf %786, %788 : vector<2x32xf32>
    %792 = arith.addf %790, %791 : vector<2x32xf32>
    %793 = math.tanh %792 : vector<2x32xf32>
    %794 = arith.mulf %789, %793 : vector<2x32xf32>
    %c0_218 = arith.constant 0 : index
    %c0_219 = arith.constant 0 : index
    %795 = vector.load %arg11[%c0_218, %c0_219] : memref<2x64xf32, #tpu.memory_space<vmem>>, vector<2x32xf32>
    tpu.vector_store %arg11[%c0_218, %c0_219], %517 {strides = array<i32>} : memref<2x64xf32, #tpu.memory_space<vmem>>, vector<2x32xf32>,
    %c0_220 = arith.constant 0 : index
    %c32_221 = arith.constant 32 : index
    %796 = vector.load %arg11[%c0_220, %c32_221] : memref<2x64xf32, #tpu.memory_space<vmem>>, vector<2x32xf32>
    tpu.vector_store %arg11[%c0_220, %c32_221], %794 {strides = array<i32>} : memref<2x64xf32, #tpu.memory_space<vmem>>, vector<2x32xf32>,
    %c0_222 = arith.constant 0 : index
    %c0_223 = arith.constant 0 : index
    %797 = vector.load %arg11[%c0_222, %c0_223] : memref<2x64xf32, #tpu.memory_space<vmem>>, vector<2x64xf32>
    %cst_224 = arith.constant dense<0.000000e+00> : vector<2x128xf32>
    %798 = tpu.matmul %797, %623, %cst_224 {dimension_numbers = #tpu.dot_dimension_numbers<[1], [0], [0], [1], [0, 0, 1, 1], [], []>} : vector<2x64xf32>, vector<64x128xf32>, vector<2x128xf32> -> vector<2x128xf32>
    %799 = vector.broadcast %624 : vector<1x128xf32> to vector<2x128xf32>
    %800 = arith.addf %798, %799 : vector<2x128xf32>
    %801 = arith.negf %800 : vector<2x128xf32>
    %802 = math.exp %801 : vector<2x128xf32>
    %cst_225 = arith.constant 1.000000e+00 : f32
    %803 = vector.broadcast %cst_225 : f32 to vector<2x128xf32>
    %804 = arith.addf %803, %802 : vector<2x128xf32>
    %805 = arith.divf %803, %804 : vector<2x128xf32>
    %806 = math.tanh %800 : vector<2x128xf32>
    %807 = vector.extract_strided_slice %805 {offsets = [0, 0], sizes = [2, 32], strides = [1, 1]} : vector<2x128xf32> to vector<2x32xf32>
    %808 = vector.extract_strided_slice %805 {offsets = [0, 32], sizes = [2, 32], strides = [1, 1]} : vector<2x128xf32> to vector<2x32xf32>
    %809 = vector.extract_strided_slice %806 {offsets = [0, 64], sizes = [2, 32], strides = [1, 1]} : vector<2x128xf32> to vector<2x32xf32>
    %810 = vector.extract_strided_slice %805 {offsets = [0, 96], sizes = [2, 32], strides = [1, 1]} : vector<2x128xf32> to vector<2x32xf32>
    %811 = arith.mulf %808, %792 : vector<2x32xf32>
    %812 = arith.mulf %807, %809 : vector<2x32xf32>
    %813 = arith.addf %811, %812 : vector<2x32xf32>
    %814 = math.tanh %813 : vector<2x32xf32>
    %815 = arith.mulf %810, %814 : vector<2x32xf32>
    %c0_226 = arith.constant 0 : index
    %c0_227 = arith.constant 0 : index
    %816 = vector.load %arg11[%c0_226, %c0_227] : memref<2x64xf32, #tpu.memory_space<vmem>>, vector<2x32xf32>
    tpu.vector_store %arg11[%c0_226, %c0_227], %538 {strides = array<i32>} : memref<2x64xf32, #tpu.memory_space<vmem>>, vector<2x32xf32>,
    %c0_228 = arith.constant 0 : index
    %c32_229 = arith.constant 32 : index
    %817 = vector.load %arg11[%c0_228, %c32_229] : memref<2x64xf32, #tpu.memory_space<vmem>>, vector<2x32xf32>
    tpu.vector_store %arg11[%c0_228, %c32_229], %815 {strides = array<i32>} : memref<2x64xf32, #tpu.memory_space<vmem>>, vector<2x32xf32>,
    %c0_230 = arith.constant 0 : index
    %c0_231 = arith.constant 0 : index
    %818 = vector.load %arg11[%c0_230, %c0_231] : memref<2x64xf32, #tpu.memory_space<vmem>>, vector<2x64xf32>
    %cst_232 = arith.constant dense<0.000000e+00> : vector<2x128xf32>
    %819 = tpu.matmul %818, %623, %cst_232 {dimension_numbers = #tpu.dot_dimension_numbers<[1], [0], [0], [1], [0, 0, 1, 1], [], []>} : vector<2x64xf32>, vector<64x128xf32>, vector<2x128xf32> -> vector<2x128xf32>
    %820 = vector.broadcast %624 : vector<1x128xf32> to vector<2x128xf32>
    %821 = arith.addf %819, %820 : vector<2x128xf32>
    %822 = arith.negf %821 : vector<2x128xf32>
    %823 = math.exp %822 : vector<2x128xf32>
    %cst_233 = arith.constant 1.000000e+00 : f32
    %824 = vector.broadcast %cst_233 : f32 to vector<2x128xf32>
    %825 = arith.addf %824, %823 : vector<2x128xf32>
    %826 = arith.divf %824, %825 : vector<2x128xf32>
    %827 = math.tanh %821 : vector<2x128xf32>
    %828 = vector.extract_strided_slice %826 {offsets = [0, 0], sizes = [2, 32], strides = [1, 1]} : vector<2x128xf32> to vector<2x32xf32>
    %829 = vector.extract_strided_slice %826 {offsets = [0, 32], sizes = [2, 32], strides = [1, 1]} : vector<2x128xf32> to vector<2x32xf32>
    %830 = vector.extract_strided_slice %827 {offsets = [0, 64], sizes = [2, 32], strides = [1, 1]} : vector<2x128xf32> to vector<2x32xf32>
    %831 = vector.extract_strided_slice %826 {offsets = [0, 96], sizes = [2, 32], strides = [1, 1]} : vector<2x128xf32> to vector<2x32xf32>
    %832 = arith.mulf %829, %813 : vector<2x32xf32>
    %833 = arith.mulf %828, %830 : vector<2x32xf32>
    %834 = arith.addf %832, %833 : vector<2x32xf32>
    %835 = math.tanh %834 : vector<2x32xf32>
    %836 = arith.mulf %831, %835 : vector<2x32xf32>
    %c0_234 = arith.constant 0 : index
    %c0_235 = arith.constant 0 : index
    %837 = vector.load %arg11[%c0_234, %c0_235] : memref<2x64xf32, #tpu.memory_space<vmem>>, vector<2x32xf32>
    tpu.vector_store %arg11[%c0_234, %c0_235], %559 {strides = array<i32>} : memref<2x64xf32, #tpu.memory_space<vmem>>, vector<2x32xf32>,
    %c0_236 = arith.constant 0 : index
    %c32_237 = arith.constant 32 : index
    %838 = vector.load %arg11[%c0_236, %c32_237] : memref<2x64xf32, #tpu.memory_space<vmem>>, vector<2x32xf32>
    tpu.vector_store %arg11[%c0_236, %c32_237], %836 {strides = array<i32>} : memref<2x64xf32, #tpu.memory_space<vmem>>, vector<2x32xf32>,
    %c0_238 = arith.constant 0 : index
    %c0_239 = arith.constant 0 : index
    %839 = vector.load %arg11[%c0_238, %c0_239] : memref<2x64xf32, #tpu.memory_space<vmem>>, vector<2x64xf32>
    %cst_240 = arith.constant dense<0.000000e+00> : vector<2x128xf32>
    %840 = tpu.matmul %839, %623, %cst_240 {dimension_numbers = #tpu.dot_dimension_numbers<[1], [0], [0], [1], [0, 0, 1, 1], [], []>} : vector<2x64xf32>, vector<64x128xf32>, vector<2x128xf32> -> vector<2x128xf32>
    %841 = vector.broadcast %624 : vector<1x128xf32> to vector<2x128xf32>
    %842 = arith.addf %840, %841 : vector<2x128xf32>
    %843 = arith.negf %842 : vector<2x128xf32>
    %844 = math.exp %843 : vector<2x128xf32>
    %cst_241 = arith.constant 1.000000e+00 : f32
    %845 = vector.broadcast %cst_241 : f32 to vector<2x128xf32>
    %846 = arith.addf %845, %844 : vector<2x128xf32>
    %847 = arith.divf %845, %846 : vector<2x128xf32>
    %848 = math.tanh %842 : vector<2x128xf32>
    %849 = vector.extract_strided_slice %847 {offsets = [0, 0], sizes = [2, 32], strides = [1, 1]} : vector<2x128xf32> to vector<2x32xf32>
    %850 = vector.extract_strided_slice %847 {offsets = [0, 32], sizes = [2, 32], strides = [1, 1]} : vector<2x128xf32> to vector<2x32xf32>
    %851 = vector.extract_strided_slice %848 {offsets = [0, 64], sizes = [2, 32], strides = [1, 1]} : vector<2x128xf32> to vector<2x32xf32>
    %852 = vector.extract_strided_slice %847 {offsets = [0, 96], sizes = [2, 32], strides = [1, 1]} : vector<2x128xf32> to vector<2x32xf32>
    %853 = arith.mulf %850, %834 : vector<2x32xf32>
    %854 = arith.mulf %849, %851 : vector<2x32xf32>
    %855 = arith.addf %853, %854 : vector<2x32xf32>
    %856 = math.tanh %855 : vector<2x32xf32>
    %857 = arith.mulf %852, %856 : vector<2x32xf32>
    %c0_242 = arith.constant 0 : index
    %c0_243 = arith.constant 0 : index
    %858 = vector.load %arg11[%c0_242, %c0_243] : memref<2x64xf32, #tpu.memory_space<vmem>>, vector<2x32xf32>
    tpu.vector_store %arg11[%c0_242, %c0_243], %580 {strides = array<i32>} : memref<2x64xf32, #tpu.memory_space<vmem>>, vector<2x32xf32>,
    %c0_244 = arith.constant 0 : index
    %c32_245 = arith.constant 32 : index
    %859 = vector.load %arg11[%c0_244, %c32_245] : memref<2x64xf32, #tpu.memory_space<vmem>>, vector<2x32xf32>
    tpu.vector_store %arg11[%c0_244, %c32_245], %857 {strides = array<i32>} : memref<2x64xf32, #tpu.memory_space<vmem>>, vector<2x32xf32>,
    %c0_246 = arith.constant 0 : index
    %c0_247 = arith.constant 0 : index
    %860 = vector.load %arg11[%c0_246, %c0_247] : memref<2x64xf32, #tpu.memory_space<vmem>>, vector<2x64xf32>
    %cst_248 = arith.constant dense<0.000000e+00> : vector<2x128xf32>
    %861 = tpu.matmul %860, %623, %cst_248 {dimension_numbers = #tpu.dot_dimension_numbers<[1], [0], [0], [1], [0, 0, 1, 1], [], []>} : vector<2x64xf32>, vector<64x128xf32>, vector<2x128xf32> -> vector<2x128xf32>
    %862 = vector.broadcast %624 : vector<1x128xf32> to vector<2x128xf32>
    %863 = arith.addf %861, %862 : vector<2x128xf32>
    %864 = arith.negf %863 : vector<2x128xf32>
    %865 = math.exp %864 : vector<2x128xf32>
    %cst_249 = arith.constant 1.000000e+00 : f32
    %866 = vector.broadcast %cst_249 : f32 to vector<2x128xf32>
    %867 = arith.addf %866, %865 : vector<2x128xf32>
    %868 = arith.divf %866, %867 : vector<2x128xf32>
    %869 = math.tanh %863 : vector<2x128xf32>
    %870 = vector.extract_strided_slice %868 {offsets = [0, 0], sizes = [2, 32], strides = [1, 1]} : vector<2x128xf32> to vector<2x32xf32>
    %871 = vector.extract_strided_slice %868 {offsets = [0, 32], sizes = [2, 32], strides = [1, 1]} : vector<2x128xf32> to vector<2x32xf32>
    %872 = vector.extract_strided_slice %869 {offsets = [0, 64], sizes = [2, 32], strides = [1, 1]} : vector<2x128xf32> to vector<2x32xf32>
    %873 = vector.extract_strided_slice %868 {offsets = [0, 96], sizes = [2, 32], strides = [1, 1]} : vector<2x128xf32> to vector<2x32xf32>
    %874 = arith.mulf %871, %855 : vector<2x32xf32>
    %875 = arith.mulf %870, %872 : vector<2x32xf32>
    %876 = arith.addf %874, %875 : vector<2x32xf32>
    %877 = math.tanh %876 : vector<2x32xf32>
    %878 = arith.mulf %873, %877 : vector<2x32xf32>
    %c0_250 = arith.constant 0 : index
    %c0_251 = arith.constant 0 : index
    %879 = vector.load %arg11[%c0_250, %c0_251] : memref<2x64xf32, #tpu.memory_space<vmem>>, vector<2x32xf32>
    tpu.vector_store %arg11[%c0_250, %c0_251], %601 {strides = array<i32>} : memref<2x64xf32, #tpu.memory_space<vmem>>, vector<2x32xf32>,
    %c0_252 = arith.constant 0 : index
    %c32_253 = arith.constant 32 : index
    %880 = vector.load %arg11[%c0_252, %c32_253] : memref<2x64xf32, #tpu.memory_space<vmem>>, vector<2x32xf32>
    tpu.vector_store %arg11[%c0_252, %c32_253], %878 {strides = array<i32>} : memref<2x64xf32, #tpu.memory_space<vmem>>, vector<2x32xf32>,
    %c0_254 = arith.constant 0 : index
    %c0_255 = arith.constant 0 : index
    %881 = vector.load %arg11[%c0_254, %c0_255] : memref<2x64xf32, #tpu.memory_space<vmem>>, vector<2x64xf32>
    %cst_256 = arith.constant dense<0.000000e+00> : vector<2x128xf32>
    %882 = tpu.matmul %881, %623, %cst_256 {dimension_numbers = #tpu.dot_dimension_numbers<[1], [0], [0], [1], [0, 0, 1, 1], [], []>} : vector<2x64xf32>, vector<64x128xf32>, vector<2x128xf32> -> vector<2x128xf32>
    %883 = vector.broadcast %624 : vector<1x128xf32> to vector<2x128xf32>
    %884 = arith.addf %882, %883 : vector<2x128xf32>
    %885 = arith.negf %884 : vector<2x128xf32>
    %886 = math.exp %885 : vector<2x128xf32>
    %cst_257 = arith.constant 1.000000e+00 : f32
    %887 = vector.broadcast %cst_257 : f32 to vector<2x128xf32>
    %888 = arith.addf %887, %886 : vector<2x128xf32>
    %889 = arith.divf %887, %888 : vector<2x128xf32>
    %890 = math.tanh %884 : vector<2x128xf32>
    %891 = vector.extract_strided_slice %889 {offsets = [0, 0], sizes = [2, 32], strides = [1, 1]} : vector<2x128xf32> to vector<2x32xf32>
    %892 = vector.extract_strided_slice %889 {offsets = [0, 32], sizes = [2, 32], strides = [1, 1]} : vector<2x128xf32> to vector<2x32xf32>
    %893 = vector.extract_strided_slice %890 {offsets = [0, 64], sizes = [2, 32], strides = [1, 1]} : vector<2x128xf32> to vector<2x32xf32>
    %894 = vector.extract_strided_slice %889 {offsets = [0, 96], sizes = [2, 32], strides = [1, 1]} : vector<2x128xf32> to vector<2x32xf32>
    %895 = arith.mulf %892, %876 : vector<2x32xf32>
    %896 = arith.mulf %891, %893 : vector<2x32xf32>
    %897 = arith.addf %895, %896 : vector<2x32xf32>
    %898 = math.tanh %897 : vector<2x32xf32>
    %899 = arith.mulf %894, %898 : vector<2x32xf32>
    %c0_258 = arith.constant 0 : index
    %c0_259 = arith.constant 0 : index
    %900 = vector.load %arg11[%c0_258, %c0_259] : memref<2x64xf32, #tpu.memory_space<vmem>>, vector<2x32xf32>
    tpu.vector_store %arg11[%c0_258, %c0_259], %622 {strides = array<i32>} : memref<2x64xf32, #tpu.memory_space<vmem>>, vector<2x32xf32>,
    %c0_260 = arith.constant 0 : index
    %c32_261 = arith.constant 32 : index
    %901 = vector.load %arg11[%c0_260, %c32_261] : memref<2x64xf32, #tpu.memory_space<vmem>>, vector<2x32xf32>
    tpu.vector_store %arg11[%c0_260, %c32_261], %899 {strides = array<i32>} : memref<2x64xf32, #tpu.memory_space<vmem>>, vector<2x32xf32>,
    %c0_262 = arith.constant 0 : index
    %c0_263 = arith.constant 0 : index
    %902 = vector.load %arg11[%c0_262, %c0_263] : memref<2x64xf32, #tpu.memory_space<vmem>>, vector<2x64xf32>
    %cst_264 = arith.constant dense<0.000000e+00> : vector<2x128xf32>
    %903 = tpu.matmul %902, %623, %cst_264 {dimension_numbers = #tpu.dot_dimension_numbers<[1], [0], [0], [1], [0, 0, 1, 1], [], []>} : vector<2x64xf32>, vector<64x128xf32>, vector<2x128xf32> -> vector<2x128xf32>
    %904 = vector.broadcast %624 : vector<1x128xf32> to vector<2x128xf32>
    %905 = arith.addf %903, %904 : vector<2x128xf32>
    %906 = arith.negf %905 : vector<2x128xf32>
    %907 = math.exp %906 : vector<2x128xf32>
    %cst_265 = arith.constant 1.000000e+00 : f32
    %908 = vector.broadcast %cst_265 : f32 to vector<2x128xf32>
    %909 = arith.addf %908, %907 : vector<2x128xf32>
    %910 = arith.divf %908, %909 : vector<2x128xf32>
    %911 = math.tanh %905 : vector<2x128xf32>
    %912 = vector.extract_strided_slice %910 {offsets = [0, 0], sizes = [2, 32], strides = [1, 1]} : vector<2x128xf32> to vector<2x32xf32>
    %913 = vector.extract_strided_slice %910 {offsets = [0, 32], sizes = [2, 32], strides = [1, 1]} : vector<2x128xf32> to vector<2x32xf32>
    %914 = vector.extract_strided_slice %911 {offsets = [0, 64], sizes = [2, 32], strides = [1, 1]} : vector<2x128xf32> to vector<2x32xf32>
    %915 = vector.extract_strided_slice %910 {offsets = [0, 96], sizes = [2, 32], strides = [1, 1]} : vector<2x128xf32> to vector<2x32xf32>
    %916 = arith.mulf %913, %897 : vector<2x32xf32>
    %917 = arith.mulf %912, %914 : vector<2x32xf32>
    %918 = arith.addf %916, %917 : vector<2x32xf32>
    %919 = math.tanh %918 : vector<2x32xf32>
    %920 = arith.mulf %915, %919 : vector<2x32xf32>
    %c0_266 = arith.constant 0 : index
    %c0_267 = arith.constant 0 : index
    %921 = vector.load %arg7[%c0_266, %c0_267] : memref<32x2xf32, #tpu.memory_space<vmem>>, vector<32x2xf32>
    %cst_268 = arith.constant dense<0.000000e+00> : vector<2x2xf32>
    %922 = tpu.matmul %920, %921, %cst_268 {dimension_numbers = #tpu.dot_dimension_numbers<[1], [0], [0], [1], [0, 0, 1, 1], [], []>} : vector<2x32xf32>, vector<32x2xf32>, vector<2x2xf32> -> vector<2x2xf32>
    %c0_269 = arith.constant 0 : index
    %c0_270 = arith.constant 0 : index
    %923 = vector.load %arg8[%c0_269, %c0_270] : memref<1x2xf32, #tpu.memory_space<vmem>>, vector<1x2xf32>
    %924 = vector.broadcast %923 : vector<1x2xf32> to vector<2x2xf32>
    %925 = arith.addf %922, %924 : vector<2x2xf32>
    %c0_271 = arith.constant 0 : index
    %c0_272 = arith.constant 0 : index
    %926 = vector.load %arg9[%c0_271, %c0_272] : memref<2x2xf32, #tpu.memory_space<vmem>>, vector<2x2xf32>
    tpu.vector_store %arg9[%c0_271, %c0_272], %925 {strides = array<i32>} : memref<2x2xf32, #tpu.memory_space<vmem>>, vector<2x2xf32>,
    return
  }
}

</mosaic_0001>

<bundles_post_ra>
// kernel: cnn_lstm_forward.1
= control target key start
LH: loop header
LB: loop body
LE: loop exit
PB: predicated region body
PF: predicated region fallthrough
CT: control target
= control target key end

     0   :  { %v4600_v1 = vmov 0   ;;  %v4601_v2 = vmov 2   ;;  %s5499_s0 = inlined_call_operand.vmem [shape: f32[2,16], index: 0, kind: input, shape index: {}]   ;;  %s5500_s1 = inlined_call_operand.vmem [shape: f32[3,8], index: 1, kind: input, shape index: {}]   ;;  %s5501_s2 = inlined_call_operand.vmem [shape: f32[1,8], index: 2, kind: input, shape index: {}]   ;;  %s5502_s3 = inlined_call_operand.vmem [shape: f32[40,128], index: 3, kind: input, shape index: {}]   ;;  %s5503_s4 = inlined_call_operand.vmem [shape: f32[1,128], index: 4, kind: input, shape index: {}]   ;;  %s5504_s5 = inlined_call_operand.vmem [shape: f32[64,128], index: 5, kind: input, shape index: {}]   ;;  %s5505_s6 = inlined_call_operand.vmem [shape: f32[1,128], index: 6, kind: input, shape index: {}]   ;;  %s5506_s7 = inlined_call_operand.vmem [shape: f32[32,2], index: 7, kind: input, shape index: {}]   ;;  %s5507_s8 = inlined_call_operand.vmem [shape: f32[1,2], index: 8, kind: input, shape index: {}]   ;;  %s5508_s9 = inlined_call_operand.hbm [shape: f32[2,2], index: 9, kind: output, shape index: {}]  }
   0x1   :  { %v4676_v0 = vld [vmem:[%s5499_s0] sm:$0x3]  ;;  %4330 = vset.pattern.permute.xlu0 %v4600_v1  ;;  %4332 = vset.pattern.permute.xlu1 %v4601_v2 }
   0x2   :  { %14 = vsyncpa [#allocation5], 0  ;;  %38 = vperm.xlu0 %4330, %v4676_v0   ;;  %58 = vperm.xlu1 %4332, %v4676_v0   ;;  %v4602_v3 = vmov 1   ;;  %v231_v4 = vld [vmem:[%s5502_s3] sm:$0xff]  ;;  %v232_v5 = vld [vmem:[%s5502_s3 + $0x8] sm:$0xff]  ;;  %v4603_v7 = vmov 0.0|0.0   ;;  %v41_v13 = vlaneseq }
   0x3   :  { %v4687_v6 = vpack.c.bf16 %v232_v5, %v231_v4  ;;  %4049 = vmatprep.subr.bf16.mxu0 %v4603_v7  ;;  %4055 = vmatprep.subr.bf16.mxu1 %v4603_v7  ;;  %v233_v8 = vld [vmem:[%s5502_s3 + $0x10] sm:$0xff]  ;;  %v234_v9 = vld [vmem:[%s5502_s3 + $0x18] sm:$0xff]  ;;  %v4604_v11 = vmov 0.0   ;;  %v4710_v12 = vld [vmem:[%s5502_s3 + $0x20] sm:$0xff]  ;;  %vm4605_vm0 = vmmov 0   ;;  %vm237_vm1 = vcmask 58368  }
   0x4   :  { %v4701_v10 = vpack.c.bf16 %v234_v9, %v233_v8  ;;  %3600 = vmatprep.mubr.msk.f32.mxu0 %vm4605_vm0, %v4604_v11  ;;  %3613 = vmatprep.mubr.msk.f32.mxu1 %vm4605_vm0, %v4604_v11  ;;  %v42_v14 = vshrl.u32 %v41_v13, 7  ;;  %v34_v18 = vld [vmem:[%s5500_s1] sm:$0x7]  ;;  %vm239_vm2 = vcmask 320576   ;;  %vm248_vm3 = vcmask 326656   ;;  %s4607_s26 = smov 64  }
   0x5   :  { %4051 = vmatpush3.bf16.msra.mxu0 %v4687_v6  ;;  %4057 = vmatpush3.bf16.msra.mxu1 %v4687_v6  ;;  %v4738_v29 = vld [vmem:[%s5501_s2] ss:$0 sm:$0xff]  ;;  %v4606_v38 = vmov 3   ;;  %s4608_s27 = smov 32   ;;  %s4609_s28 = smov 40   ;;  %v4610_v2 = vmov 4  }
   0x6   :  { %4331 = vset.pattern.permute.xlu0 %v4602_v3  ;;  %4052 = vmatprep.subr.bf16.mxu0 %v4603_v7  ;;  %v43_v15 = vsub.s32 0, %v42_v14  ;;  %v53_v16 = vsub.s32 1, %v42_v14  ;;  %v63_v17 = vsub.s32 2, %v42_v14  ;;  %v4756_v34 = vld [vmem:[%s5503_s4] ss:$0 sm:$0xff]  ;;  %vm1710_vm4 = vcmask 254976  }
   0x7   :  { %48 = vperm.xlu0 %4331, %v4676_v0   ;;  %4058 = vmatprep.subr.bf16.mxu1 %v4603_v7  ;;  %vm1712_vm5 = vcmask 517376   ;;  %vm1721_vm6 = vcmask 523264   ;;  %vm3225_vm7 = vcmask 261120   ;;  %vm3298_vm8 = vcmask 9216  }
   0x8   :  { %v4723_v20 = vrot.slane %v34_v18, %v43_v15  ;;  %v4725_v21 = vrot.slane %v34_v18, %v53_v16  ;;  %v4727_v22 = vrot.slane %v34_v18, %v63_v17  ;;  %4333 = vset.pattern.permute.xlu1 %v4606_v38 }
   0x9   :  { %4054 = vmatpush3.bf16.msra.mxu0 %v4701_v10  ;;  %4060 = vmatpush3.bf16.msra.mxu1 %v4701_v10 }
   0xa   :  { %3598 = vmatprep.subr.mxu0 %v4604_v11  ;;  %3611 = vmatprep.subr.mxu1 %v4604_v11 }
   0xb   :  { %4334 = vset.pattern.permute.xlu0 %v4610_v2 }
   0xd   :  { %3599 = vmatpush3.msra.mxu0 %v4710_v12  ;;  %3612 = vmatpush3.msra.mxu1 %v4710_v12 }
   0xe   :  { %4061 = vmatprep.subr.bf16.mxu0 %v4603_v7  ;;  %4067 = vmatprep.subr.bf16.mxu1 %v4603_v7 }
  0x81   :  { %v39_v19 = vpop.permute.xlu0 %38  ;;  %v4729_v23 = vpop.permute.xlu1 %58 }
  0x82   :  { %v45_v25 = vmul.f32 %v4723_v20, %v39_v19  ;;  %v65_v26 = vmul.f32 %v4727_v22, %v4729_v23  ;;  %v77_v50 = vmul.f32 %v4729_v23, %v4725_v21 }
  0x86   :  { %v49_v24 = vpop.permute.xlu0 %48 }
  0x87   :  { %v55_v27 = vmul.f32 %v4725_v21, %v49_v24  ;;  %v75_v51 = vmul.f32 %v49_v24, %v4723_v20  ;;  %v87_v24 = vmul.f32 %v4729_v23, %v4723_v20 }
  0x89   :  { %v56_v28 = vadd.f32 %v55_v27, %v45_v25  ;;  %v78_v53 = vadd.f32 %v77_v50, %v75_v51 }
  0x8b   :  { %v66_v30 = vadd.f32 %v65_v26, %v56_v28 }
  0x8d   :  { %v73_v31 = vadd.f32 %v4738_v29, %v66_v30 }
  0x8f   :  { %v74_v32 = vmax.f32 %v73_v31, 0.0 }
  0x91   :  { %238 = vst.msk [vmem:[#allocation2] sm:$0x3] %vm237_vm1, %v74_v32 }
  0x92   :  { %240 = vst.msk [vmem:[#allocation2] sm:$0x3] %vm239_vm2, %v4604_v11 }
  0x99   :  { %v241_v33 = vld [vmem:[#allocation2] sm:$0x3] }
  0x9a   :  { %3601 = vmatmul.mubr.msk.f32.vlgmr.msra.gmra.mrb[0].mxu0 %vm248_vm3, %v241_v33 }
  0x9b   :  { %4063 = vmatpush3.bf16.msra.mxu0 %v4687_v6  ;;  %3626 = vmatprep.mubr.msk.f32.mxu0 %vm4605_vm0, %v4604_v11 }
  0x9c   :  { %4064 = vmatprep.subr.bf16.mxu0 %v4603_v7 }
  0x9f   :  { %4066 = vmatpush3.bf16.msra.mxu0 %v4701_v10 }
  0xa0   :  { %3624 = vmatprep.subr.mxu0 %v4604_v11 }
  0xa3   :  { %3625 = vmatpush3.msra.mxu0 %v4710_v12 }
  0xa4   :  { %4073 = vmatprep.subr.bf16.mxu0 %v4603_v7 }
 0x16d   :  { %v318_v35 = vpop.f32.mrb[0].mxu0 }
 0x16e   :  { %v319_v36 = vadd.f32 %v4756_v34, %v318_v35  ;;  %v3602_v37 = vpop.f32.mrb[1].mxu0 }
 0x170   :  { %4346 = vtanh.f32 %v319_v36  ;;  %v3317_v40 = vmul.f32 -1.442695, %v319_v36 }
 0x172   :  { %4348 = vpow2.f32 %v3317_v40 }
 0x17a   :  { %v4347_v39 = vpop.eup %4346 }
 0x17b   :  { %331 = vrot.lane.b32.xlu1 %v4347_v39, %s4607_s26  ;;  %v4611_v39 = vmov 5  }
 0x17c   :  { %v4349_v41 = vpop.eup %4348 }
 0x17d   :  { %v325_v42 = vadd.f32 1.0, %v4349_v41 }
 0x17f   :  { %4350 = vrcp.f32 %v325_v42 }
 0x189   :  { %v4351_v43 = vpop.eup %4350 }
 0x18a   :  { %v329_v46 = vmul.f32 0.0, %v4351_v43 }
 0x1ed   :  { %v332_v44 = vpop.permute.xlu1 %331 }
 0x1ee   :  { %v334_v45 = vmul.f32 %v4351_v43, %v332_v44 }
 0x1f0   :  { %336 = vrot.lane.b32.xlu1 %v334_v45, %s4608_s27 }
 0x1f4   :  { %80 = vperm.xlu1 %4333, %v4676_v0  }
 0x262   :  { %v337_v47 = vpop.permute.xlu1 %336 }
 0x263   :  { %v339_v48 = vadd.f32 %v337_v47, %v329_v46 }
 0x265   :  { %4352 = vtanh.f32 %v339_v48 }
 0x26f   :  { %v4353_v49 = vpop.eup %4352 }
 0x270   :  { %342 = vrot.lane.b32.xlu0 %v4353_v49, %s4607_s26 }
 0x273   :  { %v4766_v52 = vpop.permute.xlu1 %80 }
 0x274   :  { %v83_v54 = vmul.f32 %v4766_v52, %v4727_v22  ;;  %v89_v19 = vmul.f32 %v4766_v52, %v4725_v21 }
 0x276   :  { %v84_v55 = vadd.f32 %v83_v54, %v78_v53  ;;  %v90_v26 = vadd.f32 %v89_v19, %v87_v24  ;;  %v99_v53 = vmul.f32 %v4766_v52, %v4723_v20 }
 0x278   :  { %v85_v56 = vadd.f32 %v4738_v29, %v84_v55 }
 0x27a   :  { %v86_v57 = vmax.f32 %v85_v56, 0.0 }
 0x27c   :  { %346 = vst.msk [vmem:[#allocation2] sm:$0x3] %vm237_vm1, %v86_v57 }
 0x2e2   :  { %v343_v58 = vpop.permute.xlu0 %342 }
 0x2e3   :  { %v4772_v59 = vmul.f32 %v4351_v43, %v343_v58 }
 0x2e5   :  { %348 = vrot.lane.b32.xlu0 %v4772_v59, %s4609_s28 }
 0x357   :  { %v349_v60 = vpop.permute.xlu0 %348 }
 0x358   :  { %351 = vst.msk [vmem:[#allocation2] sm:$0x3] %vm239_vm2, %v349_v60 }
 0x35f   :  { %v352_v61 = vld [vmem:[#allocation2] sm:$0x3] }
 0x360   :  { %3614 = vmatmul.mubr.msk.f32.vlgmr.msra.gmra.mrb[0].mxu1 %vm248_vm3, %v352_v61 }
 0x361   :  { %4069 = vmatpush3.bf16.msra.mxu1 %v4687_v6  ;;  %3639 = vmatprep.mubr.msk.f32.mxu1 %vm4605_vm0, %v4604_v11 }
 0x362   :  { %4070 = vmatprep.subr.bf16.mxu1 %v4603_v7 }
 0x365   :  { %4072 = vmatpush3.bf16.msra.mxu1 %v4701_v10 }
 0x366   :  { %3637 = vmatprep.subr.mxu1 %v4604_v11 }
 0x369   :  { %3638 = vmatpush3.msra.mxu1 %v4710_v12 }
 0x36a   :  { %4079 = vmatprep.subr.bf16.mxu1 %v4603_v7 }
 0x433   :  { %v422_v62 = vpop.f32.mrb[0].mxu1 }
 0x434   :  { %v423_v63 = vadd.f32 %v4756_v34, %v422_v62  ;;  %v3615_v1 = vpop.f32.mrb[1].mxu1 }
 0x436   :  { %4354 = vtanh.f32 %v423_v63  ;;  %v3319_v4 = vmul.f32 -1.442695, %v423_v63 }
 0x438   :  { %4356 = vpow2.f32 %v3319_v4  ;;  %v4612_v4 = vmov 6  }
 0x440   :  { %v4355_v3 = vpop.eup %4354 }
 0x441   :  { %435 = vrot.lane.b32.xlu1 %v4355_v3, %s4607_s26 }
 0x442   :  { %v4357_v5 = vpop.eup %4356 }
 0x443   :  { %v429_v8 = vadd.f32 1.0, %v4357_v5 }
 0x445   :  { %4358 = vrcp.f32 %v429_v8 }
 0x44f   :  { %v4359_v9 = vpop.eup %4358 }
 0x450   :  { %v433_v15 = vmul.f32 %v4359_v9, %v339_v48 }
 0x4b3   :  { %v436_v13 = vpop.permute.xlu1 %435 }
 0x4b4   :  { %v438_v14 = vmul.f32 %v4359_v9, %v436_v13 }
 0x4b6   :  { %440 = vrot.lane.b32.xlu0 %v438_v14, %s4608_s27 }
 0x4ba   :  { %92 = vperm.xlu0 %4334, %v4676_v0  }
 0x4be   :  { %4335 = vset.pattern.permute.xlu0 %v4611_v39 }
 0x528   :  { %v441_v16 = vpop.permute.xlu0 %440 }
 0x529   :  { %v443_v17 = vadd.f32 %v441_v16, %v433_v15 }
 0x52b   :  { %4360 = vtanh.f32 %v443_v17 }
 0x535   :  { %v4361_v18 = vpop.eup %4360 }
 0x536   :  { %446 = vrot.lane.b32.xlu1 %v4361_v18, %s4607_s26 }
 0x539   :  { %v4795_v25 = vpop.permute.xlu0 %92 }
 0x53a   :  { %v95_v27 = vmul.f32 %v4795_v25, %v4727_v22  ;;  %v101_v51 = vmul.f32 %v4795_v25, %v4725_v21 }
 0x53c   :  { %v96_v28 = vadd.f32 %v95_v27, %v90_v26  ;;  %v102_v55 = vadd.f32 %v101_v51, %v99_v53  ;;  %v111_v27 = vmul.f32 %v4795_v25, %v4723_v20 }
 0x53e   :  { %v97_v30 = vadd.f32 %v4738_v29, %v96_v28 }
 0x540   :  { %v98_v31 = vmax.f32 %v97_v30, 0.0 }
 0x542   :  { %450 = vst.msk [vmem:[#allocation2] sm:$0x3] %vm237_vm1, %v98_v31 }
 0x5a8   :  { %v447_v32 = vpop.permute.xlu1 %446 }
 0x5a9   :  { %v4801_v33 = vmul.f32 %v4359_v9, %v447_v32 }
 0x5ab   :  { %452 = vrot.lane.b32.xlu1 %v4801_v33, %s4609_s28 }
 0x61d   :  { %v453_v35 = vpop.permute.xlu1 %452 }
 0x61e   :  { %455 = vst.msk [vmem:[#allocation2] sm:$0x3] %vm239_vm2, %v453_v35 }
 0x625   :  { %v456_v23 = vld [vmem:[#allocation2] sm:$0x3] }
 0x626   :  { %3627 = vmatmul.mubr.msk.f32.vlgmr.msra.gmra.mrb[2].mxu0 %vm248_vm3, %v456_v23 }
 0x627   :  { %4075 = vmatpush3.bf16.msra.mxu0 %v4687_v6  ;;  %3652 = vmatprep.mubr.msk.f32.mxu0 %vm4605_vm0, %v4604_v11 }
 0x628   :  { %4076 = vmatprep.subr.bf16.mxu0 %v4603_v7 }
 0x62b   :  { %4078 = vmatpush3.bf16.msra.mxu0 %v4701_v10 }
 0x62c   :  { %3650 = vmatprep.subr.mxu0 %v4604_v11 }
 0x62f   :  { %3651 = vmatpush3.msra.mxu0 %v4710_v12 }
 0x630   :  { %4085 = vmatprep.subr.bf16.mxu0 %v4603_v7 }
 0x6f9   :  { %v526_v36 = vpop.f32.mrb[2].mxu0 }
 0x6fa   :  { %v527_v37 = vadd.f32 %v4756_v34, %v526_v36  ;;  %v3628_v38 = vpop.f32.mrb[3].mxu0 }
 0x6fc   :  { %4362 = vtanh.f32 %v527_v37  ;;  %v3321_v41 = vmul.f32 -1.442695, %v527_v37 }
 0x6fe   :  { %4364 = vpow2.f32 %v3321_v41 }
 0x706   :  { %v4363_v40 = vpop.eup %4362 }
 0x707   :  { %539 = vrot.lane.b32.xlu1 %v4363_v40, %s4607_s26 }
 0x708   :  { %v4365_v42 = vpop.eup %4364 }
 0x709   :  { %v533_v43 = vadd.f32 1.0, %v4365_v42  ;;  %v4613_v42 = vmov 7  }
 0x70b   :  { %4366 = vrcp.f32 %v533_v43 }
 0x715   :  { %v4367_v44 = vpop.eup %4366 }
 0x716   :  { %v537_v47 = vmul.f32 %v4367_v44, %v443_v17 }
 0x779   :  { %v540_v45 = vpop.permute.xlu1 %539 }
 0x77a   :  { %v542_v46 = vmul.f32 %v4367_v44, %v540_v45 }
 0x77c   :  { %544 = vrot.lane.b32.xlu0 %v542_v46, %s4608_s27 }
 0x780   :  { %104 = vperm.xlu0 %4335, %v4676_v0  }
 0x784   :  { %4336 = vset.pattern.permute.xlu0 %v4612_v4 }
 0x7ee   :  { %v545_v48 = vpop.permute.xlu0 %544 }
 0x7ef   :  { %v547_v49 = vadd.f32 %v545_v48, %v537_v47 }
 0x7f1   :  { %4368 = vtanh.f32 %v547_v49 }
 0x7fb   :  { %v4369_v50 = vpop.eup %4368 }
 0x7fc   :  { %550 = vrot.lane.b32.xlu1 %v4369_v50, %s4607_s26 }
 0x7ff   :  { %v4824_v54 = vpop.permute.xlu0 %104 }
 0x800   :  { %v107_v56 = vmul.f32 %v4824_v54, %v4727_v22  ;;  %v113_v26 = vmul.f32 %v4824_v54, %v4725_v21 }
 0x802   :  { %v108_v57 = vadd.f32 %v107_v56, %v102_v55  ;;  %v114_v30 = vadd.f32 %v113_v26, %v111_v27 }
 0x804   :  { %v109_v58 = vadd.f32 %v4738_v29, %v108_v57  ;;  %v123_v57 = vmul.f32 %v4824_v54, %v4723_v20 }
 0x806   :  { %v110_v60 = vmax.f32 %v109_v58, 0.0 }
 0x808   :  { %554 = vst.msk [vmem:[#allocation2] sm:$0x3] %vm237_vm1, %v110_v60 }
 0x86e   :  { %v551_v61 = vpop.permute.xlu1 %550 }
 0x86f   :  { %v4830_v62 = vmul.f32 %v4367_v44, %v551_v61 }
 0x871   :  { %556 = vrot.lane.b32.xlu1 %v4830_v62, %s4609_s28 }
 0x8e3   :  { %v557_v63 = vpop.permute.xlu1 %556 }
 0x8e4   :  { %559 = vst.msk [vmem:[#allocation2] sm:$0x3] %vm239_vm2, %v557_v63 }
 0x8eb   :  { %v560_v52 = vld [vmem:[#allocation2] sm:$0x3] }
 0x8ec   :  { %3640 = vmatmul.mubr.msk.f32.vlgmr.msra.gmra.mrb[2].mxu1 %vm248_vm3, %v560_v52 }
 0x8ed   :  { %4081 = vmatpush3.bf16.msra.mxu1 %v4687_v6  ;;  %3665 = vmatprep.mubr.msk.f32.mxu1 %vm4605_vm0, %v4604_v11 }
 0x8ee   :  { %4082 = vmatprep.subr.bf16.mxu1 %v4603_v7 }
 0x8f1   :  { %4084 = vmatpush3.bf16.msra.mxu1 %v4701_v10 }
 0x8f2   :  { %3663 = vmatprep.subr.mxu1 %v4604_v11 }
 0x8f5   :  { %3664 = vmatpush3.msra.mxu1 %v4710_v12 }
 0x8f6   :  { %4091 = vmatprep.subr.bf16.mxu1 %v4603_v7 }
 0x9bf   :  { %v630_v1 = vpop.f32.mrb[2].mxu1 }
 0x9c0   :  { %v631_v2 = vadd.f32 %v4756_v34, %v630_v1  ;;  %v3641_v3 = vpop.f32.mrb[3].mxu1 }
 0x9c2   :  { %4370 = vtanh.f32 %v631_v2  ;;  %v3323_v8 = vmul.f32 -1.442695, %v631_v2 }
 0x9c4   :  { %4372 = vpow2.f32 %v3323_v8 }
 0x9cc   :  { %v4371_v5 = vpop.eup %4370 }
 0x9cd   :  { %643 = vrot.lane.b32.xlu1 %v4371_v5, %s4607_s26 }
 0x9ce   :  { %v4373_v9 = vpop.eup %4372 }
 0x9cf   :  { %v637_v13 = vadd.f32 1.0, %v4373_v9 }
 0x9d1   :  { %4374 = vrcp.f32 %v637_v13  ;;  %v4614_v13 = vmov 8  }
 0x9db   :  { %v4375_v14 = vpop.eup %4374 }
 0x9dc   :  { %v641_v17 = vmul.f32 %v4375_v14, %v547_v49 }
 0xa3f   :  { %v644_v15 = vpop.permute.xlu1 %643 }
 0xa40   :  { %v646_v16 = vmul.f32 %v4375_v14, %v644_v15 }
 0xa42   :  { %648 = vrot.lane.b32.xlu0 %v646_v16, %s4608_s27 }
 0xa46   :  { %116 = vperm.xlu0 %4336, %v4676_v0  }
 0xa4a   :  { %4337 = vset.pattern.permute.xlu0 %v4613_v42 }
 0xab4   :  { %v649_v18 = vpop.permute.xlu0 %648 }
 0xab5   :  { %v651_v19 = vadd.f32 %v649_v18, %v641_v17 }
 0xab7   :  { %4376 = vtanh.f32 %v651_v19 }
 0xac1   :  { %v4377_v24 = vpop.eup %4376 }
 0xac2   :  { %654 = vrot.lane.b32.xlu1 %v4377_v24, %s4607_s26 }
 0xac5   :  { %v4853_v28 = vpop.permute.xlu0 %116 }
 0xac6   :  { %v119_v31 = vmul.f32 %v4853_v28, %v4727_v22  ;;  %v125_v56 = vmul.f32 %v4853_v28, %v4725_v21 }
 0xac8   :  { %v120_v32 = vadd.f32 %v119_v31, %v114_v30  ;;  %v126_v60 = vadd.f32 %v125_v56, %v123_v57 }
 0xaca   :  { %v121_v35 = vadd.f32 %v4738_v29, %v120_v32 }
 0xacc   :  { %v122_v23 = vmax.f32 %v121_v35, 0.0  ;;  %v135_v35 = vmul.f32 %v4853_v28, %v4723_v20 }
 0xace   :  { %658 = vst.msk [vmem:[#allocation2] sm:$0x3] %vm237_vm1, %v122_v23 }
 0xb34   :  { %v655_v36 = vpop.permute.xlu1 %654 }
 0xb35   :  { %v4859_v37 = vmul.f32 %v4375_v14, %v655_v36 }
 0xb37   :  { %660 = vrot.lane.b32.xlu1 %v4859_v37, %s4609_s28 }
 0xba9   :  { %v661_v38 = vpop.permute.xlu1 %660 }
 0xbaa   :  { %663 = vst.msk [vmem:[#allocation2] sm:$0x3] %vm239_vm2, %v661_v38 }
 0xbb1   :  { %v664_v25 = vld [vmem:[#allocation2] sm:$0x3] }
 0xbb2   :  { %3653 = vmatmul.mubr.msk.f32.vlgmr.msra.gmra.mrb[4].mxu0 %vm248_vm3, %v664_v25 }
 0xbb3   :  { %4087 = vmatpush3.bf16.msra.mxu0 %v4687_v6  ;;  %3678 = vmatprep.mubr.msk.f32.mxu0 %vm4605_vm0, %v4604_v11 }
 0xbb4   :  { %4088 = vmatprep.subr.bf16.mxu0 %v4603_v7 }
 0xbb7   :  { %4090 = vmatpush3.bf16.msra.mxu0 %v4701_v10 }
 0xbb8   :  { %3676 = vmatprep.subr.mxu0 %v4604_v11 }
 0xbbb   :  { %3677 = vmatpush3.msra.mxu0 %v4710_v12 }
 0xbbc   :  { %4097 = vmatprep.subr.bf16.mxu0 %v4603_v7 }
 0xc85   :  { %v734_v39 = vpop.f32.mrb[4].mxu0 }
 0xc86   :  { %v735_v40 = vadd.f32 %v4756_v34, %v734_v39  ;;  %v3654_v41 = vpop.f32.mrb[5].mxu0 }
 0xc88   :  { %4378 = vtanh.f32 %v735_v40  ;;  %v3325_v44 = vmul.f32 -1.442695, %v735_v40 }
 0xc8a   :  { %4380 = vpow2.f32 %v3325_v44 }
 0xc92   :  { %v4379_v43 = vpop.eup %4378 }
 0xc93   :  { %747 = vrot.lane.b32.xlu1 %v4379_v43, %s4607_s26 }
 0xc94   :  { %v4381_v45 = vpop.eup %4380 }
 0xc95   :  { %v741_v46 = vadd.f32 1.0, %v4381_v45 }
 0xc97   :  { %4382 = vrcp.f32 %v741_v46 }
 0xca1   :  { %v4383_v47 = vpop.eup %4382 }
 0xca2   :  { %v745_v50 = vmul.f32 %v4383_v47, %v651_v19 }
 0xd05   :  { %v748_v48 = vpop.permute.xlu1 %747 }
 0xd06   :  { %v750_v49 = vmul.f32 %v4383_v47, %v748_v48 }
 0xd08   :  { %752 = vrot.lane.b32.xlu0 %v750_v49, %s4608_s27 }
 0xd0c   :  { %128 = vperm.xlu0 %4337, %v4676_v0  }
 0xd10   :  { %4338 = vset.pattern.permute.xlu0 %v4614_v13 }
 0xd7a   :  { %v753_v51 = vpop.permute.xlu0 %752 }
 0xd7b   :  { %v755_v53 = vadd.f32 %v753_v51, %v745_v50 }
 0xd7d   :  { %4384 = vtanh.f32 %v755_v53 }
 0xd87   :  { %v4385_v55 = vpop.eup %4384 }
 0xd88   :  { %758 = vrot.lane.b32.xlu1 %v4385_v55, %s4607_s26 }
 0xd8b   :  { %v4882_v58 = vpop.permute.xlu0 %128 }
 0xd8c   :  { %v131_v61 = vmul.f32 %v4882_v58, %v4727_v22  ;;  %v137_v32 = vmul.f32 %v4882_v58, %v4725_v21 }
 0xd8e   :  { %v132_v63 = vadd.f32 %v131_v61, %v126_v60  ;;  %v138_v36 = vadd.f32 %v137_v32, %v135_v35 }
 0xd90   :  { %v133_v52 = vadd.f32 %v4738_v29, %v132_v63 }
 0xd92   :  { %v134_v1 = vmax.f32 %v133_v52, 0.0 }
 0xd94   :  { %762 = vst.msk [vmem:[#allocation2] sm:$0x3] %vm237_vm1, %v134_v1  ;;  %v147_v1 = vmul.f32 %v4882_v58, %v4723_v20 }
 0xdfa   :  { %v759_v2 = vpop.permute.xlu1 %758 }
 0xdfb   :  { %v4888_v3 = vmul.f32 %v4383_v47, %v759_v2  ;;  %v4615_v47 = vmov 9  }
 0xdfd   :  { %764 = vrot.lane.b32.xlu1 %v4888_v3, %s4609_s28 }
 0xe6f   :  { %v765_v4 = vpop.permute.xlu1 %764 }
 0xe70   :  { %767 = vst.msk [vmem:[#allocation2] sm:$0x3] %vm239_vm2, %v765_v4 }
 0xe77   :  { %v768_v54 = vld [vmem:[#allocation2] sm:$0x3] }
 0xe78   :  { %3666 = vmatmul.mubr.msk.f32.vlgmr.msra.gmra.mrb[4].mxu1 %vm248_vm3, %v768_v54 }
 0xe79   :  { %4093 = vmatpush3.bf16.msra.mxu1 %v4687_v6  ;;  %3691 = vmatprep.mubr.msk.f32.mxu1 %vm4605_vm0, %v4604_v11 }
 0xe7a   :  { %4094 = vmatprep.subr.bf16.mxu1 %v4603_v7 }
 0xe7d   :  { %4096 = vmatpush3.bf16.msra.mxu1 %v4701_v10 }
 0xe7e   :  { %3689 = vmatprep.subr.mxu1 %v4604_v11 }
 0xe81   :  { %3690 = vmatpush3.msra.mxu1 %v4710_v12 }
 0xe82   :  { %4103 = vmatprep.subr.bf16.mxu1 %v4603_v7 }
 0xf4b   :  { %v838_v5 = vpop.f32.mrb[4].mxu1 }
 0xf4c   :  { %v839_v8 = vadd.f32 %v4756_v34, %v838_v5  ;;  %v3667_v9 = vpop.f32.mrb[5].mxu1 }
 0xf4e   :  { %4386 = vtanh.f32 %v839_v8  ;;  %v3327_v15 = vmul.f32 -1.442695, %v839_v8 }
 0xf50   :  { %4388 = vpow2.f32 %v3327_v15 }
 0xf58   :  { %v4387_v14 = vpop.eup %4386 }
 0xf59   :  { %851 = vrot.lane.b32.xlu1 %v4387_v14, %s4607_s26 }
 0xf5a   :  { %v4389_v16 = vpop.eup %4388 }
 0xf5b   :  { %v845_v17 = vadd.f32 1.0, %v4389_v16 }
 0xf5d   :  { %4390 = vrcp.f32 %v845_v17 }
 0xf67   :  { %v4391_v18 = vpop.eup %4390 }
 0xf68   :  { %v849_v26 = vmul.f32 %v4391_v18, %v755_v53 }
 0xfcb   :  { %v852_v19 = vpop.permute.xlu1 %851 }
 0xfcc   :  { %v854_v24 = vmul.f32 %v4391_v18, %v852_v19  ;;  %v4616_v19 = vmov 10  }
 0xfce   :  { %856 = vrot.lane.b32.xlu0 %v854_v24, %s4608_s27 }
 0xfd2   :  { %140 = vperm.xlu0 %4338, %v4676_v0  }
 0xfd6   :  { %4339 = vset.pattern.permute.xlu0 %v4615_v47 }
0x1040   :  { %v857_v27 = vpop.permute.xlu0 %856 }
0x1041   :  { %v859_v30 = vadd.f32 %v857_v27, %v849_v26 }
0x1043   :  { %4392 = vtanh.f32 %v859_v30 }
0x104d   :  { %v4393_v31 = vpop.eup %4392 }
0x104e   :  { %862 = vrot.lane.b32.xlu1 %v4393_v31, %s4607_s26 }
0x1051   :  { %v4911_v23 = vpop.permute.xlu0 %140 }
0x1052   :  { %v143_v38 = vmul.f32 %v4911_v23, %v4727_v22  ;;  %v149_v52 = vmul.f32 %v4911_v23, %v4725_v21 }
0x1054   :  { %v144_v25 = vadd.f32 %v143_v38, %v138_v36  ;;  %v150_v4 = vadd.f32 %v149_v52, %v147_v1 }
0x1056   :  { %v145_v39 = vadd.f32 %v4738_v29, %v144_v25 }
0x1058   :  { %v146_v40 = vmax.f32 %v145_v39, 0.0 }
0x105a   :  { %866 = vst.msk [vmem:[#allocation2] sm:$0x3] %vm237_vm1, %v146_v40 }
0x10c0   :  { %v863_v41 = vpop.permute.xlu1 %862 }
0x10c1   :  { %v4917_v42 = vmul.f32 %v4391_v18, %v863_v41  ;;  %v159_v41 = vmul.f32 %v4911_v23, %v4723_v20 }
0x10c3   :  { %868 = vrot.lane.b32.xlu1 %v4917_v42, %s4609_s28 }
0x1135   :  { %v869_v43 = vpop.permute.xlu1 %868 }
0x1136   :  { %871 = vst.msk [vmem:[#allocation2] sm:$0x3] %vm239_vm2, %v869_v43 }
0x113d   :  { %v872_v28 = vld [vmem:[#allocation2] sm:$0x3] }
0x113e   :  { %3679 = vmatmul.mubr.msk.f32.vlgmr.msra.gmra.mrb[6].mxu0 %vm248_vm3, %v872_v28 }
0x113f   :  { %4099 = vmatpush3.bf16.msra.mxu0 %v4687_v6  ;;  %3704 = vmatprep.mubr.msk.f32.mxu0 %vm4605_vm0, %v4604_v11 }
0x1140   :  { %4100 = vmatprep.subr.bf16.mxu0 %v4603_v7 }
0x1143   :  { %4102 = vmatpush3.bf16.msra.mxu0 %v4701_v10 }
0x1144   :  { %3702 = vmatprep.subr.mxu0 %v4604_v11 }
0x1147   :  { %3703 = vmatpush3.msra.mxu0 %v4710_v12 }
0x1148   :  { %4109 = vmatprep.subr.bf16.mxu0 %v4603_v7 }
0x1211   :  { %v942_v44 = vpop.f32.mrb[6].mxu0 }
0x1212   :  { %v943_v45 = vadd.f32 %v4756_v34, %v942_v44  ;;  %v3680_v46 = vpop.f32.mrb[7].mxu0 }
0x1214   :  { %4394 = vtanh.f32 %v943_v45  ;;  %v3329_v49 = vmul.f32 -1.442695, %v943_v45 }
0x1216   :  { %4396 = vpow2.f32 %v3329_v49 }
0x121e   :  { %v4395_v48 = vpop.eup %4394 }
0x121f   :  { %955 = vrot.lane.b32.xlu1 %v4395_v48, %s4607_s26 }
0x1220   :  { %v4397_v50 = vpop.eup %4396 }
0x1221   :  { %v949_v51 = vadd.f32 1.0, %v4397_v50 }
0x1223   :  { %4398 = vrcp.f32 %v949_v51 }
0x122d   :  { %v4399_v53 = vpop.eup %4398 }
0x122e   :  { %v953_v57 = vmul.f32 %v4399_v53, %v859_v30 }
0x1291   :  { %v956_v55 = vpop.permute.xlu1 %955 }
0x1292   :  { %v958_v56 = vmul.f32 %v4399_v53, %v956_v55 }
0x1294   :  { %960 = vrot.lane.b32.xlu0 %v958_v56, %s4608_s27  ;;  %v4617_v56 = vmov 11  }
0x1298   :  { %152 = vperm.xlu0 %4339, %v4676_v0  }
0x129c   :  { %4340 = vset.pattern.permute.xlu0 %v4616_v19 }
0x1306   :  { %v961_v60 = vpop.permute.xlu0 %960 }
0x1307   :  { %v963_v61 = vadd.f32 %v961_v60, %v953_v57 }
0x1309   :  { %4400 = vtanh.f32 %v963_v61 }
0x1313   :  { %v4401_v63 = vpop.eup %4400 }
0x1314   :  { %966 = vrot.lane.b32.xlu1 %v4401_v63, %s4607_s26 }
0x1317   :  { %v4940_v2 = vpop.permute.xlu0 %152 }
0x1318   :  { %v155_v54 = vmul.f32 %v4940_v2, %v4727_v22  ;;  %v161_v40 = vmul.f32 %v4940_v2, %v4725_v21 }
0x131a   :  { %v156_v5 = vadd.f32 %v155_v54, %v150_v4  ;;  %v162_v28 = vadd.f32 %v161_v40, %v159_v41 }
0x131c   :  { %v157_v8 = vadd.f32 %v4738_v29, %v156_v5 }
0x131e   :  { %v158_v9 = vmax.f32 %v157_v8, 0.0 }
0x1320   :  { %970 = vst.msk [vmem:[#allocation2] sm:$0x3] %vm237_vm1, %v158_v9 }
0x1386   :  { %v967_v13 = vpop.permute.xlu1 %966 }
0x1387   :  { %v4946_v14 = vmul.f32 %v4399_v53, %v967_v13 }
0x1389   :  { %972 = vrot.lane.b32.xlu1 %v4946_v14, %s4609_s28 }
0x13fb   :  { %v973_v15 = vpop.permute.xlu1 %972 }
0x13fc   :  { %975 = vst.msk [vmem:[#allocation2] sm:$0x3] %vm239_vm2, %v973_v15  ;;  %v171_v15 = vmul.f32 %v4940_v2, %v4723_v20 }
0x1403   :  { %v976_v58 = vld [vmem:[#allocation2] sm:$0x3] }
0x1404   :  { %3692 = vmatmul.mubr.msk.f32.vlgmr.msra.gmra.mrb[6].mxu1 %vm248_vm3, %v976_v58 }
0x1405   :  { %4105 = vmatpush3.bf16.msra.mxu1 %v4687_v6  ;;  %3717 = vmatprep.mubr.msk.f32.mxu1 %vm4605_vm0, %v4604_v11 }
0x1406   :  { %4106 = vmatprep.subr.bf16.mxu1 %v4603_v7 }
0x1409   :  { %4108 = vmatpush3.bf16.msra.mxu1 %v4701_v10 }
0x140a   :  { %3715 = vmatprep.subr.mxu1 %v4604_v11 }
0x140d   :  { %3716 = vmatpush3.msra.mxu1 %v4710_v12 }
0x140e   :  { %4115 = vmatprep.subr.bf16.mxu1 %v4603_v7 }
0x14d7   :  { %v1046_v16 = vpop.f32.mrb[6].mxu1 }
0x14d8   :  { %v1047_v17 = vadd.f32 %v4756_v34, %v1046_v16  ;;  %v3693_v18 = vpop.f32.mrb[7].mxu1 }
0x14da   :  { %4402 = vtanh.f32 %v1047_v17  ;;  %v3331_v26 = vmul.f32 -1.442695, %v1047_v17 }
0x14dc   :  { %4404 = vpow2.f32 %v3331_v26 }
0x14e4   :  { %v4403_v24 = vpop.eup %4402 }
0x14e5   :  { %1059 = vrot.lane.b32.xlu1 %v4403_v24, %s4607_s26 }
0x14e6   :  { %v4405_v27 = vpop.eup %4404 }
0x14e7   :  { %v1053_v30 = vadd.f32 1.0, %v4405_v27 }
0x14e9   :  { %4406 = vrcp.f32 %v1053_v30 }
0x14f3   :  { %v4407_v31 = vpop.eup %4406 }
0x14f4   :  { %v1057_v36 = vmul.f32 %v4407_v31, %v963_v61 }
0x1557   :  { %v1060_v32 = vpop.permute.xlu1 %1059 }
0x1558   :  { %v1062_v35 = vmul.f32 %v4407_v31, %v1060_v32 }
0x155a   :  { %1064 = vrot.lane.b32.xlu0 %v1062_v35, %s4608_s27  ;;  %v4618_v35 = vmov 12  }
0x155e   :  { %164 = vperm.xlu0 %4340, %v4676_v0  }
0x1562   :  { %4341 = vset.pattern.permute.xlu0 %v4617_v56 }
0x15cc   :  { %v1065_v38 = vpop.permute.xlu0 %1064 }
0x15cd   :  { %v1067_v25 = vadd.f32 %v1065_v38, %v1057_v36 }
0x15cf   :  { %4408 = vtanh.f32 %v1067_v25 }
0x15d9   :  { %v4409_v39 = vpop.eup %4408 }
0x15da   :  { %1070 = vrot.lane.b32.xlu1 %v4409_v39, %s4607_s26 }
0x15dd   :  { %v4969_v43 = vpop.permute.xlu0 %164 }
0x15de   :  { %v167_v44 = vmul.f32 %v4969_v43, %v4727_v22  ;;  %v173_v13 = vmul.f32 %v4969_v43, %v4725_v21 }
0x15e0   :  { %v168_v45 = vadd.f32 %v167_v44, %v162_v28  ;;  %v174_v16 = vadd.f32 %v173_v13, %v171_v15  ;;  %v5024_v28 = vld [vmem:[%s5499_s0] sm:$0x3] }
0x15e2   :  { %v169_v46 = vadd.f32 %v4738_v29, %v168_v45 }
0x15e4   :  { %v170_v47 = vmax.f32 %v169_v46, 0.0 }
0x15e6   :  { %1074 = vst.msk [vmem:[#allocation2] sm:$0x3] %vm237_vm1, %v170_v47 }
0x164c   :  { %v1071_v48 = vpop.permute.xlu1 %1070 }
0x164d   :  { %v4975_v49 = vmul.f32 %v4407_v31, %v1071_v48 }
0x164f   :  { %1076 = vrot.lane.b32.xlu1 %v4975_v49, %s4609_s28 }
0x16c1   :  { %v1077_v50 = vpop.permute.xlu1 %1076 }
0x16c2   :  { %1079 = vst.msk [vmem:[#allocation2] sm:$0x3] %vm239_vm2, %v1077_v50  ;;  %v183_v50 = vmul.f32 %v4969_v43, %v4723_v20 }
0x16c9   :  { %v1080_v23 = vld [vmem:[#allocation2] sm:$0x3] }
0x16ca   :  { %3705 = vmatmul.mubr.msk.f32.vlgmr.msra.gmra.mrb[8].mxu0 %vm248_vm3, %v1080_v23 }
0x16cb   :  { %4111 = vmatpush3.bf16.msra.mxu0 %v4687_v6  ;;  %3730 = vmatprep.mubr.msk.f32.mxu0 %vm4605_vm0, %v4604_v11 }
0x16cc   :  { %4112 = vmatprep.subr.bf16.mxu0 %v4603_v7 }
0x16cf   :  { %4114 = vmatpush3.bf16.msra.mxu0 %v4701_v10 }
0x16d0   :  { %3728 = vmatprep.subr.mxu0 %v4604_v11 }
0x16d3   :  { %3729 = vmatpush3.msra.mxu0 %v4710_v12 }
0x16d4   :  { %4121 = vmatprep.subr.bf16.mxu0 %v4603_v7 }
0x179d   :  { %v1150_v51 = vpop.f32.mrb[8].mxu0 }
0x179e   :  { %v1151_v53 = vadd.f32 %v4756_v34, %v1150_v51  ;;  %v3706_v55 = vpop.f32.mrb[9].mxu0 }
0x17a0   :  { %4410 = vtanh.f32 %v1151_v53  ;;  %v3333_v60 = vmul.f32 -1.442695, %v1151_v53 }
0x17a2   :  { %4412 = vpow2.f32 %v3333_v60 }
0x17aa   :  { %v4411_v57 = vpop.eup %4410 }
0x17ab   :  { %1163 = vrot.lane.b32.xlu1 %v4411_v57, %s4607_s26 }
0x17ac   :  { %v4413_v61 = vpop.eup %4412 }
0x17ad   :  { %v1157_v63 = vadd.f32 1.0, %v4413_v61 }
0x17af   :  { %4414 = vrcp.f32 %v1157_v63 }
0x17b9   :  { %v4415_v52 = vpop.eup %4414 }
0x17ba   :  { %v1161_v54 = vmul.f32 %v4415_v52, %v1067_v25 }
0x181d   :  { %v1164_v1 = vpop.permute.xlu1 %1163 }
0x181e   :  { %v1166_v4 = vmul.f32 %v4415_v52, %v1164_v1 }
0x1820   :  { %1168 = vrot.lane.b32.xlu0 %v1166_v4, %s4608_s27 }
0x1824   :  { %176 = vperm.xlu0 %4341, %v4676_v0  }
0x1828   :  { %4342 = vset.pattern.permute.xlu0 %v4618_v35  ;;  %v5070_v35 = vld [vmem:[%s5501_s2] ss:$0 sm:$0xff] }
0x1892   :  { %v1169_v5 = vpop.permute.xlu0 %1168 }
0x1893   :  { %v1171_v8 = vadd.f32 %v1169_v5, %v1161_v54  ;;  %v4619_v54 = vmov 13  }
0x1895   :  { %4416 = vtanh.f32 %v1171_v8 }
0x189f   :  { %v4417_v9 = vpop.eup %4416 }
0x18a0   :  { %1174 = vrot.lane.b32.xlu1 %v4417_v9, %s4607_s26 }
0x18a3   :  { %v4998_v58 = vpop.permute.xlu0 %176 }
0x18a4   :  { %v179_v17 = vmul.f32 %v4998_v58, %v4727_v22  ;;  %v185_v48 = vmul.f32 %v4998_v58, %v4725_v21 }
0x18a6   :  { %v180_v0 = vadd.f32 %v179_v17, %v174_v16  ;;  %v186_v51 = vadd.f32 %v185_v48, %v183_v50 }
0x18a8   :  { %v181_v18 = vadd.f32 %v4738_v29, %v180_v0 }
0x18aa   :  { %v182_v19 = vmax.f32 %v181_v18, 0.0 }
0x18ac   :  { %1178 = vst.msk [vmem:[#allocation2] sm:$0x3] %vm237_vm1, %v182_v19 }
0x1912   :  { %v1175_v24 = vpop.permute.xlu1 %1174 }
0x1913   :  { %v5004_v26 = vmul.f32 %v4415_v52, %v1175_v24 }
0x1915   :  { %1180 = vrot.lane.b32.xlu1 %v5004_v26, %s4609_s28 }
0x1987   :  { %v1181_v27 = vpop.permute.xlu1 %1180 }
0x1988   :  { %1183 = vst.msk [vmem:[#allocation2] sm:$0x3] %vm239_vm2, %v1181_v27  ;;  %v195_v27 = vmul.f32 %v4998_v58, %v4723_v20 }
0x198f   :  { %v1184_v2 = vld [vmem:[#allocation2] sm:$0x3] }
0x1990   :  { %3718 = vmatmul.mubr.msk.f32.vlgmr.msra.gmra.mrb[8].mxu1 %vm248_vm3, %v1184_v2 }
0x1991   :  { %4117 = vmatpush3.bf16.msra.mxu1 %v4687_v6  ;;  %3743 = vmatprep.mubr.msk.f32.mxu1 %vm4605_vm0, %v4604_v11 }
0x1992   :  { %4118 = vmatprep.subr.bf16.mxu1 %v4603_v7 }
0x1995   :  { %4120 = vmatpush3.bf16.msra.mxu1 %v4701_v10 }
0x1996   :  { %3741 = vmatprep.subr.mxu1 %v4604_v11 }
0x1999   :  { %3742 = vmatpush3.msra.mxu1 %v4710_v12 }
0x199a   :  { %4127 = vmatprep.subr.bf16.mxu1 %v4603_v7 }
0x1a63   :  { %v1254_v30 = vpop.f32.mrb[8].mxu1 }
0x1a64   :  { %v1255_v31 = vadd.f32 %v4756_v34, %v1254_v30  ;;  %v3719_v32 = vpop.f32.mrb[9].mxu1 }
0x1a66   :  { %4418 = vtanh.f32 %v1255_v31  ;;  %v3335_v38 = vmul.f32 -1.442695, %v1255_v31 }
0x1a68   :  { %4420 = vpow2.f32 %v3335_v38 }
0x1a70   :  { %v4419_v36 = vpop.eup %4418 }
0x1a71   :  { %1267 = vrot.lane.b32.xlu1 %v4419_v36, %s4607_s26 }
0x1a72   :  { %v4421_v25 = vpop.eup %4420 }
0x1a73   :  { %v1261_v39 = vadd.f32 1.0, %v4421_v25 }
0x1a75   :  { %4422 = vrcp.f32 %v1261_v39 }
0x1a7f   :  { %v4423_v40 = vpop.eup %4422 }
0x1a80   :  { %v1265_v44 = vmul.f32 %v4423_v40, %v1171_v8 }
0x1ae3   :  { %v1268_v41 = vpop.permute.xlu1 %1267 }
0x1ae4   :  { %v1270_v12 = vmul.f32 %v4423_v40, %v1268_v41 }
0x1ae6   :  { %1272 = vrot.lane.b32.xlu0 %v1270_v12, %s4608_s27  ;;  %v5090_v12 = vld [vmem:[%s5503_s4] ss:$0 sm:$0xff] }
0x1aea   :  { %188 = vperm.xlu0 %4342, %v5024_v28  }
0x1aee   :  { %4343 = vset.pattern.permute.xlu0 %v4619_v54 }
0x1b58   :  { %v1273_v45 = vpop.permute.xlu0 %1272 }
0x1b59   :  { %v1275_v46 = vadd.f32 %v1273_v45, %v1265_v44  ;;  %v4620_v45 = vmov 14  }
0x1b5b   :  { %4424 = vtanh.f32 %v1275_v46 }
0x1b65   :  { %v4425_v47 = vpop.eup %4424 }
0x1b66   :  { %1278 = vrot.lane.b32.xlu1 %v4425_v47, %s4607_s26 }
0x1b69   :  { %v5032_v23 = vpop.permute.xlu0 %188 }
0x1b6a   :  { %v191_v53 = vmul.f32 %v5032_v23, %v4727_v22  ;;  %v197_v24 = vmul.f32 %v5032_v23, %v4725_v21 }
0x1b6c   :  { %v192_v55 = vadd.f32 %v191_v53, %v186_v51  ;;  %v198_v30 = vadd.f32 %v197_v24, %v195_v27  ;;  %v1703_v24 = vld [vmem:[%s5504_s5 + $0x28] sm:$0xff] }
0x1b6e   :  { %v193_v56 = vadd.f32 %v4738_v29, %v192_v55  ;;  %v4571_v29 = vld [vmem:[%s5502_s3 + $0x20] sm:$0xff] }
0x1b70   :  { %v194_v57 = vmax.f32 %v193_v56, 0.0 }
0x1b72   :  { %1282 = vst.msk [vmem:[#allocation2] sm:$0x3] %vm237_vm1, %v194_v57 }
0x1bd8   :  { %v1279_v60 = vpop.permute.xlu1 %1278 }
0x1bd9   :  { %v5038_v61 = vmul.f32 %v4423_v40, %v1279_v60 }
0x1bdb   :  { %1284 = vrot.lane.b32.xlu1 %v5038_v61, %s4609_s28 }
0x1c4d   :  { %v1285_v63 = vpop.permute.xlu1 %1284 }
0x1c4e   :  { %1287 = vst.msk [vmem:[#allocation2] sm:$0x3] %vm239_vm2, %v1285_v63 }
0x1c55   :  { %v1288_v43 = vld [vmem:[#allocation2] sm:$0x3] }
0x1c56   :  { %3731 = vmatmul.mubr.msk.f32.vlgmr.msra.gmra.mrb[10].mxu0 %vm248_vm3, %v1288_v43  ;;  %v207_v43 = vmul.f32 %v5032_v23, %v4723_v20 }
0x1c57   :  { %4123 = vmatpush3.bf16.msra.mxu0 %v4687_v6  ;;  %3756 = vmatprep.mubr.msk.f32.mxu0 %vm4605_vm0, %v4604_v11 }
0x1c58   :  { %4124 = vmatprep.subr.bf16.mxu0 %v4603_v7 }
0x1c5b   :  { %4126 = vmatpush3.bf16.msra.mxu0 %v4701_v10 }
0x1c5c   :  { %3754 = vmatprep.subr.mxu0 %v4604_v11 }
0x1c5f   :  { %3755 = vmatpush3.msra.mxu0 %v4571_v29 }
0x1c60   :  { %4133 = vmatprep.subr.bf16.mxu0 %v4603_v7 }
0x1d29   :  { %v1358_v52 = vpop.f32.mrb[10].mxu0 }
0x1d2a   :  { %v1359_v1 = vadd.f32 %v4756_v34, %v1358_v52  ;;  %v3732_v4 = vpop.f32.mrb[11].mxu0 }
0x1d2c   :  { %4426 = vtanh.f32 %v1359_v1  ;;  %v3337_v8 = vmul.f32 -1.442695, %v1359_v1 }
0x1d2e   :  { %4428 = vpow2.f32 %v3337_v8 }
0x1d36   :  { %v4427_v5 = vpop.eup %4426 }
0x1d37   :  { %1371 = vrot.lane.b32.xlu1 %v4427_v5, %s4607_s26 }
0x1d38   :  { %v4429_v9 = vpop.eup %4428 }
0x1d39   :  { %v1365_v13 = vadd.f32 1.0, %v4429_v9 }
0x1d3b   :  { %4430 = vrcp.f32 %v1365_v13  ;;  %v1698_v13 = vld [vmem:[%s5504_s5] sm:$0xff] }
0x1d45   :  { %v4431_v15 = vpop.eup %4430 }
0x1d46   :  { %v1369_v34 = vmul.f32 %v4431_v15, %v1275_v46 }
0x1da9   :  { %v1372_v16 = vpop.permute.xlu1 %1371 }
0x1daa   :  { %v1374_v17 = vmul.f32 %v4431_v15, %v1372_v16 }
0x1dac   :  { %1376 = vrot.lane.b32.xlu0 %v1374_v17, %s4608_s27  ;;  %v1700_v17 = vld [vmem:[%s5504_s5 + $0x10] sm:$0xff] }
0x1db0   :  { %200 = vperm.xlu0 %4343, %v5024_v28  }
0x1db4   :  { %4344 = vset.pattern.permute.xlu0 %v4620_v45 }
0x1e1e   :  { %v1377_v0 = vpop.permute.xlu0 %1376 }
0x1e1f   :  { %v1379_v18 = vadd.f32 %v1377_v0, %v1369_v34  ;;  %v1701_v34 = vld [vmem:[%s5504_s5 + $0x18] sm:$0xff] }
0x1e21   :  { %4432 = vtanh.f32 %v1379_v18 }
0x1e2b   :  { %v4433_v19 = vpop.eup %4432 }
0x1e2c   :  { %1382 = vrot.lane.b32.xlu1 %v4433_v19, %s4607_s26  ;;  %v1702_v19 = vld [vmem:[%s5504_s5 + $0x20] sm:$0xff] }
0x1e2d   :  { %v5148_v27 = vpack.c.bf16 %v1703_v24, %v1702_v19 }
0x1e2f   :  { %v5063_v2 = vpop.permute.xlu0 %200 }
0x1e30   :  { %v203_v31 = vmul.f32 %v5063_v2, %v4727_v22  ;;  %v209_v63 = vmul.f32 %v5063_v2, %v4725_v21 }
0x1e32   :  { %v204_v32 = vadd.f32 %v203_v31, %v198_v30  ;;  %v210_v52 = vadd.f32 %v209_v63, %v207_v43  ;;  %v1704_v30 = vld [vmem:[%s5504_s5 + $0x30] sm:$0xff]  ;;  %v1705_v31 = vld [vmem:[%s5504_s5 + $0x38] sm:$0xff] }
0x1e34   :  { %v205_v36 = vadd.f32 %v5070_v35, %v204_v32  ;;  %v5158_v32 = vpack.c.bf16 %v1705_v31, %v1704_v30 }
0x1e36   :  { %v206_v38 = vmax.f32 %v205_v36, 0.0 }
0x1e38   :  { %1386 = vst.msk [vmem:[#allocation2] sm:$0x3] %vm237_vm1, %v206_v38 }
0x1e9e   :  { %v1383_v25 = vpop.permute.xlu1 %1382 }
0x1e9f   :  { %v5074_v39 = vmul.f32 %v4431_v15, %v1383_v25  ;;  %v1699_v15 = vld [vmem:[%s5504_s5 + $0x8] sm:$0xff] }
0x1ea1   :  { %1388 = vrot.lane.b32.xlu1 %v5074_v39, %s4609_s28 }
0x1f13   :  { %v1389_v58 = vpop.permute.xlu1 %1388 }
0x1f14   :  { %1391 = vst.msk [vmem:[#allocation2] sm:$0x3] %vm239_vm2, %v1389_v58 }
0x1f1b   :  { %v1392_v40 = vld [vmem:[#allocation2] sm:$0x3] }
0x1f1c   :  { %3744 = vmatmul.mubr.msk.f32.vlgmr.msra.gmra.mrb[10].mxu1 %vm248_vm3, %v1392_v40 }
0x1f1d   :  { %4129 = vmatpush3.bf16.msra.mxu1 %v4687_v6  ;;  %3769 = vmatprep.mubr.msk.f32.mxu1 %vm4605_vm0, %v4604_v11 }
0x1f1e   :  { %4130 = vmatprep.subr.bf16.mxu1 %v4603_v7 }
0x1f21   :  { %4132 = vmatpush3.bf16.msra.mxu1 %v4701_v10 }
0x1f22   :  { %3767 = vmatprep.subr.mxu1 %v4604_v11 }
0x1f25   :  { %3768 = vmatpush3.msra.mxu1 %v4571_v29 }
0x1f26   :  { %4145 = vmatprep.subr.bf16.mxu1 %v4603_v7 }
0x1fef   :  { %v1462_v41 = vpop.f32.mrb[10].mxu1 }
0x1ff0   :  { %v1463_v6 = vadd.f32 %v5090_v12, %v1462_v41  ;;  %v3745_v44 = vpop.f32.mrb[11].mxu1  ;;  %v5179_v41 = vld [vmem:[%s5505_s6] ss:$0 sm:$0xff] }
0x1ff2   :  { %4434 = vtanh.f32 %v1463_v6  ;;  %v3339_v10 = vmul.f32 -1.442695, %v1463_v6 }
0x1ff4   :  { %4436 = vpow2.f32 %v3339_v10 }
0x1ffc   :  { %v4435_v46 = vpop.eup %4434 }
0x1ffd   :  { %1475 = vrot.lane.b32.xlu1 %v4435_v46, %s4607_s26 }
0x1ffe   :  { %v4437_v47 = vpop.eup %4436 }
0x1fff   :  { %v1469_v48 = vadd.f32 1.0, %v4437_v47 }
0x2001   :  { %4438 = vrcp.f32 %v1469_v48 }
0x200b   :  { %v4439_v50 = vpop.eup %4438 }
0x200c   :  { %v1473_v55 = vmul.f32 %v4439_v50, %v1379_v18  ;;  %v5136_v18 = vpack.c.bf16 %v1701_v34, %v1700_v17 }
0x206f   :  { %v1476_v51 = vpop.permute.xlu1 %1475 }
0x2070   :  { %v1478_v53 = vmul.f32 %v4439_v50, %v1476_v51 }
0x2072   :  { %1480 = vrot.lane.b32.xlu0 %v1478_v53, %s4608_s27 }
0x2076   :  { %212 = vperm.xlu0 %4344, %v5024_v28  }
0x20e4   :  { %v1481_v56 = vpop.permute.xlu0 %1480 }
0x20e5   :  { %v5096_v57 = vadd.f32 %v1481_v56, %v1473_v55 }
0x20e7   :  { %4440 = vtanh.f32 %v5096_v57 }
0x20f1   :  { %v4441_v60 = vpop.eup %4440 }
0x20f2   :  { %1486 = vrot.lane.b32.xlu1 %v4441_v60, %s4607_s26  ;;  %v4621_v60 = vmov 15  }
0x20f3   :  { %4345 = vset.pattern.permute.xlu0 %v4621_v60 }
0x20f5   :  { %v5104_v29 = vpop.permute.xlu0 %212 }
0x20f6   :  { %v215_v1 = vmul.f32 %v5104_v29, %v4727_v22  ;;  %v221_v17 = vmul.f32 %v5104_v29, %v4725_v21 }
0x20f8   :  { %v216_v4 = vadd.f32 %v215_v1, %v210_v52 }
0x20fa   :  { %v217_v54 = vadd.f32 %v5070_v35, %v216_v4 }
0x20fc   :  { %v218_v5 = vmax.f32 %v217_v54, 0.0 }
0x20fe   :  { %1490 = vst.msk [vmem:[#allocation2] sm:$0x3] %vm237_vm1, %v218_v5 }
0x2164   :  { %v1487_v8 = vpop.permute.xlu1 %1486 }
0x2165   :  { %v5110_v9 = vmul.f32 %v4439_v50, %v1487_v8 }
0x2167   :  { %1492 = vrot.lane.b32.xlu1 %v5110_v9, %s4609_s28 }
0x216b   :  { %1707 = vrot.lane.b32.xlu1 %v4772_v59, %s4608_s27  ;;  %v5126_v59 = vpack.c.bf16 %v1699_v15, %v1698_v13 }
0x21d9   :  { %v1493_v23 = vpop.permute.xlu1 %1492 }
0x21da   :  { %1495 = vst.msk [vmem:[#allocation2] sm:$0x3] %vm239_vm2, %v1493_v23 }
0x21dd   :  { %v1708_v16 = vpop.permute.xlu1 %1707 }
0x21de   :  { %1711 = vst.msk [vmem:[#allocation3] sm:$0x3] %vm1710_vm4, %v1708_v16 }
0x21df   :  { %1713 = vst.msk [vmem:[#allocation3] sm:$0x3] %vm1712_vm5, %v4604_v11 }
0x21e1   :  { %v1496_v0 = vld [vmem:[#allocation2] sm:$0x3] }
0x21e2   :  { %3757 = vmatmul.mubr.msk.f32.vlgmr.msra.gmra.mrb[12].mxu0 %vm248_vm3, %v1496_v0 }
0x21e3   :  { %4135 = vmatpush3.bf16.msra.mxu0 %v5126_v59  ;;  %3788 = vmatprep.mubr.msk.f32.mxu0 %vm4605_vm0, %v4604_v11 }
0x21e4   :  { %4136 = vmatprep.subr.bf16.mxu0 %v4603_v7 }
0x21e6   :  { %v1714_v36 = vld [vmem:[#allocation3] sm:$0x3] }
0x21e7   :  { %4138 = vmatpush3.bf16.msra.mxu0 %v5136_v18 }
0x21e8   :  { %4139 = vmatprep.subr.bf16.mxu0 %v4603_v7 }
0x21eb   :  { %4141 = vmatpush3.bf16.msra.mxu0 %v5148_v27 }
0x21ec   :  { %4142 = vmatprep.subr.bf16.mxu0 %v4603_v7 }
0x21ef   :  { %4144 = vmatpush3.bf16.msra.mxu0 %v5158_v32 }
0x21f0   :  { %4157 = vmatprep.subr.bf16.mxu0 %v4603_v7 }
0x21f2   :  { %3789 = vmatmul.mubr.msk.f32.vlgmr.msra.gmra.mrb[14].mxu0 %vm1721_vm6, %v1714_v36 }
0x21f3   :  { %4159 = vmatpush3.bf16.msra.mxu0 %v5126_v59  ;;  %3826 = vmatprep.mubr.msk.f32.mxu0 %vm4605_vm0, %v4604_v11 }
0x21f4   :  { %4160 = vmatprep.subr.bf16.mxu0 %v4603_v7 }
0x21f7   :  { %4162 = vmatpush3.bf16.msra.mxu0 %v5136_v18 }
0x21f8   :  { %4163 = vmatprep.subr.bf16.mxu0 %v4603_v7 }
0x21fb   :  { %4165 = vmatpush3.bf16.msra.mxu0 %v5148_v27 }
0x21fc   :  { %4166 = vmatprep.subr.bf16.mxu0 %v4603_v7 }
0x21ff   :  { %4168 = vmatpush3.bf16.msra.mxu0 %v5158_v32 }
0x2200   :  { %4181 = vmatprep.subr.bf16.mxu0 %v4603_v7 }
0x22b5   :  { %v1566_v38 = vpop.f32.mrb[12].mxu0 }
0x22b6   :  { %v1567_v25 = vadd.f32 %v5090_v12, %v1566_v38  ;;  %v3758_v58 = vpop.f32.mrb[13].mxu0 }
0x22b8   :  { %4442 = vtanh.f32 %v1567_v25  ;;  %v3341_v10 = vmul.f32 -1.442695, %v1567_v25 }
0x22c2   :  { %v4443_v40 = vpop.eup %4442 }
0x22c3   :  { %1579 = vrot.lane.b32.xlu0 %v4443_v40, %s4607_s26 }
0x22c5   :  { %v1791_v6 = vpop.f32.mrb[14].mxu0 }
0x22c6   :  { %v1792_v44 = vadd.f32 %v5179_v41, %v1791_v6  ;;  %v3790_v45 = vpop.f32.mrb[15].mxu0 }
0x22c8   :  { %4444 = vtanh.f32 %v1792_v44  ;;  %v3346_v47 = vmul.f32 -1.442695, %v1792_v44 }
0x22c9   :  { %4446 = vpow2.f32 %v3341_v10 }
0x22ca   :  { %4448 = vpow2.f32 %v3346_v47 }
0x22d2   :  { %v4445_v46 = vpop.eup %4444 }
0x22d3   :  { %1804 = vrot.lane.b32.xlu1 %v4445_v46, %s4607_s26  ;;  %v4447_v12 = vpop.eup %4446 }
0x22d4   :  { %v1573_v48 = vadd.f32 1.0, %v4447_v12  ;;  %v4449_v50 = vpop.eup %4448 }
0x22d5   :  { %v1798_v56 = vadd.f32 1.0, %v4449_v50 }
0x22d6   :  { %4450 = vrcp.f32 %v1573_v48 }
0x22d7   :  { %4452 = vrcp.f32 %v1798_v56 }
0x22e0   :  { %v4451_v51 = vpop.eup %4450 }
0x22e1   :  { %v4453_v63 = vpop.eup %4452  ;;  %v1577_v1 = vmul.f32 %v4451_v51, %v5096_v57 }
0x22e2   :  { %v1802_v8 = vmul.f32 0.0, %v4453_v63 }
0x2335   :  { %v1580_v53 = vpop.permute.xlu0 %1579 }
0x2336   :  { %v1582_v55 = vmul.f32 %v4451_v51, %v1580_v53 }
0x2338   :  { %1584 = vrot.lane.b32.xlu0 %v1582_v55, %s4608_s27 }
0x2345   :  { %v1805_v43 = vpop.permute.xlu1 %1804 }
0x2346   :  { %v1807_v52 = vmul.f32 %v4453_v63, %v1805_v43 }
0x2348   :  { %1809 = vrot.lane.b32.xlu1 %v1807_v52, %s4608_s27 }
0x23aa   :  { %v1585_v4 = vpop.permute.xlu0 %1584 }
0x23ab   :  { %v5186_v54 = vadd.f32 %v1585_v4, %v1577_v1 }
0x23ad   :  { %4454 = vtanh.f32 %v5186_v54 }
0x23b7   :  { %v4455_v5 = vpop.eup %4454 }
0x23b8   :  { %1590 = vrot.lane.b32.xlu0 %v4455_v5, %s4607_s26 }
0x23ba   :  { %v1810_v23 = vpop.permute.xlu1 %1809 }
0x23bb   :  { %v5190_v13 = vadd.f32 %v1810_v23, %v1802_v8 }
0x23bc   :  { %224 = vperm.xlu0 %4345, %v5024_v28   ;;  %v219_v28 = vmul.f32 %v5063_v2, %v4723_v20 }
0x23bd   :  { %4456 = vtanh.f32 %v5190_v13 }
0x23be   :  { %v222_v24 = vadd.f32 %v221_v17, %v219_v28 }
0x23c7   :  { %v4457_v15 = vpop.eup %4456 }
0x23c8   :  { %1815 = vrot.lane.b32.xlu1 %v4457_v15, %s4607_s26 }
0x242a   :  { %v1591_v57 = vpop.permute.xlu0 %1590 }
0x242b   :  { %v5195_v16 = vmul.f32 %v4451_v51, %v1591_v57 }
0x242d   :  { %1596 = vrot.lane.b32.xlu1 %v5195_v16, %s4609_s28 }
0x2431   :  { %1819 = vrot.lane.b32.xlu1 %v4801_v33, %s4608_s27 }
0x243a   :  { %v1816_v34 = vpop.permute.xlu1 %1815 }
0x243b   :  { %v1818_v0 = vmul.f32 %v4453_v63, %v1816_v34  ;;  %v225_v19 = vpop.permute.xlu0 %224 }
0x243c   :  { %v227_v30 = vmul.f32 %v225_v19, %v4727_v22 }
0x243d   :  { %1824 = vrot.lane.b32.xlu0 %v1818_v0, %s4607_s26 }
0x243e   :  { %v228_v31 = vadd.f32 %v227_v30, %v222_v24 }
0x2440   :  { %v229_v36 = vadd.f32 %v5070_v35, %v228_v31 }
0x2442   :  { %v230_v38 = vmax.f32 %v229_v36, 0.0 }
0x2444   :  { %1594 = vst.msk [vmem:[#allocation2] sm:$0x3] %vm237_vm1, %v230_v38 }
0x249f   :  { %v1597_v33 = vpop.permute.xlu1 %1596 }
0x24a0   :  { %1599 = vst.msk [vmem:[#allocation2] sm:$0x3] %vm239_vm2, %v1597_v33 }
0x24a3   :  { %v1820_v21 = vpop.permute.xlu1 %1819 }
0x24a4   :  { %1822 = vst.msk [vmem:[#allocation3] sm:$0x3] %vm1710_vm4, %v1820_v21 }
0x24a7   :  { %v1600_v20 = vld [vmem:[#allocation2] sm:$0x3] }
0x24a8   :  { %3770 = vmatmul.mubr.msk.f32.vlgmr.msra.gmra.mrb[12].mxu1 %vm248_vm3, %v1600_v20 }
0x24a9   :  { %4147 = vmatpush3.bf16.msra.mxu1 %v5126_v59  ;;  %3807 = vmatprep.mubr.msk.f32.mxu1 %vm4605_vm0, %v4604_v11 }
0x24aa   :  { %4148 = vmatprep.subr.bf16.mxu1 %v4603_v7 }
0x24ad   :  { %4150 = vmatpush3.bf16.msra.mxu1 %v5136_v18 }
0x24ae   :  { %4151 = vmatprep.subr.bf16.mxu1 %v4603_v7 }
0x24af   :  { %v1825_v22 = vpop.permute.xlu0 %1824 }
0x24b0   :  { %1827 = vst.msk [vmem:[#allocation3] sm:$0x3] %vm1712_vm5, %v1825_v22 }
0x24b1   :  { %4153 = vmatpush3.bf16.msra.mxu1 %v5148_v27 }
0x24b2   :  { %4154 = vmatprep.subr.bf16.mxu1 %v4603_v7 }
0x24b5   :  { %4156 = vmatpush3.bf16.msra.mxu1 %v5158_v32 }
0x24b6   :  { %4169 = vmatprep.subr.bf16.mxu1 %v4603_v7 }
0x24b7   :  { %v1828_v2 = vld [vmem:[#allocation3] sm:$0x3] }
0x24b8   :  { %3808 = vmatmul.mubr.msk.f32.vlgmr.msra.gmra.mrb[14].mxu1 %vm1721_vm6, %v1828_v2 }
0x24b9   :  { %4171 = vmatpush3.bf16.msra.mxu1 %v5126_v59  ;;  %3845 = vmatprep.mubr.msk.f32.mxu1 %vm4605_vm0, %v4604_v11 }
0x24ba   :  { %4172 = vmatprep.subr.bf16.mxu1 %v4603_v7 }
0x24bd   :  { %4174 = vmatpush3.bf16.msra.mxu1 %v5136_v18 }
0x24be   :  { %4175 = vmatprep.subr.bf16.mxu1 %v4603_v7 }
0x24c1   :  { %4177 = vmatpush3.bf16.msra.mxu1 %v5148_v27 }
0x24c2   :  { %4178 = vmatprep.subr.bf16.mxu1 %v4603_v7 }
0x24c5   :  { %4180 = vmatpush3.bf16.msra.mxu1 %v5158_v32 }
0x24c6   :  { %4193 = vmatprep.subr.bf16.mxu1 %v4603_v7 }
0x257b   :  { %v5234_v35 = vpop.f32.mrb[12].mxu1 }
0x257c   :  { %v3771_v29 = vpop.f32.mrb[13].mxu1 }
0x258b   :  { %v1898_v25 = vpop.f32.mrb[14].mxu1 }
0x258c   :  { %v1899_v58 = vadd.f32 %v5179_v41, %v1898_v25  ;;  %v3809_v40 = vpop.f32.mrb[15].mxu1 }
0x258e   :  { %4458 = vtanh.f32 %v1899_v58  ;;  %v3348_v44 = vmul.f32 -1.442695, %v1899_v58 }
0x2590   :  { %4460 = vpow2.f32 %v3348_v44 }
0x2598   :  { %v4459_v6 = vpop.eup %4458 }
0x2599   :  { %1911 = vrot.lane.b32.xlu1 %v4459_v6, %s4607_s26 }
0x259a   :  { %v4461_v45 = vpop.eup %4460 }
0x259b   :  { %v1905_v46 = vadd.f32 1.0, %v4461_v45 }
0x259d   :  { %4462 = vrcp.f32 %v1905_v46 }
0x25a7   :  { %v4463_v10 = vpop.eup %4462 }
0x25a8   :  { %v1909_v48 = vmul.f32 %v4463_v10, %v5190_v13 }
0x260b   :  { %v1912_v12 = vpop.permute.xlu1 %1911 }
0x260c   :  { %v1914_v47 = vmul.f32 %v4463_v10, %v1912_v12 }
0x260e   :  { %1916 = vrot.lane.b32.xlu0 %v1914_v47, %s4608_s27 }
0x2612   :  { %1926 = vrot.lane.b32.xlu0 %v4830_v62, %s4608_s27 }
0x2680   :  { %v1917_v50 = vpop.permute.xlu0 %1916 }
0x2681   :  { %v1919_v51 = vadd.f32 %v1917_v50, %v1909_v48 }
0x2683   :  { %4464 = vtanh.f32 %v1919_v51 }
0x2684   :  { %v1927_v53 = vpop.permute.xlu0 %1926 }
0x2685   :  { %1929 = vst.msk [vmem:[#allocation3] sm:$0x3] %vm1710_vm4, %v1927_v53 }
0x268d   :  { %v4465_v55 = vpop.eup %4464 }
0x268e   :  { %1922 = vrot.lane.b32.xlu1 %v4465_v55, %s4607_s26 }
0x2700   :  { %v1923_v56 = vpop.permute.xlu1 %1922 }
0x2701   :  { %v1925_v60 = vmul.f32 %v4463_v10, %v1923_v56 }
0x2703   :  { %1931 = vrot.lane.b32.xlu1 %v1925_v60, %s4607_s26 }
0x2775   :  { %v1932_v63 = vpop.permute.xlu1 %1931 }
0x2776   :  { %1934 = vst.msk [vmem:[#allocation3] sm:$0x3] %vm1712_vm5, %v1932_v63 }
0x277d   :  { %v1935_v43 = vld [vmem:[#allocation3] sm:$0x3] }
0x277e   :  { %3827 = vmatmul.mubr.msk.f32.vlgmr.msra.gmra.mrb[16].mxu0 %vm1721_vm6, %v1935_v43 }
0x277f   :  { %4183 = vmatpush3.bf16.msra.mxu0 %v5126_v59  ;;  %3864 = vmatprep.mubr.msk.f32.mxu0 %vm4605_vm0, %v4604_v11 }
0x2780   :  { %4184 = vmatprep.subr.bf16.mxu0 %v4603_v7 }
0x2783   :  { %4186 = vmatpush3.bf16.msra.mxu0 %v5136_v18 }
0x2784   :  { %4187 = vmatprep.subr.bf16.mxu0 %v4603_v7 }
0x2787   :  { %4189 = vmatpush3.bf16.msra.mxu0 %v5148_v27 }
0x2788   :  { %4190 = vmatprep.subr.bf16.mxu0 %v4603_v7 }
0x278b   :  { %4192 = vmatpush3.bf16.msra.mxu0 %v5158_v32 }
0x278c   :  { %4205 = vmatprep.subr.bf16.mxu0 %v4603_v7 }
0x2851   :  { %v2005_v62 = vpop.f32.mrb[16].mxu0 }
0x2852   :  { %v2006_v52 = vadd.f32 %v5179_v41, %v2005_v62  ;;  %v3828_v1 = vpop.f32.mrb[17].mxu0 }
0x2854   :  { %4466 = vtanh.f32 %v2006_v52  ;;  %v3350_v5 = vmul.f32 -1.442695, %v2006_v52 }
0x2856   :  { %4468 = vpow2.f32 %v3350_v5 }
0x285e   :  { %v4467_v4 = vpop.eup %4466 }
0x285f   :  { %2018 = vrot.lane.b32.xlu0 %v4467_v4, %s4607_s26 }
0x2860   :  { %v4469_v8 = vpop.eup %4468 }
0x2861   :  { %v2012_v23 = vadd.f32 1.0, %v4469_v8 }
0x2863   :  { %4470 = vrcp.f32 %v2012_v23 }
0x286d   :  { %v4471_v13 = vpop.eup %4470 }
0x286e   :  { %v2016_v17 = vmul.f32 %v4471_v13, %v1919_v51 }
0x28d1   :  { %v2019_v15 = vpop.permute.xlu0 %2018 }
0x28d2   :  { %v2021_v57 = vmul.f32 %v4471_v13, %v2019_v15 }
0x28d4   :  { %2023 = vrot.lane.b32.xlu1 %v2021_v57, %s4608_s27 }
0x28d8   :  { %2033 = vrot.lane.b32.xlu1 %v4859_v37, %s4608_s27 }
0x2946   :  { %v2024_v28 = vpop.permute.xlu1 %2023 }
0x2947   :  { %v2026_v34 = vadd.f32 %v2024_v28, %v2016_v17 }
0x2949   :  { %4472 = vtanh.f32 %v2026_v34 }
0x294a   :  { %v2034_v0 = vpop.permute.xlu1 %2033 }
0x294b   :  { %2036 = vst.msk [vmem:[#allocation3] sm:$0x3] %vm1710_vm4, %v2034_v0 }
0x2953   :  { %v4473_v19 = vpop.eup %4472 }
0x2954   :  { %2029 = vrot.lane.b32.xlu0 %v4473_v19, %s4607_s26 }
0x29c6   :  { %v2030_v24 = vpop.permute.xlu0 %2029 }
0x29c7   :  { %v2032_v30 = vmul.f32 %v4471_v13, %v2030_v24 }
0x29c9   :  { %2038 = vrot.lane.b32.xlu0 %v2032_v30, %s4607_s26 }
0x2a3b   :  { %v2039_v31 = vpop.permute.xlu0 %2038 }
0x2a3c   :  { %2041 = vst.msk [vmem:[#allocation3] sm:$0x3] %vm1712_vm5, %v2039_v31 }
0x2a43   :  { %v2042_v36 = vld [vmem:[#allocation3] sm:$0x3] }
0x2a44   :  { %3846 = vmatmul.mubr.msk.f32.vlgmr.msra.gmra.mrb[16].mxu1 %vm1721_vm6, %v2042_v36 }
0x2a45   :  { %4195 = vmatpush3.bf16.msra.mxu1 %v5126_v59  ;;  %3883 = vmatprep.mubr.msk.f32.mxu1 %vm4605_vm0, %v4604_v11 }
0x2a46   :  { %4196 = vmatprep.subr.bf16.mxu1 %v4603_v7 }
0x2a49   :  { %4198 = vmatpush3.bf16.msra.mxu1 %v5136_v18 }
0x2a4a   :  { %4199 = vmatprep.subr.bf16.mxu1 %v4603_v7 }
0x2a4d   :  { %4201 = vmatpush3.bf16.msra.mxu1 %v5148_v27 }
0x2a4e   :  { %4202 = vmatprep.subr.bf16.mxu1 %v4603_v7 }
0x2a51   :  { %4204 = vmatpush3.bf16.msra.mxu1 %v5158_v32 }
0x2a52   :  { %4217 = vmatprep.subr.bf16.mxu1 %v4603_v7 }
0x2b17   :  { %v2112_v37 = vpop.f32.mrb[16].mxu1 }
0x2b18   :  { %v2113_v38 = vadd.f32 %v5179_v41, %v2112_v37  ;;  %v3847_v33 = vpop.f32.mrb[17].mxu1 }
0x2b1a   :  { %4474 = vtanh.f32 %v2113_v38  ;;  %v3352_v20 = vmul.f32 -1.442695, %v2113_v38 }
0x2b1c   :  { %4476 = vpow2.f32 %v3352_v20 }
0x2b24   :  { %v4475_v21 = vpop.eup %4474 }
0x2b25   :  { %2125 = vrot.lane.b32.xlu1 %v4475_v21, %s4607_s26 }
0x2b26   :  { %v4477_v22 = vpop.eup %4476 }
0x2b27   :  { %v2119_v2 = vadd.f32 1.0, %v4477_v22 }
0x2b29   :  { %4478 = vrcp.f32 %v2119_v2 }
0x2b33   :  { %v4479_v29 = vpop.eup %4478 }
0x2b34   :  { %v2123_v40 = vmul.f32 %v4479_v29, %v2026_v34 }
0x2b97   :  { %v2126_v25 = vpop.permute.xlu1 %2125 }
0x2b98   :  { %v2128_v58 = vmul.f32 %v4479_v29, %v2126_v25 }
0x2b9a   :  { %2130 = vrot.lane.b32.xlu0 %v2128_v58, %s4608_s27 }
0x2b9e   :  { %2140 = vrot.lane.b32.xlu0 %v4888_v3, %s4608_s27 }
0x2c0c   :  { %v2131_v6 = vpop.permute.xlu0 %2130 }
0x2c0d   :  { %v2133_v44 = vadd.f32 %v2131_v6, %v2123_v40 }
0x2c0f   :  { %4480 = vtanh.f32 %v2133_v44 }
0x2c10   :  { %v2141_v45 = vpop.permute.xlu0 %2140 }
0x2c11   :  { %2143 = vst.msk [vmem:[#allocation3] sm:$0x3] %vm1710_vm4, %v2141_v45 }
0x2c19   :  { %v4481_v46 = vpop.eup %4480 }
0x2c1a   :  { %2136 = vrot.lane.b32.xlu1 %v4481_v46, %s4607_s26 }
0x2c8c   :  { %v2137_v10 = vpop.permute.xlu1 %2136 }
0x2c8d   :  { %v2139_v12 = vmul.f32 %v4479_v29, %v2137_v10 }
0x2c8f   :  { %2145 = vrot.lane.b32.xlu1 %v2139_v12, %s4607_s26 }
0x2d01   :  { %v2146_v47 = vpop.permute.xlu1 %2145 }
0x2d02   :  { %2148 = vst.msk [vmem:[#allocation3] sm:$0x3] %vm1712_vm5, %v2146_v47 }
0x2d09   :  { %v2149_v48 = vld [vmem:[#allocation3] sm:$0x3] }
0x2d0a   :  { %3865 = vmatmul.mubr.msk.f32.vlgmr.msra.gmra.mrb[18].mxu0 %vm1721_vm6, %v2149_v48 }
0x2d0b   :  { %4207 = vmatpush3.bf16.msra.mxu0 %v5126_v59  ;;  %3902 = vmatprep.mubr.msk.f32.mxu0 %vm4605_vm0, %v4604_v11 }
0x2d0c   :  { %4208 = vmatprep.subr.bf16.mxu0 %v4603_v7 }
0x2d0f   :  { %4210 = vmatpush3.bf16.msra.mxu0 %v5136_v18 }
0x2d10   :  { %4211 = vmatprep.subr.bf16.mxu0 %v4603_v7 }
0x2d13   :  { %4213 = vmatpush3.bf16.msra.mxu0 %v5148_v27 }
0x2d14   :  { %4214 = vmatprep.subr.bf16.mxu0 %v4603_v7 }
0x2d17   :  { %4216 = vmatpush3.bf16.msra.mxu0 %v5158_v32 }
0x2d18   :  { %4229 = vmatprep.subr.bf16.mxu0 %v4603_v7 }
0x2ddd   :  { %v2219_v3 = vpop.f32.mrb[18].mxu0 }
0x2dde   :  { %v2220_v50 = vadd.f32 %v5179_v41, %v2219_v3  ;;  %v3866_v51 = vpop.f32.mrb[19].mxu0 }
0x2de0   :  { %4482 = vtanh.f32 %v2220_v50  ;;  %v3354_v55 = vmul.f32 -1.442695, %v2220_v50 }
0x2de2   :  { %4484 = vpow2.f32 %v3354_v55 }
0x2dea   :  { %v4483_v53 = vpop.eup %4482 }
0x2deb   :  { %2232 = vrot.lane.b32.xlu0 %v4483_v53, %s4607_s26 }
0x2dec   :  { %v4485_v56 = vpop.eup %4484 }
0x2ded   :  { %v2226_v60 = vadd.f32 1.0, %v4485_v56 }
0x2def   :  { %4486 = vrcp.f32 %v2226_v60 }
0x2df9   :  { %v4487_v63 = vpop.eup %4486 }
0x2dfa   :  { %v2230_v52 = vmul.f32 %v4487_v63, %v2133_v44 }
0x2e5d   :  { %v2233_v43 = vpop.permute.xlu0 %2232 }
0x2e5e   :  { %v2235_v62 = vmul.f32 %v4487_v63, %v2233_v43 }
0x2e60   :  { %2237 = vrot.lane.b32.xlu1 %v2235_v62, %s4608_s27 }
0x2e64   :  { %2247 = vrot.lane.b32.xlu1 %v4917_v42, %s4608_s27 }
0x2ed2   :  { %v2238_v1 = vpop.permute.xlu1 %2237 }
0x2ed3   :  { %v2240_v4 = vadd.f32 %v2238_v1, %v2230_v52 }
0x2ed5   :  { %4488 = vtanh.f32 %v2240_v4 }
0x2ed6   :  { %v2248_v5 = vpop.permute.xlu1 %2247 }
0x2ed7   :  { %2250 = vst.msk [vmem:[#allocation3] sm:$0x3] %vm1710_vm4, %v2248_v5 }
0x2edf   :  { %v4489_v8 = vpop.eup %4488 }
0x2ee0   :  { %2243 = vrot.lane.b32.xlu0 %v4489_v8, %s4607_s26 }
0x2f52   :  { %v2244_v23 = vpop.permute.xlu0 %2243 }
0x2f53   :  { %v2246_v13 = vmul.f32 %v4487_v63, %v2244_v23 }
0x2f55   :  { %2252 = vrot.lane.b32.xlu0 %v2246_v13, %s4607_s26 }
0x2fc7   :  { %v2253_v15 = vpop.permute.xlu0 %2252 }
0x2fc8   :  { %2255 = vst.msk [vmem:[#allocation3] sm:$0x3] %vm1712_vm5, %v2253_v15 }
0x2fcf   :  { %v2256_v57 = vld [vmem:[#allocation3] sm:$0x3] }
0x2fd0   :  { %3884 = vmatmul.mubr.msk.f32.vlgmr.msra.gmra.mrb[18].mxu1 %vm1721_vm6, %v2256_v57 }
0x2fd1   :  { %4219 = vmatpush3.bf16.msra.mxu1 %v5126_v59  ;;  %3921 = vmatprep.mubr.msk.f32.mxu1 %vm4605_vm0, %v4604_v11 }
0x2fd2   :  { %4220 = vmatprep.subr.bf16.mxu1 %v4603_v7 }
0x2fd5   :  { %4222 = vmatpush3.bf16.msra.mxu1 %v5136_v18 }
0x2fd6   :  { %4223 = vmatprep.subr.bf16.mxu1 %v4603_v7 }
0x2fd9   :  { %4225 = vmatpush3.bf16.msra.mxu1 %v5148_v27 }
0x2fda   :  { %4226 = vmatprep.subr.bf16.mxu1 %v4603_v7 }
0x2fdd   :  { %4228 = vmatpush3.bf16.msra.mxu1 %v5158_v32 }
0x2fde   :  { %4241 = vmatprep.subr.bf16.mxu1 %v4603_v7 }
0x30a3   :  { %v2326_v42 = vpop.f32.mrb[18].mxu1 }
0x30a4   :  { %v2327_v17 = vadd.f32 %v5179_v41, %v2326_v42  ;;  %v3885_v28 = vpop.f32.mrb[19].mxu1 }
0x30a6   :  { %4490 = vtanh.f32 %v2327_v17  ;;  %v3356_v0 = vmul.f32 -1.442695, %v2327_v17 }
0x30a8   :  { %4492 = vpow2.f32 %v3356_v0 }
0x30b0   :  { %v4491_v34 = vpop.eup %4490 }
0x30b1   :  { %2339 = vrot.lane.b32.xlu1 %v4491_v34, %s4607_s26 }
0x30b2   :  { %v4493_v19 = vpop.eup %4492 }
0x30b3   :  { %v2333_v24 = vadd.f32 1.0, %v4493_v19 }
0x30b5   :  { %4494 = vrcp.f32 %v2333_v24 }
0x30bf   :  { %v4495_v30 = vpop.eup %4494 }
0x30c0   :  { %v2337_v37 = vmul.f32 %v4495_v30, %v2240_v4 }
0x3123   :  { %v2340_v31 = vpop.permute.xlu1 %2339 }
0x3124   :  { %v2342_v36 = vmul.f32 %v4495_v30, %v2340_v31 }
0x3126   :  { %2344 = vrot.lane.b32.xlu0 %v2342_v36, %s4608_s27 }
0x312a   :  { %2354 = vrot.lane.b32.xlu0 %v4946_v14, %s4608_s27 }
0x3198   :  { %v2345_v38 = vpop.permute.xlu0 %2344 }
0x3199   :  { %v2347_v33 = vadd.f32 %v2345_v38, %v2337_v37 }
0x319b   :  { %4496 = vtanh.f32 %v2347_v33 }
0x319c   :  { %v2355_v21 = vpop.permute.xlu0 %2354 }
0x319d   :  { %2357 = vst.msk [vmem:[#allocation3] sm:$0x3] %vm1710_vm4, %v2355_v21 }
0x31a5   :  { %v4497_v20 = vpop.eup %4496 }
0x31a6   :  { %2350 = vrot.lane.b32.xlu1 %v4497_v20, %s4607_s26 }
0x3218   :  { %v2351_v22 = vpop.permute.xlu1 %2350 }
0x3219   :  { %v2353_v2 = vmul.f32 %v4495_v30, %v2351_v22 }
0x321b   :  { %2359 = vrot.lane.b32.xlu1 %v2353_v2, %s4607_s26 }
0x328d   :  { %v2360_v29 = vpop.permute.xlu1 %2359 }
0x328e   :  { %2362 = vst.msk [vmem:[#allocation3] sm:$0x3] %vm1712_vm5, %v2360_v29 }
0x3295   :  { %v2363_v25 = vld [vmem:[#allocation3] sm:$0x3] }
0x3296   :  { %3903 = vmatmul.mubr.msk.f32.vlgmr.msra.gmra.mrb[20].mxu0 %vm1721_vm6, %v2363_v25 }
0x3297   :  { %4231 = vmatpush3.bf16.msra.mxu0 %v5126_v59  ;;  %3940 = vmatprep.mubr.msk.f32.mxu0 %vm4605_vm0, %v4604_v11 }
0x3298   :  { %4232 = vmatprep.subr.bf16.mxu0 %v4603_v7 }
0x329b   :  { %4234 = vmatpush3.bf16.msra.mxu0 %v5136_v18 }
0x329c   :  { %4235 = vmatprep.subr.bf16.mxu0 %v4603_v7 }
0x329f   :  { %4237 = vmatpush3.bf16.msra.mxu0 %v5148_v27 }
0x32a0   :  { %4238 = vmatprep.subr.bf16.mxu0 %v4603_v7 }
0x32a3   :  { %4240 = vmatpush3.bf16.msra.mxu0 %v5158_v32 }
0x32a4   :  { %4253 = vmatprep.subr.bf16.mxu0 %v4603_v7 }
0x3369   :  { %v2433_v14 = vpop.f32.mrb[20].mxu0 }
0x336a   :  { %v2434_v58 = vadd.f32 %v5179_v41, %v2433_v14  ;;  %v3904_v40 = vpop.f32.mrb[21].mxu0 }
0x336c   :  { %4498 = vtanh.f32 %v2434_v58  ;;  %v3358_v44 = vmul.f32 -1.442695, %v2434_v58 }
0x336e   :  { %4500 = vpow2.f32 %v3358_v44 }
0x3376   :  { %v4499_v6 = vpop.eup %4498 }
0x3377   :  { %2446 = vrot.lane.b32.xlu0 %v4499_v6, %s4607_s26 }
0x3378   :  { %v4501_v45 = vpop.eup %4500 }
0x3379   :  { %v2440_v46 = vadd.f32 1.0, %v4501_v45 }
0x337b   :  { %4502 = vrcp.f32 %v2440_v46 }
0x3385   :  { %v4503_v10 = vpop.eup %4502 }
0x3386   :  { %v2444_v48 = vmul.f32 %v4503_v10, %v2347_v33 }
0x33e9   :  { %v2447_v12 = vpop.permute.xlu0 %2446 }
0x33ea   :  { %v2449_v47 = vmul.f32 %v4503_v10, %v2447_v12 }
0x33ec   :  { %2451 = vrot.lane.b32.xlu1 %v2449_v47, %s4608_s27 }
0x33f0   :  { %2461 = vrot.lane.b32.xlu1 %v4975_v49, %s4608_s27 }
0x345e   :  { %v2452_v3 = vpop.permute.xlu1 %2451 }
0x345f   :  { %v2454_v50 = vadd.f32 %v2452_v3, %v2444_v48 }
0x3461   :  { %4504 = vtanh.f32 %v2454_v50 }
0x3462   :  { %v2462_v51 = vpop.permute.xlu1 %2461 }
0x3463   :  { %2464 = vst.msk [vmem:[#allocation3] sm:$0x3] %vm1710_vm4, %v2462_v51 }
0x346b   :  { %v4505_v53 = vpop.eup %4504 }
0x346c   :  { %2457 = vrot.lane.b32.xlu0 %v4505_v53, %s4607_s26 }
0x34de   :  { %v2458_v55 = vpop.permute.xlu0 %2457 }
0x34df   :  { %v2460_v56 = vmul.f32 %v4503_v10, %v2458_v55 }
0x34e1   :  { %2466 = vrot.lane.b32.xlu0 %v2460_v56, %s4607_s26 }
0x3553   :  { %v2467_v60 = vpop.permute.xlu0 %2466 }
0x3554   :  { %2469 = vst.msk [vmem:[#allocation3] sm:$0x3] %vm1712_vm5, %v2467_v60 }
0x355b   :  { %v2470_v63 = vld [vmem:[#allocation3] sm:$0x3] }
0x355c   :  { %3922 = vmatmul.mubr.msk.f32.vlgmr.msra.gmra.mrb[20].mxu1 %vm1721_vm6, %v2470_v63 }
0x355d   :  { %4243 = vmatpush3.bf16.msra.mxu1 %v5126_v59  ;;  %3959 = vmatprep.mubr.msk.f32.mxu1 %vm4605_vm0, %v4604_v11 }
0x355e   :  { %4244 = vmatprep.subr.bf16.mxu1 %v4603_v7 }
0x3561   :  { %4246 = vmatpush3.bf16.msra.mxu1 %v5136_v18 }
0x3562   :  { %4247 = vmatprep.subr.bf16.mxu1 %v4603_v7 }
0x3565   :  { %4249 = vmatpush3.bf16.msra.mxu1 %v5148_v27 }
0x3566   :  { %4250 = vmatprep.subr.bf16.mxu1 %v4603_v7 }
0x3569   :  { %4252 = vmatpush3.bf16.msra.mxu1 %v5158_v32 }
0x356a   :  { %4265 = vmatprep.subr.bf16.mxu1 %v4603_v7 }
0x362f   :  { %v2540_v49 = vpop.f32.mrb[20].mxu1 }
0x3630   :  { %v2541_v43 = vadd.f32 %v5179_v41, %v2540_v49  ;;  %v3923_v62 = vpop.f32.mrb[21].mxu1 }
0x3632   :  { %4506 = vtanh.f32 %v2541_v43  ;;  %v3360_v1 = vmul.f32 -1.442695, %v2541_v43 }
0x3634   :  { %4508 = vpow2.f32 %v3360_v1 }
0x363c   :  { %v4507_v52 = vpop.eup %4506 }
0x363d   :  { %2553 = vrot.lane.b32.xlu1 %v4507_v52, %s4607_s26 }
0x363e   :  { %v4509_v4 = vpop.eup %4508 }
0x363f   :  { %v2547_v5 = vadd.f32 1.0, %v4509_v4 }
0x3641   :  { %4510 = vrcp.f32 %v2547_v5 }
0x364b   :  { %v4511_v8 = vpop.eup %4510 }
0x364c   :  { %v2551_v15 = vmul.f32 %v4511_v8, %v2454_v50 }
0x36af   :  { %v2554_v23 = vpop.permute.xlu1 %2553 }
0x36b0   :  { %v2556_v13 = vmul.f32 %v4511_v8, %v2554_v23 }
0x36b2   :  { %2558 = vrot.lane.b32.xlu0 %v2556_v13, %s4608_s27 }
0x36b6   :  { %2568 = vrot.lane.b32.xlu0 %v5004_v26, %s4608_s27 }
0x3724   :  { %v2559_v57 = vpop.permute.xlu0 %2558 }
0x3725   :  { %v2561_v42 = vadd.f32 %v2559_v57, %v2551_v15 }
0x3727   :  { %4512 = vtanh.f32 %v2561_v42 }
0x3728   :  { %v2569_v17 = vpop.permute.xlu0 %2568 }
0x3729   :  { %2571 = vst.msk [vmem:[#allocation3] sm:$0x3] %vm1710_vm4, %v2569_v17 }
0x3731   :  { %v4513_v28 = vpop.eup %4512 }
0x3732   :  { %2564 = vrot.lane.b32.xlu1 %v4513_v28, %s4607_s26 }
0x37a4   :  { %v2565_v34 = vpop.permute.xlu1 %2564 }
0x37a5   :  { %v2567_v0 = vmul.f32 %v4511_v8, %v2565_v34 }
0x37a7   :  { %2573 = vrot.lane.b32.xlu1 %v2567_v0, %s4607_s26 }
0x3819   :  { %v2574_v19 = vpop.permute.xlu1 %2573 }
0x381a   :  { %2576 = vst.msk [vmem:[#allocation3] sm:$0x3] %vm1712_vm5, %v2574_v19 }
0x3821   :  { %v2577_v24 = vld [vmem:[#allocation3] sm:$0x3] }
0x3822   :  { %3941 = vmatmul.mubr.msk.f32.vlgmr.msra.gmra.mrb[22].mxu0 %vm1721_vm6, %v2577_v24 }
0x3823   :  { %4255 = vmatpush3.bf16.msra.mxu0 %v5126_v59  ;;  %3978 = vmatprep.mubr.msk.f32.mxu0 %vm4605_vm0, %v4604_v11 }
0x3824   :  { %4256 = vmatprep.subr.bf16.mxu0 %v4603_v7 }
0x3827   :  { %4258 = vmatpush3.bf16.msra.mxu0 %v5136_v18 }
0x3828   :  { %4259 = vmatprep.subr.bf16.mxu0 %v4603_v7 }
0x382b   :  { %4261 = vmatpush3.bf16.msra.mxu0 %v5148_v27 }
0x382c   :  { %4262 = vmatprep.subr.bf16.mxu0 %v4603_v7 }
0x382f   :  { %4264 = vmatpush3.bf16.msra.mxu0 %v5158_v32 }
0x3830   :  { %4277 = vmatprep.subr.bf16.mxu0 %v4603_v7 }
0x38f5   :  { %v2647_v26 = vpop.f32.mrb[22].mxu0 }
0x38f6   :  { %v2648_v30 = vadd.f32 %v5179_v41, %v2647_v26  ;;  %v3942_v31 = vpop.f32.mrb[23].mxu0 }
0x38f8   :  { %4514 = vtanh.f32 %v2648_v30  ;;  %v3362_v37 = vmul.f32 -1.442695, %v2648_v30 }
0x38fa   :  { %4516 = vpow2.f32 %v3362_v37 }
0x3902   :  { %v4515_v36 = vpop.eup %4514 }
0x3903   :  { %2660 = vrot.lane.b32.xlu0 %v4515_v36, %s4607_s26 }
0x3904   :  { %v4517_v38 = vpop.eup %4516 }
0x3905   :  { %v2654_v33 = vadd.f32 1.0, %v4517_v38 }
0x3907   :  { %4518 = vrcp.f32 %v2654_v33 }
0x3911   :  { %v4519_v21 = vpop.eup %4518 }
0x3912   :  { %v2658_v2 = vmul.f32 %v4519_v21, %v2561_v42 }
0x3975   :  { %v2661_v20 = vpop.permute.xlu0 %2660 }
0x3976   :  { %v2663_v22 = vmul.f32 %v4519_v21, %v2661_v20 }
0x3978   :  { %2665 = vrot.lane.b32.xlu1 %v2663_v22, %s4608_s27 }
0x397c   :  { %2675 = vrot.lane.b32.xlu1 %v5038_v61, %s4608_s27 }
0x39ea   :  { %v2666_v29 = vpop.permute.xlu1 %2665 }
0x39eb   :  { %v2668_v25 = vadd.f32 %v2666_v29, %v2658_v2 }
0x39ed   :  { %4520 = vtanh.f32 %v2668_v25 }
0x39ee   :  { %v2676_v14 = vpop.permute.xlu1 %2675 }
0x39ef   :  { %2678 = vst.msk [vmem:[#allocation3] sm:$0x3] %vm1710_vm4, %v2676_v14 }
0x39f7   :  { %v4521_v58 = vpop.eup %4520 }
0x39f8   :  { %2671 = vrot.lane.b32.xlu0 %v4521_v58, %s4607_s26 }
0x3a6a   :  { %v2672_v40 = vpop.permute.xlu0 %2671 }
0x3a6b   :  { %v2674_v6 = vmul.f32 %v4519_v21, %v2672_v40 }
0x3a6d   :  { %2680 = vrot.lane.b32.xlu0 %v2674_v6, %s4607_s26 }
0x3adf   :  { %v2681_v44 = vpop.permute.xlu0 %2680 }
0x3ae0   :  { %2683 = vst.msk [vmem:[#allocation3] sm:$0x3] %vm1712_vm5, %v2681_v44 }
0x3ae7   :  { %v2684_v45 = vld [vmem:[#allocation3] sm:$0x3] }
0x3ae8   :  { %3960 = vmatmul.mubr.msk.f32.vlgmr.msra.gmra.mrb[22].mxu1 %vm1721_vm6, %v2684_v45 }
0x3ae9   :  { %4267 = vmatpush3.bf16.msra.mxu1 %v5126_v59  ;;  %3997 = vmatprep.mubr.msk.f32.mxu1 %vm4605_vm0, %v4604_v11 }
0x3aea   :  { %4268 = vmatprep.subr.bf16.mxu1 %v4603_v7 }
0x3aed   :  { %4270 = vmatpush3.bf16.msra.mxu1 %v5136_v18 }
0x3aee   :  { %4271 = vmatprep.subr.bf16.mxu1 %v4603_v7 }
0x3af1   :  { %4273 = vmatpush3.bf16.msra.mxu1 %v5148_v27 }
0x3af2   :  { %4274 = vmatprep.subr.bf16.mxu1 %v4603_v7 }
0x3af5   :  { %4276 = vmatpush3.bf16.msra.mxu1 %v5158_v32 }
0x3af6   :  { %4289 = vmatprep.subr.bf16.mxu1 %v4603_v7 }
0x3bbb   :  { %v2754_v61 = vpop.f32.mrb[22].mxu1 }
0x3bbc   :  { %v2755_v46 = vadd.f32 %v5179_v41, %v2754_v61  ;;  %v3961_v10 = vpop.f32.mrb[23].mxu1 }
0x3bbe   :  { %4522 = vtanh.f32 %v2755_v46  ;;  %v3364_v47 = vmul.f32 -1.442695, %v2755_v46 }
0x3bc0   :  { %4524 = vpow2.f32 %v3364_v47 }
0x3bc8   :  { %v4523_v12 = vpop.eup %4522 }
0x3bc9   :  { %2767 = vrot.lane.b32.xlu1 %v4523_v12, %s4607_s26 }
0x3bca   :  { %v4525_v48 = vpop.eup %4524 }
0x3bcb   :  { %v2761_v3 = vadd.f32 1.0, %v4525_v48 }
0x3bcd   :  { %4526 = vrcp.f32 %v2761_v3 }
0x3bd7   :  { %v4527_v50 = vpop.eup %4526 }
0x3bd8   :  { %v2765_v55 = vmul.f32 %v4527_v50, %v2668_v25 }
0x3c3b   :  { %v2768_v51 = vpop.permute.xlu1 %2767 }
0x3c3c   :  { %v2770_v53 = vmul.f32 %v4527_v50, %v2768_v51 }
0x3c3e   :  { %2772 = vrot.lane.b32.xlu0 %v2770_v53, %s4608_s27 }
0x3c42   :  { %2782 = vrot.lane.b32.xlu0 %v5074_v39, %s4608_s27 }
0x3cb0   :  { %v2773_v56 = vpop.permute.xlu0 %2772 }
0x3cb1   :  { %v2775_v60 = vadd.f32 %v2773_v56, %v2765_v55 }
0x3cb3   :  { %4528 = vtanh.f32 %v2775_v60 }
0x3cb4   :  { %v2783_v63 = vpop.permute.xlu0 %2782 }
0x3cb5   :  { %2785 = vst.msk [vmem:[#allocation3] sm:$0x3] %vm1710_vm4, %v2783_v63 }
0x3cbd   :  { %v4529_v49 = vpop.eup %4528 }
0x3cbe   :  { %2778 = vrot.lane.b32.xlu1 %v4529_v49, %s4607_s26 }
0x3d30   :  { %v2779_v43 = vpop.permute.xlu1 %2778 }
0x3d31   :  { %v2781_v62 = vmul.f32 %v4527_v50, %v2779_v43 }
0x3d33   :  { %2787 = vrot.lane.b32.xlu1 %v2781_v62, %s4607_s26 }
0x3da5   :  { %v2788_v52 = vpop.permute.xlu1 %2787 }
0x3da6   :  { %2790 = vst.msk [vmem:[#allocation3] sm:$0x3] %vm1712_vm5, %v2788_v52 }
0x3dad   :  { %v2791_v1 = vld [vmem:[#allocation3] sm:$0x3] }
0x3dae   :  { %3979 = vmatmul.mubr.msk.f32.vlgmr.msra.gmra.mrb[24].mxu0 %vm1721_vm6, %v2791_v1 }
0x3daf   :  { %4279 = vmatpush3.bf16.msra.mxu0 %v5126_v59  ;;  %4016 = vmatprep.mubr.msk.f32.mxu0 %vm4605_vm0, %v4604_v11 }
0x3db0   :  { %4280 = vmatprep.subr.bf16.mxu0 %v4603_v7 }
0x3db3   :  { %4282 = vmatpush3.bf16.msra.mxu0 %v5136_v18 }
0x3db4   :  { %4283 = vmatprep.subr.bf16.mxu0 %v4603_v7 }
0x3db7   :  { %4285 = vmatpush3.bf16.msra.mxu0 %v5148_v27 }
0x3db8   :  { %4286 = vmatprep.subr.bf16.mxu0 %v4603_v7 }
0x3dbb   :  { %4288 = vmatpush3.bf16.msra.mxu0 %v5158_v32 }
0x3dbc   :  { %4301 = vmatprep.subr.bf16.mxu0 %v4603_v7 }
0x3e81   :  { %v2861_v39 = vpop.f32.mrb[24].mxu0 }
0x3e82   :  { %v2862_v4 = vadd.f32 %v5179_v41, %v2861_v39  ;;  %v3980_v5 = vpop.f32.mrb[25].mxu0 }
0x3e84   :  { %4530 = vtanh.f32 %v2862_v4  ;;  %v3366_v23 = vmul.f32 -1.442695, %v2862_v4 }
0x3e86   :  { %4532 = vpow2.f32 %v3366_v23 }
0x3e8e   :  { %v4531_v8 = vpop.eup %4530 }
0x3e8f   :  { %2874 = vrot.lane.b32.xlu0 %v4531_v8, %s4607_s26 }
0x3e90   :  { %v4533_v13 = vpop.eup %4532 }
0x3e91   :  { %v2868_v15 = vadd.f32 1.0, %v4533_v13 }
0x3e93   :  { %4534 = vrcp.f32 %v2868_v15 }
0x3e9d   :  { %v4535_v57 = vpop.eup %4534 }
0x3e9e   :  { %v2872_v28 = vmul.f32 %v4535_v57, %v2775_v60  ;;  %v4575_v60 = vld [vmem:[%s5505_s6] ss:$0 sm:$0xff] }
0x3f01   :  { %v2875_v42 = vpop.permute.xlu0 %2874 }
0x3f02   :  { %v2877_v17 = vmul.f32 %v4535_v57, %v2875_v42 }
0x3f04   :  { %2879 = vrot.lane.b32.xlu1 %v2877_v17, %s4608_s27 }
0x3f08   :  { %2889 = vrot.lane.b32.xlu1 %v5110_v9, %s4608_s27 }
0x3f76   :  { %v2880_v34 = vpop.permute.xlu1 %2879 }
0x3f77   :  { %v2882_v0 = vadd.f32 %v2880_v34, %v2872_v28 }
0x3f79   :  { %4536 = vtanh.f32 %v2882_v0 }
0x3f7a   :  { %v2890_v19 = vpop.permute.xlu1 %2889 }
0x3f7b   :  { %2892 = vst.msk [vmem:[#allocation3] sm:$0x3] %vm1710_vm4, %v2890_v19 }
0x3f83   :  { %v4537_v24 = vpop.eup %4536 }
0x3f84   :  { %2885 = vrot.lane.b32.xlu0 %v4537_v24, %s4607_s26 }
0x3ff6   :  { %v2886_v26 = vpop.permute.xlu0 %2885 }
0x3ff7   :  { %v2888_v30 = vmul.f32 %v4535_v57, %v2886_v26 }
0x3ff9   :  { %2894 = vrot.lane.b32.xlu0 %v2888_v30, %s4607_s26 }
0x406b   :  { %v2895_v31 = vpop.permute.xlu0 %2894 }
0x406c   :  { %2897 = vst.msk [vmem:[#allocation3] sm:$0x3] %vm1712_vm5, %v2895_v31 }
0x4073   :  { %v2898_v36 = vld [vmem:[#allocation3] sm:$0x3] }
0x4074   :  { %3998 = vmatmul.mubr.msk.f32.vlgmr.msra.gmra.mrb[24].mxu1 %vm1721_vm6, %v2898_v36 }
0x4075   :  { %4291 = vmatpush3.bf16.msra.mxu1 %v5126_v59  ;;  %4035 = vmatprep.mubr.msk.f32.mxu1 %vm4605_vm0, %v4604_v11 }
0x4076   :  { %4292 = vmatprep.subr.bf16.mxu1 %v4603_v7 }
0x4079   :  { %4294 = vmatpush3.bf16.msra.mxu1 %v5136_v18 }
0x407a   :  { %4295 = vmatprep.subr.bf16.mxu1 %v4603_v7 }
0x407d   :  { %4297 = vmatpush3.bf16.msra.mxu1 %v5148_v27  ;;  %v4574_v27 = vld [vmem:[%s5503_s4] ss:$0 sm:$0xff] }
0x407e   :  { %4298 = vmatprep.subr.bf16.mxu1 %v4603_v7  ;;  %v1671_v20 = vadd.f32 %v4574_v27, %v5234_v35 }
0x4080   :  { %v3343_v29 = vmul.f32 -1.442695, %v1671_v20 }
0x4081   :  { %4300 = vmatpush3.bf16.msra.mxu1 %v5158_v32 }
0x4147   :  { %v2968_v9 = vpop.f32.mrb[24].mxu1 }
0x4148   :  { %v2969_v37 = vadd.f32 %v5179_v41, %v2968_v9  ;;  %v3999_v38 = vpop.f32.mrb[25].mxu1 }
0x414a   :  { %4538 = vtanh.f32 %v2969_v37  ;;  %v3368_v33 = vmul.f32 -1.442695, %v2969_v37 }
0x414c   :  { %4540 = vpow2.f32 %v3368_v33  ;;  %v3211_v33 = vld [vmem:[%s5506_s7] sm:$0xff] }
0x4154   :  { %v4539_v59 = vpop.eup %4538 }
0x4155   :  { %2981 = vrot.lane.b32.xlu1 %v4539_v59, %s4607_s26 }
0x4156   :  { %v4541_v21 = vpop.eup %4540 }
0x4157   :  { %v2975_v18 = vadd.f32 1.0, %v4541_v21  ;;  %v3212_v21 = vld [vmem:[%s5506_s7 + $0x8] sm:$0xff] }
0x4158   :  { %v4302_v27 = vpack.c.bf16 %v3212_v21, %v3211_v33 }
0x4159   :  { %4542 = vrcp.f32 %v2975_v18  ;;  %v3213_v18 = vld [vmem:[%s5506_s7 + $0x10] sm:$0xff] }
0x415a   :  { %4544 = vtanh.f32 %v1671_v20  ;;  %v3214_v20 = vld [vmem:[%s5506_s7 + $0x18] sm:$0xff]  ;;  %s4622_s7 = smov [#allocation4]  }
0x415b   :  { %4546 = vpow2.f32 %v3343_v29  ;;  %s3306_s19 = sshll.u32 %s4622_s7, 4  ;;  %s3307_s19 = int_to_ptr.vmem [resolvable:$true] %s3306_s19 }
0x415c   :  { %p4581_p1 = scmp.lt.s32.totalorder %s3307_s19, %s3307_s19 }
0x4163   :  { %v4543_v32 = vpop.eup %4542 }
0x4164   :  { %v4545_v2 = vpop.eup %4544  ;;  %v2979_v58 = vmul.f32 %v4543_v32, %v2882_v0 }
0x4165   :  { %v4547_v25 = vpop.eup %4546 }
0x4166   :  { %v1677_v14 = vadd.f32 1.0, %v4547_v25  ;;  %v3373_v25 = vld [vmem:[%s5507_s8] ss:$0 sm:$0xff] }
0x4168   :  { %4548 = vrcp.f32 %v1677_v14 }
0x4172   :  { %v4549_v44 = vpop.eup %4548 }
0x4173   :  { %v1681_v46 = vmul.f32 %v4549_v44, %v5186_v54 }
0x41c7   :  { %v2982_v22 = vpop.permute.xlu1 %2981 }
0x41c8   :  { %v2984_v41 = vmul.f32 %v4543_v32, %v2982_v22 }
0x41ca   :  { %2986 = vrot.lane.b32.xlu0 %v2984_v41, %s4608_s27 }
0x41ce   :  { %2996 = vrot.lane.b32.xlu0 %v5195_v16, %s4608_s27 }
0x41d2   :  { %1683 = vrot.lane.b32.xlu0 %v4545_v2, %s4607_s26 }
0x423c   :  { %v2987_v40 = vpop.permute.xlu0 %2986 }
0x423d   :  { %v2989_v35 = vadd.f32 %v2987_v40, %v2979_v58 }
0x423f   :  { %4550 = vtanh.f32 %v2989_v35 }
0x4240   :  { %v2997_v6 = vpop.permute.xlu0 %2996 }
0x4241   :  { %2999 = vst.msk [vmem:[#allocation3] sm:$0x3] %vm1710_vm4, %v2997_v6 }
0x4244   :  { %v1684_v45 = vpop.permute.xlu0 %1683 }
0x4245   :  { %v1686_v61 = vmul.f32 %v4549_v44, %v1684_v45 }
0x4247   :  { %1688 = vrot.lane.b32.xlu0 %v1686_v61, %s4608_s27 }
0x4249   :  { %v4551_v16 = vpop.eup %4550 }
0x424a   :  { %2992 = vrot.lane.b32.xlu1 %v4551_v16, %s4607_s26 }
0x42b9   :  { %v1689_v10 = vpop.permute.xlu0 %1688 }
0x42ba   :  { %v1691_v12 = vadd.f32 %v1689_v10, %v1681_v46 }
0x42bc   :  { %4552 = vtanh.f32 %v1691_v12  ;;  %v2993_v47 = vpop.permute.xlu1 %2992 }
0x42bd   :  { %v2995_v48 = vmul.f32 %v4543_v32, %v2993_v47  ;;  %v4305_v32 = vpack.c.bf16 %v3214_v20, %v3213_v18 }
0x42bf   :  { %3001 = vrot.lane.b32.xlu1 %v2995_v48, %s4607_s26 }
0x42c6   :  { %v4553_v3 = vpop.eup %4552 }
0x42c7   :  { %1694 = vrot.lane.b32.xlu0 %v4553_v3, %s4607_s26 }
0x4331   :  { %v3002_v50 = vpop.permute.xlu1 %3001 }
0x4332   :  { %3004 = vst.msk [vmem:[#allocation3] sm:$0x3] %vm1712_vm5, %v3002_v50 }
0x4339   :  { %v1695_v51 = vpop.permute.xlu0 %1694  ;;  %v3005_v53 = vld [vmem:[#allocation3] sm:$0x3] }
0x433a   :  { %v1697_v55 = vmul.f32 %v4549_v44, %v1695_v51  ;;  %4017 = vmatmul.mubr.msk.f32.vlgmr.msra.gmra.mrb[26].mxu0 %vm1721_vm6, %v3005_v53 }
0x433b   :  { %4046 = vmatprep.mubr.msk.f32.mxu0 %vm4605_vm0, %v4604_v11  ;;  %4303 = vmatpush3.bf16.msra.mxu0 %v4302_v27 }
0x433c   :  { %3104 = vrot.lane.b32.xlu0 %v1697_v55, %s4608_s27  ;;  %4304 = vmatprep.subr.bf16.mxu0 %v4603_v7 }
0x433f   :  { %4306 = vmatpush3.bf16.msra.mxu0 %v4305_v32 }
0x43ae   :  { %v3105_v54 = vpop.permute.xlu0 %3104 }
0x43af   :  { %3107 = vst.msk [vmem:[#allocation3] sm:$0x3] %vm1710_vm4, %v3105_v54 }
0x440d   :  { %v3075_v56 = vpop.f32.mrb[26].mxu0 }
0x440e   :  { %v3076_v63 = vadd.f32 %v4575_v60, %v3075_v56  ;;  %v4018_v49 = vpop.f32.mrb[27].mxu0 }
0x4410   :  { %4554 = vtanh.f32 %v3076_v63  ;;  %v3370_v62 = vmul.f32 -1.442695, %v3076_v63 }
0x4412   :  { %4556 = vpow2.f32 %v3370_v62 }
0x441a   :  { %v4555_v43 = vpop.eup %4554 }
0x441b   :  { %3088 = vrot.lane.b32.xlu1 %v4555_v43, %s4607_s26 }
0x441c   :  { %v4557_v52 = vpop.eup %4556 }
0x441d   :  { %v3082_v11 = vadd.f32 1.0, %v4557_v52 }
0x441f   :  { %4558 = vrcp.f32 %v3082_v11 }
0x4429   :  { %v4559_v1 = vpop.eup %4558 }
0x442a   :  { %v3086_v5 = vmul.f32 %v4559_v1, %v2989_v35 }
0x448d   :  { %v3089_v39 = vpop.permute.xlu1 %3088 }
0x448e   :  { %v3091_v4 = vmul.f32 %v4559_v1, %v3089_v39 }
0x4490   :  { %3093 = vrot.lane.b32.xlu1 %v3091_v4, %s4608_s27 }
0x4502   :  { %v3094_v8 = vpop.permute.xlu1 %3093 }
0x4503   :  { %v3096_v23 = vadd.f32 %v3094_v8, %v3086_v5 }
0x4505   :  { %4560 = vtanh.f32 %v3096_v23 }
0x450f   :  { %v4561_v13 = vpop.eup %4560 }
0x4510   :  { %3099 = vrot.lane.b32.xlu1 %v4561_v13, %s4607_s26 }
0x4582   :  { %v3100_v15 = vpop.permute.xlu1 %3099 }
0x4583   :  { %v3102_v57 = vmul.f32 %v4559_v1, %v3100_v15 }
0x4585   :  { %3109 = vrot.lane.b32.xlu1 %v3102_v57, %s4607_s26 }
0x45f7   :  { %v3110_v42 = vpop.permute.xlu1 %3109 }
0x45f8   :  { %3112 = vst.msk [vmem:[#allocation3] sm:$0x3] %vm1712_vm5, %v3110_v42 }
0x45ff   :  { %v3113_v17 = vld [vmem:[#allocation3] sm:$0x3] }
0x4600   :  { %4036 = vmatmul.mubr.msk.f32.vlgmr.msra.gmra.mrb[26].mxu1 %vm1721_vm6, %v3113_v17 }
0x46d3   :  { %v3183_v28 = vpop.f32.mrb[26].mxu1 }
0x46d4   :  { %v3184_v34 = vadd.f32 %v4575_v60, %v3183_v28  ;;  %v4037_v0 = vpop.f32.mrb[27].mxu1 }
0x46d6   :  { %4562 = vtanh.f32 %v3184_v34  ;;  %v3372_v24 = vmul.f32 -1.442695, %v3184_v34 }
0x46d8   :  { %4564 = vpow2.f32 %v3372_v24 }
0x46e0   :  { %v4563_v19 = vpop.eup %4562 }
0x46e1   :  { %3196 = vrot.lane.b32.xlu0 %v4563_v19, %s4607_s26 }
0x46e2   :  { %v4565_v26 = vpop.eup %4564 }
0x46e3   :  { %v3190_v30 = vadd.f32 1.0, %v4565_v26 }
0x46e5   :  { %4566 = vrcp.f32 %v3190_v30 }
0x46ef   :  { %v4567_v31 = vpop.eup %4566 }
0x46f0   :  { %v3194_v37 = vmul.f32 %v4567_v31, %v3096_v23 }
0x4753   :  { %v3197_v36 = vpop.permute.xlu0 %3196 }
0x4754   :  { %v3199_v9 = vmul.f32 %v4567_v31, %v3197_v36 }
0x4756   :  { %3201 = vrot.lane.b32.xlu1 %v3199_v9, %s4608_s27 }
0x47c8   :  { %v3202_v38 = vpop.permute.xlu1 %3201 }
0x47c9   :  { %v3204_v59 = vadd.f32 %v3202_v38, %v3194_v37 }
0x47cb   :  { %4568 = vtanh.f32 %v3204_v59 }
0x47d5   :  { %v4569_v22 = vpop.eup %4568 }
0x47d6   :  { %3207 = vrot.lane.b32.xlu0 %v4569_v22, %s4607_s26  ;;  %s4576_s26 = scalar_lea.vmem %s3307_s19, 32 }
0x47d7   :  { %p4577_p0 = scmp.ne.s32.totalorder %s3307_s19, %s4576_s26  ;;  %p4582_p2 = scmp.lt.s32.totalorder %s4576_s26, %s4576_s26 }
0x47d9   :  { %p4583_p3 = por %p4582_p2, %p4581_p1 }
0x47db   :  { %p4584_p4 = pnand %p4583_p3, %p4577_p0 }
0x4848   :  { %v3208_v41 = vpop.permute.xlu0 %3207 }
0x4849   :  { %v3210_v2 = vmul.f32 %v4567_v31, %v3208_v41 }
0x484b   :  { %3223 = vrot.lane.b32.xlu1 %v3210_v2, %s4608_s27 }
0x48bd   :  { %v3224_v29 = vpop.permute.xlu1 %3223 }
0x48be   :  { %4047 = vmatmul.mubr.msk.f32.vlgmr.msra.gmra.mrb[28].mxu0 %vm3225_vm7, %v3224_v29 }
0x4991   :  { %v3294_v14 = vpop.f32.mrb[28].mxu0 }
0x4992   :  { %v3295_v7 = vadd.f32 %v3373_v25, %v3294_v14  ;;  %v4048_v58 = vpop.f32.mrb[29].mxu0 }
0x4994   :  { %3299 = vst.msk [vmem:[#allocation4] sm:$0x3] %vm3298_vm8, %v3295_v7 }
0x4995   :  { %4587 = shalt.err (!%p4584_p4)
}
0x4996   :  { %s4588_s21 = scalar_lea.hbm %s5508_s9, 32 }
0x4997   :  { %p4589_p5 = scmp.ne.s32.totalorder %s5508_s9, %s4588_s21  ;;  %p4592_p6 = scmp.lt.u32.totalorder %s4588_s21, %s5508_s9 }
0x4999   :  { %p4594_p7 = pnand %p4592_p6, %p4589_p5 }
0x499b   :  { %4597 = shalt.err (!%p4594_p7)
}
0x499c   :  { %3309 = dma.vmem_to_hbm [thread:$0]  %s3307_s19, 32, %s5508_s9, [#allocation5]  }
0x499d   :  { %4598 = dma.done.wait [#allocation5], 32  }
0x499e   :  { %4599 = vsyncadd [#allocation5], 4294967264 }
0x499f   :  { %3313 = vsyncpa [#allocation5], 1 }

</bundles_post_ra>
